<compile_context>
chip_gen: v7x
topology: tpu7x:2x2x1
jax: 0.10.0
libtpu: 0.0.40
codegen_flags: <defaults>
</compile_context>

<pallas_src>
import math

import jax
import jax.numpy as jnp
from jax import lax
from jax.experimental import pallas as pl
from jax.experimental.pallas import tpu as pltpu

# Fully unroll the in-kernel decode loop up to this many steps (straight-line
# code = best LLO scheduling); longer sequences fall back to lax.fori_loop.
_UNROLL_T_MAX = 32


def _make_decoder_kernel(num_layers):
    """Factory: one whole-sequence decode per grid point (one batch tile)."""

    def kernel(*refs):
        n_in = 7 + 2 * num_layers + 2
        (x_ref, enc_ref, vl_ref, h0_ref, c0_ref, wqv_ref, wkv_ref) = refs[:7]
        lstm_w = refs[7:7 + num_layers]
        lstm_b = refs[7 + num_layers:7 + 2 * num_layers]
        wd_ref = refs[7 + 2 * num_layers]
        bd_ref = refs[7 + 2 * num_layers + 1]
        logits_ref, hfin_ref, cfin_ref = refs[n_in:n_in + 3]

        T = x_ref.shape[0]
        H = h0_ref.shape[-1]

        def mm(a, b):
            return jnp.dot(a, b, preferred_element_type=jnp.float32)

        def sigmoid(x):
            # Single-transcendental sigmoid (EUP tanh); identical math.
            return 0.5 * (jnp.tanh(0.5 * x) + 1.0)

        # ---- step-invariant work, hoisted out of the decode loop ------------
        enc = enc_ref[...]                          # (bt, K, H) keys == values
        # Key-side additive-attention term v·(Wk k) with the SequenceMask
        # (-1e6) folded in; both are constant across decode steps.
        # (For very long encoder sequences this is where a K-tiled
        #  online-softmax loop would go; use the MXU form enc @ wkv^T once
        #  K reaches 128+.)
        kscore = jnp.sum(enc * wkv_ref[...][None, :, :], axis=-1)    # (bt, K)
        col = lax.broadcasted_iota(jnp.int32, kscore.shape, 1)
        kscore = jnp.where(col < vl_ref[...], kscore,
                           jnp.float32(-1000000.0))

        wqv = wqv_ref[...]                          # (1, H)  v·Wq (query side)
        w_l = [w[...] for w in lstm_w]              # fused, pre-transposed
        b_l = [b[...] for b in lstm_b]
        wd = wd_ref[...]                            # (H, vocab)
        bd = bd_ref[...]                            # (1, vocab)

        def lstm_cell(gates, c_prev):
            # PyTorch gate order (i, f, g, o), lane slices of the (bt,4H) tile.
            i_g = sigmoid(gates[:, 0 * H:1 * H])
            f_g = sigmoid(gates[:, 1 * H:2 * H])
            g_g = jnp.tanh(gates[:, 2 * H:3 * H])
            o_g = sigmoid(gates[:, 3 * H:4 * H])
            c_new = f_g * c_prev + i_g * g_g
            h_new = o_g * jnp.tanh(c_new)
            return h_new, c_new

        def step(t, carry):
            h, c = carry                            # tuples of (bt, H)
            x_t = x_ref[t]                          # (bt, E) embedded token

            # ---- MLPAttention (linear v => both terms fold to dot products) -
            q = h[num_layers - 1]                   # top-layer hidden = query
            q_score = jnp.sum(q * wqv, axis=-1, keepdims=True)       # (bt, 1)
            scores = q_score + kscore                                # (bt, K)
            m = jnp.max(scores, axis=-1, keepdims=True)
            e = jnp.exp(scores - m)
            denom = jnp.sum(e, axis=-1, keepdims=True)
            w = e * pl.reciprocal(denom, approx=True)
            # TODO(synk): attention dropout omitted (p=0.0 / eval -> identity)
            context = jnp.sum(w[:, :, None] * enc, axis=1)           # (bt, H)

            # ---- stacked LSTM, one fused gate matmul per layer --------------
            inp0 = jnp.concatenate([context, x_t, h[0]], axis=-1)    # (bt,H+E+H)
            g0 = mm(inp0, w_l[0]) + b_l[0]
            h_new0, c_new0 = lstm_cell(g0, c[0])
            new_h, new_c, out_t = [h_new0], [c_new0], h_new0
            for l in range(1, num_layers):
                inp = jnp.concatenate([out_t, h[l]], axis=-1)        # (bt, 2H)
                g = mm(inp, w_l[l]) + b_l[l]
                h_new, c_new = lstm_cell(g, c[l])
                new_h.append(h_new)
                new_c.append(c_new)
                out_t = h_new
            # TODO(synk): LSTM inter-layer dropout omitted (p=0.0 -> identity)

            # ---- vocab projection (lane-dense: vocab multiple of 128) -------
            logits_ref[t] = mm(out_t, wd) + bd
            return tuple(new_h), tuple(new_c)

        carry = (tuple(h0_ref[l] for l in range(num_layers)),
                 tuple(c0_ref[l] for l in range(num_layers)))
        if T <= _UNROLL_T_MAX:
            for t in range(T):                      # fully unrolled recurrence
                carry = step(t, carry)
        else:
            carry = lax.fori_loop(0, T, step, carry)
        h_fin, c_fin = carry

        # Final LSTM state, written exactly once per batch tile.
        for l in range(num_layers):
            hfin_ref[l] = h_fin[l]
            cfin_ref[l] = c_fin[l]

    return kernel


def atten_seq2seq_decoder_forward(params, tokens, state, *, batch_tile=8):
    """Forward pass of AttenSeq2SeqDecoder.

    tokens: (B, T) int32
    state : (enc_outputs (B, K, H), (h0, c0) each (L, B, H), valid_len (B,) or None)
    returns (logits (B, T, vocab), (enc_outputs, (hT, cT), valid_len))
    """
    enc_outputs, (h0, c0), valid_len = state
    B, T = tokens.shape
    _, K, H = enc_outputs.shape
    num_layers = h0.shape[0]
    vocab, E = params["dense_w"].shape[0], params["embedding"].shape[1]

    if valid_len is None:
        valid_len = jnp.full((B,), K, dtype=jnp.int32)
    valid_len = valid_len.astype(jnp.int32)

    # TODO(synk): embedding gather stays in the wrapper (data-dependent gather).
    x_emb = params["embedding"][tokens]                              # (B, T, E)

    # Pad the batch to a multiple of the (sublane-full) batch tile.  Keep
    # bt >= 8 (f32 sublane height); on v7x additionally pick bt so nb = Bp/bt
    # is a multiple of 2 to feed both TensorCores.
    bt = batch_tile
    Bp = ((B + bt - 1) // bt) * bt
    pad = Bp - B
    if pad:
        x_emb = jnp.pad(x_emb, ((0, pad), (0, 0), (0, 0)))
        enc_p = jnp.pad(enc_outputs, ((0, pad), (0, 0), (0, 0)))
        vl_p = jnp.pad(valid_len, (0, pad), constant_values=1)
        h0_p = jnp.pad(h0, ((0, 0), (0, pad), (0, 0)))
        c0_p = jnp.pad(c0, ((0, 0), (0, pad), (0, 0)))
    else:
        enc_p, vl_p, h0_p, c0_p = enc_outputs, valid_len, h0, c0
    nb = Bp // bt

    # Batch-tile layouts (lane-dense trailing dims; time/layer as leading dims).
    x_tiles = jnp.transpose(x_emb.reshape(nb, bt, T, E), (0, 2, 1, 3))  # (nb,T,bt,E)
    enc_tiles = enc_p.reshape(nb, bt, K, H)                             # (nb,bt,K,H)
    vl_tiles = vl_p.reshape(nb, bt, 1)                                  # (nb,bt,1)
    h0_tiles = jnp.transpose(
        jnp.transpose(h0_p, (1, 0, 2)).reshape(nb, bt, num_layers, H),
        (0, 2, 1, 3))                                                   # (nb,L,bt,H)
    c0_tiles = jnp.transpose(
        jnp.transpose(c0_p, (1, 0, 2)).reshape(nb, bt, num_layers, H),
        (0, 2, 1, 3))

    # Fold the (linear, bias-free) additive-attention head once:
    #   v(Wq q + Wk k) = q @ (v Wq)^T + k @ (v Wk)^T
    wqv = params["v_w"] @ params["wq_w"]                                # (1, H)
    wkv = params["v_w"] @ params["wk_w"]                                # (1, H)

    # LSTM weights: concat(W_ih, W_hh) along the input dim and pre-transpose so
    # each layer is ONE row-major matmul into a lane-dense (bt, 4H) gate tile.
    lstm_w_cat = [jnp.concatenate([params["lstm_w_ih"][l],
                                   params["lstm_w_hh"][l]], axis=1).T
                  for l in range(num_layers)]                           # (in_l+H,4H)
    lstm_b_cat = [(params["lstm_b_ih"][l] + params["lstm_b_hh"][l])[None, :]
                  for l in range(num_layers)]                           # (1, 4H)

    wd_t = params["dense_w"].T                                          # (H, vocab)
    bd = params["dense_b"][None, :]                                     # (1, vocab)

    kernel = _make_decoder_kernel(num_layers)

    in_specs = [
        pl.BlockSpec((None, T, bt, E), lambda b: (b, 0, 0, 0)),          # x_emb
        pl.BlockSpec((None, bt, K, H), lambda b: (b, 0, 0, 0)),          # enc K/V
        pl.BlockSpec((None, bt, 1), lambda b: (b, 0, 0)),                # valid_len
        pl.BlockSpec((None, num_layers, bt, H), lambda b: (b, 0, 0, 0)), # h0
        pl.BlockSpec((None, num_layers, bt, H), lambda b: (b, 0, 0, 0)), # c0
        pl.BlockSpec((1, H), lambda b: (0, 0)),                          # v·Wq
        pl.BlockSpec((1, H), lambda b: (0, 0)),                          # v·Wk
    ]
    in_specs += [pl.BlockSpec(w.shape, lambda b: (0, 0)) for w in lstm_w_cat]
    in_specs += [pl.BlockSpec(bb.shape, lambda b: (0, 0)) for bb in lstm_b_cat]
    in_specs += [pl.BlockSpec((H, vocab), lambda b: (0, 0)),             # dense W^T
                 pl.BlockSpec((1, vocab), lambda b: (0, 0))]             # dense b

    out_specs = (
        pl.BlockSpec((None, T, bt, vocab), lambda b: (b, 0, 0, 0)),
        pl.BlockSpec((None, num_layers, bt, H), lambda b: (b, 0, 0, 0)),
        pl.BlockSpec((None, num_layers, bt, H), lambda b: (b, 0, 0, 0)),
    )
    out_shape = (
        jax.ShapeDtypeStruct((nb, T, bt, vocab), jnp.float32),
        jax.ShapeDtypeStruct((nb, num_layers, bt, H), jnp.float32),
        jax.ShapeDtypeStruct((nb, num_layers, bt, H), jnp.float32),
    )

    logits_t, h_t, c_t = pl.pallas_call(
        kernel,
        grid=(nb,),
        in_specs=in_specs,
        out_specs=out_specs,
        out_shape=out_shape,
        compiler_params=pltpu.CompilerParams(
            # The batch-tile axis shards across TensorCores on v7x (megacore);
            # on single-TC v5e/v6e it is just a short serial loop.
            dimension_semantics=("parallel",),
            # Headroom for v7x: 64 MiB physical / 32 MiB default scoped VMEM.
            # Per-tile working set (enc + x + logits + weights, double
            # buffered) is well under 1 MiB at these shapes.
            vmem_limit_bytes=32 * 1024 * 1024),
    )(x_tiles, enc_tiles, vl_tiles, h0_tiles, c0_tiles, wqv, wkv,
      *lstm_w_cat, *lstm_b_cat, wd_t, bd)

    # Un-tile and un-pad.
    logits = jnp.transpose(logits_t, (0, 2, 1, 3)).reshape(Bp, T, vocab)[:B]
    h_fin = jnp.transpose(h_t, (1, 0, 2, 3)).reshape(num_layers, Bp, H)[:, :B]
    c_fin = jnp.transpose(c_t, (1, 0, 2, 3)).reshape(num_layers, Bp, H)[:, :B]
    return logits, (enc_outputs, (h_fin, c_fin), valid_len)


def _reference_forward(params, tokens, enc_outputs, h0, c0, valid_len):
    """Pure-JAX mirror of the PyTorch AttenSeq2SeqDecoder.forward."""
    num_layers = h0.shape[0]
    emb = params["embedding"][tokens]                      # (B, T, E)
    X = jnp.transpose(emb, (1, 0, 2))                      # (T, B, E)
    h, c = h0, c0
    outs = []
    for t in range(X.shape[0]):
        x = X[t]                                           # (B, E)
        query = h[-1][:, None, :]                          # (B, 1, H)
        key = value = enc_outputs                          # (B, K, H)
        # MLPAttention
        qp = query @ params["wq_w"].T                      # (B, 1, U)
        kp = key @ params["wk_w"].T                        # (B, K, U)
        feats = qp[:, :, None, :] + kp[:, None, :, :]      # (B, 1, K, U)
        scores = jnp.squeeze(feats @ params["v_w"].T, -1)  # (B, 1, K)
        # masked softmax (SequenceMask value = -1e6)
        col = jnp.arange(scores.shape[-1])[None, None, :]
        scores = jnp.where(col < valid_len[:, None, None], scores, -1000000.0)
        w = jax.nn.softmax(scores, axis=-1)
        context = w @ value                                # (B, 1, H)
        inp = jnp.concatenate([context[:, 0, :], x], axis=-1)  # (B, H+E)
        new_h, new_c = [], []
        for l in range(num_layers):
            gates = (inp @ params["lstm_w_ih"][l].T + params["lstm_b_ih"][l]
                     + h[l] @ params["lstm_w_hh"][l].T + params["lstm_b_hh"][l])
            i_g, f_g, g_g, o_g = jnp.split(gates, 4, axis=-1)
            i_g = jax.nn.sigmoid(i_g)
            f_g = jax.nn.sigmoid(f_g)
            g_g = jnp.tanh(g_g)
            o_g = jax.nn.sigmoid(o_g)
            c_l = f_g * c[l] + i_g * g_g
            h_l = o_g * jnp.tanh(c_l)
            new_h.append(h_l)
            new_c.append(c_l)
            inp = h_l
        h = jnp.stack(new_h)
        c = jnp.stack(new_c)
        outs.append(inp)
    outs = jnp.stack(outs)                                 # (T, B, H)
    logits = outs @ params["dense_w"].T + params["dense_b"]
    return jnp.transpose(logits, (1, 0, 2)), h, c


if __name__ == "__main__":
    # Small shapes consistent with the module; vocab is a multiple of 128 so the
    # per-step logit store is lane-dense.
    vocab_size, embed_size, num_hiddens, num_layers = 128, 32, 32, 2
    B, T, K = 4, 8, 8

    root = jax.random.PRNGKey(0)
    keys = jax.random.split(root, 24)

    def unif(k, shape, scale):
        return jax.random.uniform(k, shape, jnp.float32, -scale, scale)

    sa = 1.0 / math.sqrt(num_hiddens)
    in_sizes = [embed_size + num_hiddens] + [num_hiddens] * (num_layers - 1)
    params = {
        "embedding": jax.random.normal(keys[0], (vocab_size, embed_size),
                                       jnp.float32),
        "wq_w": unif(keys[1], (num_hiddens, num_hiddens), sa),
        "wk_w": unif(keys[2], (num_hiddens, num_hiddens), sa),
        "v_w": unif(keys[3], (1, num_hiddens), sa),
        "lstm_w_ih": [unif(keys[4 + l], (4 * num_hiddens, in_sizes[l]), sa)
                      for l in range(num_layers)],
        "lstm_w_hh": [unif(keys[8 + l], (4 * num_hiddens, num_hiddens), sa)
                      for l in range(num_layers)],
        "lstm_b_ih": [unif(keys[12 + l], (4 * num_hiddens,), sa)
                      for l in range(num_layers)],
        "lstm_b_hh": [unif(keys[16 + l], (4 * num_hiddens,), sa)
                      for l in range(num_layers)],
        "dense_w": unif(keys[20], (vocab_size, num_hiddens), sa),
        "dense_b": unif(keys[21], (vocab_size,), sa),
    }

    tokens = jax.random.randint(keys[22], (B, T), 0, vocab_size, dtype=jnp.int32)
    ek = jax.random.split(keys[23], 3)
    enc_outputs = jax.random.normal(ek[0], (B, K, num_hiddens), jnp.float32) * 0.5
    h0 = jax.random.normal(ek[1], (num_layers, B, num_hiddens), jnp.float32) * 0.5
    c0 = jax.random.normal(ek[2], (num_layers, B, num_hiddens), jnp.float32) * 0.5
    valid_len = jnp.array([3, 6, 8, 5], dtype=jnp.int32)

    state = (enc_outputs, (h0, c0), valid_len)
    fwd = jax.jit(lambda p, tk, st: atten_seq2seq_decoder_forward(
        p, tk, st, batch_tile=8))
    logits, (_, (h_fin, c_fin), _) = fwd(params, tokens, state)
    logits = jax.block_until_ready(logits)

    ref_logits, ref_h, ref_c = _reference_forward(
        params, tokens, enc_outputs, h0, c0, valid_len)

    assert logits.shape == (B, T, vocab_size)
    assert jnp.allclose(logits, ref_logits, atol=1e-3, rtol=1e-3), (
        "logits mismatch, max abs diff = "
        + str(float(jnp.max(jnp.abs(logits - ref_logits)))))
    assert jnp.allclose(h_fin, ref_h, atol=1e-3, rtol=1e-3), "h state mismatch"
    assert jnp.allclose(c_fin, ref_c, atol=1e-3, rtol=1e-3), "c state mismatch"

    print("KERNEL_OK")
</pallas_src>

<mosaic_0001>
module attributes {stable_mosaic.version = 11 : i64} {
  func.func @kernel(%arg0: i32, %arg1: memref<1x8x8x32xf32, #tpu.memory_space<vmem>>, %arg2: memref<1x8x8x32xf32, #tpu.memory_space<vmem>>, %arg3: memref<1x8x1xi32, #tpu.memory_space<vmem>>, %arg4: memref<1x2x8x32xf32, #tpu.memory_space<vmem>>, %arg5: memref<1x2x8x32xf32, #tpu.memory_space<vmem>>, %arg6: memref<1x32xf32, #tpu.memory_space<vmem>>, %arg7: memref<1x32xf32, #tpu.memory_space<vmem>>, %arg8: memref<96x128xf32, #tpu.memory_space<vmem>>, %arg9: memref<64x128xf32, #tpu.memory_space<vmem>>, %arg10: memref<1x128xf32, #tpu.memory_space<vmem>>, %arg11: memref<1x128xf32, #tpu.memory_space<vmem>>, %arg12: memref<32x128xf32, #tpu.memory_space<vmem>>, %arg13: memref<1x128xf32, #tpu.memory_space<vmem>>, %arg14: memref<1x8x8x128xf32, #tpu.memory_space<vmem>>, %arg15: memref<1x2x8x32xf32, #tpu.memory_space<vmem>>, %arg16: memref<1x2x8x32xf32, #tpu.memory_space<vmem>>) attributes {dimension_semantics = [#tpu.dimension_semantics<parallel>], iteration_bounds = array<i64: 1>, scalar_prefetch = 0 : i64, scratch_operands = 0 : i64, tpu.core_type = #tpu.core_type<tc>, window_params = [{transform_indices = @transform_0, window_bounds = array<i64: 1, 8, 8, 32>}, {transform_indices = @transform_1, window_bounds = array<i64: 1, 8, 8, 32>}, {transform_indices = @transform_2, window_bounds = array<i64: 1, 8, 1>}, {transform_indices = @transform_3, window_bounds = array<i64: 1, 2, 8, 32>}, {transform_indices = @transform_4, window_bounds = array<i64: 1, 2, 8, 32>}, {pipeline_mode = #tpu.pipeline_mode<synchronous>, transform_indices = @transform_5, window_bounds = array<i64: 1, 32>}, {pipeline_mode = #tpu.pipeline_mode<synchronous>, transform_indices = @transform_6, window_bounds = array<i64: 1, 32>}, {pipeline_mode = #tpu.pipeline_mode<synchronous>, transform_indices = @transform_7, window_bounds = array<i64: 96, 128>}, {pipeline_mode = #tpu.pipeline_mode<synchronous>, transform_indices = @transform_8, window_bounds = array<i64: 64, 128>}, {pipeline_mode = #tpu.pipeline_mode<synchronous>, transform_indices = @transform_9, window_bounds = array<i64: 1, 128>}, {pipeline_mode = #tpu.pipeline_mode<synchronous>, transform_indices = @transform_10, window_bounds = array<i64: 1, 128>}, {pipeline_mode = #tpu.pipeline_mode<synchronous>, transform_indices = @transform_11, window_bounds = array<i64: 32, 128>}, {pipeline_mode = #tpu.pipeline_mode<synchronous>, transform_indices = @transform_12, window_bounds = array<i64: 1, 128>}, {transform_indices = @transform_13, window_bounds = array<i64: 1, 8, 8, 128>}, {transform_indices = @transform_14, window_bounds = array<i64: 1, 2, 8, 32>}, {transform_indices = @transform_15, window_bounds = array<i64: 1, 2, 8, 32>}]} {
    %c0 = arith.constant 0 : index
    %c0_0 = arith.constant 0 : index
    %c0_1 = arith.constant 0 : index
    %c0_2 = arith.constant 0 : index
    %0 = vector.load %arg2[%c0, %c0_0, %c0_1, %c0_2] : memref<1x8x8x32xf32, #tpu.memory_space<vmem>>, vector<1x8x8x32xf32>
    %1 = vector.shape_cast %0 : vector<1x8x8x32xf32> to vector<8x8x32xf32>
    %c0_3 = arith.constant 0 : index
    %c0_4 = arith.constant 0 : index
    %2 = vector.load %arg7[%c0_3, %c0_4] : memref<1x32xf32, #tpu.memory_space<vmem>>, vector<1x32xf32>
    %3 = vector.shape_cast %2 : vector<1x32xf32> to vector<1x1x32xf32>
    %4 = vector.broadcast %3 : vector<1x1x32xf32> to vector<8x8x32xf32>
    %5 = arith.mulf %1, %4 : vector<8x8x32xf32>
    %cst = arith.constant dense<0.000000e+00> : vector<8x8xf32>
    %6 = vector.multi_reduction <add>, %5, %cst [2] : vector<8x8x32xf32> to vector<8x8xf32>
    %7 = tpu.iota {dimensions = array<i32: 1>} : vector<8x8xi32>
    %c0_5 = arith.constant 0 : index
    %c0_6 = arith.constant 0 : index
    %c0_7 = arith.constant 0 : index
    %8 = vector.load %arg3[%c0_5, %c0_6, %c0_7] : memref<1x8x1xi32, #tpu.memory_space<vmem>>, vector<1x8x1xi32>
    %9 = vector.shape_cast %8 : vector<1x8x1xi32> to vector<8x1xi32>
    %10 = vector.broadcast %9 : vector<8x1xi32> to vector<8x8xi32>
    %11 = arith.cmpi slt, %7, %10 : vector<8x8xi32>
    %cst_8 = arith.constant -1.000000e+06 : f32
    %12 = vector.broadcast %cst_8 : f32 to vector<8x8xf32>
    %13 = arith.select %11, %6, %12 : vector<8x8xi1>, vector<8x8xf32>
    %c0_9 = arith.constant 0 : index
    %c0_10 = arith.constant 0 : index
    %14 = vector.load %arg6[%c0_9, %c0_10] : memref<1x32xf32, #tpu.memory_space<vmem>>, vector<1x32xf32>
    %c0_11 = arith.constant 0 : index
    %c0_12 = arith.constant 0 : index
    %15 = vector.load %arg8[%c0_11, %c0_12] : memref<96x128xf32, #tpu.memory_space<vmem>>, vector<96x128xf32>
    %c0_13 = arith.constant 0 : index
    %c0_14 = arith.constant 0 : index
    %16 = vector.load %arg9[%c0_13, %c0_14] : memref<64x128xf32, #tpu.memory_space<vmem>>, vector<64x128xf32>
    %c0_15 = arith.constant 0 : index
    %c0_16 = arith.constant 0 : index
    %17 = vector.load %arg10[%c0_15, %c0_16] : memref<1x128xf32, #tpu.memory_space<vmem>>, vector<1x128xf32>
    %c0_17 = arith.constant 0 : index
    %c0_18 = arith.constant 0 : index
    %18 = vector.load %arg11[%c0_17, %c0_18] : memref<1x128xf32, #tpu.memory_space<vmem>>, vector<1x128xf32>
    %c0_19 = arith.constant 0 : index
    %c0_20 = arith.constant 0 : index
    %19 = vector.load %arg12[%c0_19, %c0_20] : memref<32x128xf32, #tpu.memory_space<vmem>>, vector<32x128xf32>
    %c0_21 = arith.constant 0 : index
    %c0_22 = arith.constant 0 : index
    %20 = vector.load %arg13[%c0_21, %c0_22] : memref<1x128xf32, #tpu.memory_space<vmem>>, vector<1x128xf32>
    %c0_23 = arith.constant 0 : index
    %c0_24 = arith.constant 0 : index
    %c0_25 = arith.constant 0 : index
    %c0_26 = arith.constant 0 : index
    %21 = vector.load %arg4[%c0_23, %c0_24, %c0_25, %c0_26] : memref<1x2x8x32xf32, #tpu.memory_space<vmem>>, vector<1x1x8x32xf32>
    %22 = vector.shape_cast %21 : vector<1x1x8x32xf32> to vector<8x32xf32>
    %c0_27 = arith.constant 0 : index
    %c1 = arith.constant 1 : index
    %c0_28 = arith.constant 0 : index
    %c0_29 = arith.constant 0 : index
    %23 = vector.load %arg4[%c0_27, %c1, %c0_28, %c0_29] : memref<1x2x8x32xf32, #tpu.memory_space<vmem>>, vector<1x1x8x32xf32>
    %24 = vector.shape_cast %23 : vector<1x1x8x32xf32> to vector<8x32xf32>
    %c0_30 = arith.constant 0 : index
    %c0_31 = arith.constant 0 : index
    %c0_32 = arith.constant 0 : index
    %c0_33 = arith.constant 0 : index
    %25 = vector.load %arg5[%c0_30, %c0_31, %c0_32, %c0_33] : memref<1x2x8x32xf32, #tpu.memory_space<vmem>>, vector<1x1x8x32xf32>
    %26 = vector.shape_cast %25 : vector<1x1x8x32xf32> to vector<8x32xf32>
    %c0_34 = arith.constant 0 : index
    %c1_35 = arith.constant 1 : index
    %c0_36 = arith.constant 0 : index
    %c0_37 = arith.constant 0 : index
    %27 = vector.load %arg5[%c0_34, %c1_35, %c0_36, %c0_37] : memref<1x2x8x32xf32, #tpu.memory_space<vmem>>, vector<1x1x8x32xf32>
    %28 = vector.shape_cast %27 : vector<1x1x8x32xf32> to vector<8x32xf32>
    %c0_38 = arith.constant 0 : index
    %c0_39 = arith.constant 0 : index
    %c0_40 = arith.constant 0 : index
    %c0_41 = arith.constant 0 : index
    %29 = vector.load %arg1[%c0_38, %c0_39, %c0_40, %c0_41] : memref<1x8x8x32xf32, #tpu.memory_space<vmem>>, vector<1x1x8x32xf32>
    %30 = vector.shape_cast %29 : vector<1x1x8x32xf32> to vector<8x32xf32>
    %31 = vector.broadcast %14 : vector<1x32xf32> to vector<8x32xf32>
    %32 = arith.mulf %24, %31 : vector<8x32xf32>
    %cst_42 = arith.constant dense<0.000000e+00> : vector<8xf32>
    %33 = vector.multi_reduction <add>, %32, %cst_42 [1] : vector<8x32xf32> to vector<8xf32>
    %34 = vector.shape_cast %33 : vector<8xf32> to vector<8x1xf32>
    %35 = vector.broadcast %34 : vector<8x1xf32> to vector<8x8xf32>
    %36 = arith.addf %35, %13 : vector<8x8xf32>
    %cst_43 = arith.constant dense<0xFF800000> : vector<8xf32>
    %37 = vector.multi_reduction <maximumf>, %36, %cst_43 [1] : vector<8x8xf32> to vector<8xf32>
    %38 = vector.shape_cast %37 : vector<8xf32> to vector<8x1xf32>
    %39 = vector.broadcast %38 : vector<8x1xf32> to vector<8x8xf32>
    %40 = arith.subf %36, %39 : vector<8x8xf32>
    %41 = math.exp %40 : vector<8x8xf32>
    %cst_44 = arith.constant dense<0.000000e+00> : vector<8xf32>
    %42 = vector.multi_reduction <add>, %41, %cst_44 [1] : vector<8x8xf32> to vector<8xf32>
    %43 = vector.shape_cast %42 : vector<8xf32> to vector<8x1xf32>
    %44 = tpu.reciprocal %43 {approx = true} : vector<8x1xf32> -> vector<8x1xf32>
    %45 = vector.broadcast %44 : vector<8x1xf32> to vector<8x8xf32>
    %46 = arith.mulf %41, %45 : vector<8x8xf32>
    %47 = vector.shape_cast %46 : vector<8x8xf32> to vector<8x8x1xf32>
    %48 = vector.broadcast %47 : vector<8x8x1xf32> to vector<8x8x32xf32>
    %49 = arith.mulf %48, %1 : vector<8x8x32xf32>
    %cst_45 = arith.constant dense<0.000000e+00> : vector<8x32xf32>
    %50 = vector.multi_reduction <add>, %49, %cst_45 [1] : vector<8x8x32xf32> to vector<8x32xf32>
    %51 = tpu.concatenate %50, %30, %22 in 1 : vector<8x32xf32>, vector<8x32xf32>, vector<8x32xf32> -> vector<8x96xf32>
    %cst_46 = arith.constant dense<0.000000e+00> : vector<8x128xf32>
    %52 = tpu.matmul %51, %15, %cst_46 {dimension_numbers = #tpu.dot_dimension_numbers<[1], [0], [0], [1], [0, 0, 1, 1], [], []>} : vector<8x96xf32>, vector<96x128xf32>, vector<8x128xf32> -> vector<8x128xf32>
    %53 = vector.broadcast %17 : vector<1x128xf32> to vector<8x128xf32>
    %54 = arith.addf %52, %53 : vector<8x128xf32>
    %55 = vector.extract_strided_slice %54 {offsets = [0, 0], sizes = [8, 32], strides = [1, 1]} : vector<8x128xf32> to vector<8x32xf32>
    %cst_47 = arith.constant 5.000000e-01 : f32
    %56 = vector.broadcast %cst_47 : f32 to vector<8x32xf32>
    %57 = arith.mulf %56, %55 : vector<8x32xf32>
    %58 = math.tanh %57 : vector<8x32xf32>
    %cst_48 = arith.constant 1.000000e+00 : f32
    %59 = vector.broadcast %cst_48 : f32 to vector<8x32xf32>
    %60 = arith.addf %58, %59 : vector<8x32xf32>
    %cst_49 = arith.constant 5.000000e-01 : f32
    %61 = vector.broadcast %cst_49 : f32 to vector<8x32xf32>
    %62 = arith.mulf %61, %60 : vector<8x32xf32>
    %63 = vector.extract_strided_slice %54 {offsets = [0, 32], sizes = [8, 32], strides = [1, 1]} : vector<8x128xf32> to vector<8x32xf32>
    %cst_50 = arith.constant 5.000000e-01 : f32
    %64 = vector.broadcast %cst_50 : f32 to vector<8x32xf32>
    %65 = arith.mulf %64, %63 : vector<8x32xf32>
    %66 = math.tanh %65 : vector<8x32xf32>
    %cst_51 = arith.constant 1.000000e+00 : f32
    %67 = vector.broadcast %cst_51 : f32 to vector<8x32xf32>
    %68 = arith.addf %66, %67 : vector<8x32xf32>
    %cst_52 = arith.constant 5.000000e-01 : f32
    %69 = vector.broadcast %cst_52 : f32 to vector<8x32xf32>
    %70 = arith.mulf %69, %68 : vector<8x32xf32>
    %71 = vector.extract_strided_slice %54 {offsets = [0, 64], sizes = [8, 32], strides = [1, 1]} : vector<8x128xf32> to vector<8x32xf32>
    %72 = math.tanh %71 : vector<8x32xf32>
    %73 = vector.extract_strided_slice %54 {offsets = [0, 96], sizes = [8, 32], strides = [1, 1]} : vector<8x128xf32> to vector<8x32xf32>
    %cst_53 = arith.constant 5.000000e-01 : f32
    %74 = vector.broadcast %cst_53 : f32 to vector<8x32xf32>
    %75 = arith.mulf %74, %73 : vector<8x32xf32>
    %76 = math.tanh %75 : vector<8x32xf32>
    %cst_54 = arith.constant 1.000000e+00 : f32
    %77 = vector.broadcast %cst_54 : f32 to vector<8x32xf32>
    %78 = arith.addf %76, %77 : vector<8x32xf32>
    %cst_55 = arith.constant 5.000000e-01 : f32
    %79 = vector.broadcast %cst_55 : f32 to vector<8x32xf32>
    %80 = arith.mulf %79, %78 : vector<8x32xf32>
    %81 = arith.mulf %70, %26 : vector<8x32xf32>
    %82 = arith.mulf %62, %72 : vector<8x32xf32>
    %83 = arith.addf %81, %82 : vector<8x32xf32>
    %84 = math.tanh %83 : vector<8x32xf32>
    %85 = arith.mulf %80, %84 : vector<8x32xf32>
    %86 = tpu.concatenate %85, %24 in 1 : vector<8x32xf32>, vector<8x32xf32> -> vector<8x64xf32>
    %cst_56 = arith.constant dense<0.000000e+00> : vector<8x128xf32>
    %87 = tpu.matmul %86, %16, %cst_56 {dimension_numbers = #tpu.dot_dimension_numbers<[1], [0], [0], [1], [0, 0, 1, 1], [], []>} : vector<8x64xf32>, vector<64x128xf32>, vector<8x128xf32> -> vector<8x128xf32>
    %88 = vector.broadcast %18 : vector<1x128xf32> to vector<8x128xf32>
    %89 = arith.addf %87, %88 : vector<8x128xf32>
    %90 = vector.extract_strided_slice %89 {offsets = [0, 0], sizes = [8, 32], strides = [1, 1]} : vector<8x128xf32> to vector<8x32xf32>
    %cst_57 = arith.constant 5.000000e-01 : f32
    %91 = vector.broadcast %cst_57 : f32 to vector<8x32xf32>
    %92 = arith.mulf %91, %90 : vector<8x32xf32>
    %93 = math.tanh %92 : vector<8x32xf32>
    %cst_58 = arith.constant 1.000000e+00 : f32
    %94 = vector.broadcast %cst_58 : f32 to vector<8x32xf32>
    %95 = arith.addf %93, %94 : vector<8x32xf32>
    %cst_59 = arith.constant 5.000000e-01 : f32
    %96 = vector.broadcast %cst_59 : f32 to vector<8x32xf32>
    %97 = arith.mulf %96, %95 : vector<8x32xf32>
    %98 = vector.extract_strided_slice %89 {offsets = [0, 32], sizes = [8, 32], strides = [1, 1]} : vector<8x128xf32> to vector<8x32xf32>
    %cst_60 = arith.constant 5.000000e-01 : f32
    %99 = vector.broadcast %cst_60 : f32 to vector<8x32xf32>
    %100 = arith.mulf %99, %98 : vector<8x32xf32>
    %101 = math.tanh %100 : vector<8x32xf32>
    %cst_61 = arith.constant 1.000000e+00 : f32
    %102 = vector.broadcast %cst_61 : f32 to vector<8x32xf32>
    %103 = arith.addf %101, %102 : vector<8x32xf32>
    %cst_62 = arith.constant 5.000000e-01 : f32
    %104 = vector.broadcast %cst_62 : f32 to vector<8x32xf32>
    %105 = arith.mulf %104, %103 : vector<8x32xf32>
    %106 = vector.extract_strided_slice %89 {offsets = [0, 64], sizes = [8, 32], strides = [1, 1]} : vector<8x128xf32> to vector<8x32xf32>
    %107 = math.tanh %106 : vector<8x32xf32>
    %108 = vector.extract_strided_slice %89 {offsets = [0, 96], sizes = [8, 32], strides = [1, 1]} : vector<8x128xf32> to vector<8x32xf32>
    %cst_63 = arith.constant 5.000000e-01 : f32
    %109 = vector.broadcast %cst_63 : f32 to vector<8x32xf32>
    %110 = arith.mulf %109, %108 : vector<8x32xf32>
    %111 = math.tanh %110 : vector<8x32xf32>
    %cst_64 = arith.constant 1.000000e+00 : f32
    %112 = vector.broadcast %cst_64 : f32 to vector<8x32xf32>
    %113 = arith.addf %111, %112 : vector<8x32xf32>
    %cst_65 = arith.constant 5.000000e-01 : f32
    %114 = vector.broadcast %cst_65 : f32 to vector<8x32xf32>
    %115 = arith.mulf %114, %113 : vector<8x32xf32>
    %116 = arith.mulf %105, %28 : vector<8x32xf32>
    %117 = arith.mulf %97, %107 : vector<8x32xf32>
    %118 = arith.addf %116, %117 : vector<8x32xf32>
    %119 = math.tanh %118 : vector<8x32xf32>
    %120 = arith.mulf %115, %119 : vector<8x32xf32>
    %cst_66 = arith.constant dense<0.000000e+00> : vector<8x128xf32>
    %121 = tpu.matmul %120, %19, %cst_66 {dimension_numbers = #tpu.dot_dimension_numbers<[1], [0], [0], [1], [0, 0, 1, 1], [], []>} : vector<8x32xf32>, vector<32x128xf32>, vector<8x128xf32> -> vector<8x128xf32>
    %122 = vector.broadcast %20 : vector<1x128xf32> to vector<8x128xf32>
    %123 = arith.addf %121, %122 : vector<8x128xf32>
    %c0_67 = arith.constant 0 : index
    %c0_68 = arith.constant 0 : index
    %c0_69 = arith.constant 0 : index
    %c0_70 = arith.constant 0 : index
    %124 = vector.load %arg14[%c0_67, %c0_68, %c0_69, %c0_70] : memref<1x8x8x128xf32, #tpu.memory_space<vmem>>, vector<1x1x8x128xf32>
    %125 = vector.shape_cast %124 : vector<1x1x8x128xf32> to vector<8x128xf32>
    %126 = vector.shape_cast %123 : vector<8x128xf32> to vector<1x1x8x128xf32>
    tpu.vector_store %arg14[%c0_67, %c0_68, %c0_69, %c0_70], %126 {strides = array<i32>} : memref<1x8x8x128xf32, #tpu.memory_space<vmem>>, vector<1x1x8x128xf32>,
    %c0_71 = arith.constant 0 : index
    %c1_72 = arith.constant 1 : index
    %c0_73 = arith.constant 0 : index
    %c0_74 = arith.constant 0 : index
    %127 = vector.load %arg1[%c0_71, %c1_72, %c0_73, %c0_74] : memref<1x8x8x32xf32, #tpu.memory_space<vmem>>, vector<1x1x8x32xf32>
    %128 = vector.shape_cast %127 : vector<1x1x8x32xf32> to vector<8x32xf32>
    %129 = vector.broadcast %14 : vector<1x32xf32> to vector<8x32xf32>
    %130 = arith.mulf %120, %129 : vector<8x32xf32>
    %cst_75 = arith.constant dense<0.000000e+00> : vector<8xf32>
    %131 = vector.multi_reduction <add>, %130, %cst_75 [1] : vector<8x32xf32> to vector<8xf32>
    %132 = vector.shape_cast %131 : vector<8xf32> to vector<8x1xf32>
    %133 = vector.broadcast %132 : vector<8x1xf32> to vector<8x8xf32>
    %134 = arith.addf %133, %13 : vector<8x8xf32>
    %cst_76 = arith.constant dense<0xFF800000> : vector<8xf32>
    %135 = vector.multi_reduction <maximumf>, %134, %cst_76 [1] : vector<8x8xf32> to vector<8xf32>
    %136 = vector.shape_cast %135 : vector<8xf32> to vector<8x1xf32>
    %137 = vector.broadcast %136 : vector<8x1xf32> to vector<8x8xf32>
    %138 = arith.subf %134, %137 : vector<8x8xf32>
    %139 = math.exp %138 : vector<8x8xf32>
    %cst_77 = arith.constant dense<0.000000e+00> : vector<8xf32>
    %140 = vector.multi_reduction <add>, %139, %cst_77 [1] : vector<8x8xf32> to vector<8xf32>
    %141 = vector.shape_cast %140 : vector<8xf32> to vector<8x1xf32>
    %142 = tpu.reciprocal %141 {approx = true} : vector<8x1xf32> -> vector<8x1xf32>
    %143 = vector.broadcast %142 : vector<8x1xf32> to vector<8x8xf32>
    %144 = arith.mulf %139, %143 : vector<8x8xf32>
    %145 = vector.shape_cast %144 : vector<8x8xf32> to vector<8x8x1xf32>
    %146 = vector.broadcast %145 : vector<8x8x1xf32> to vector<8x8x32xf32>
    %147 = arith.mulf %146, %1 : vector<8x8x32xf32>
    %cst_78 = arith.constant dense<0.000000e+00> : vector<8x32xf32>
    %148 = vector.multi_reduction <add>, %147, %cst_78 [1] : vector<8x8x32xf32> to vector<8x32xf32>
    %149 = tpu.concatenate %148, %128, %85 in 1 : vector<8x32xf32>, vector<8x32xf32>, vector<8x32xf32> -> vector<8x96xf32>
    %cst_79 = arith.constant dense<0.000000e+00> : vector<8x128xf32>
    %150 = tpu.matmul %149, %15, %cst_79 {dimension_numbers = #tpu.dot_dimension_numbers<[1], [0], [0], [1], [0, 0, 1, 1], [], []>} : vector<8x96xf32>, vector<96x128xf32>, vector<8x128xf32> -> vector<8x128xf32>
    %151 = vector.broadcast %17 : vector<1x128xf32> to vector<8x128xf32>
    %152 = arith.addf %150, %151 : vector<8x128xf32>
    %153 = vector.extract_strided_slice %152 {offsets = [0, 0], sizes = [8, 32], strides = [1, 1]} : vector<8x128xf32> to vector<8x32xf32>
    %cst_80 = arith.constant 5.000000e-01 : f32
    %154 = vector.broadcast %cst_80 : f32 to vector<8x32xf32>
    %155 = arith.mulf %154, %153 : vector<8x32xf32>
    %156 = math.tanh %155 : vector<8x32xf32>
    %cst_81 = arith.constant 1.000000e+00 : f32
    %157 = vector.broadcast %cst_81 : f32 to vector<8x32xf32>
    %158 = arith.addf %156, %157 : vector<8x32xf32>
    %cst_82 = arith.constant 5.000000e-01 : f32
    %159 = vector.broadcast %cst_82 : f32 to vector<8x32xf32>
    %160 = arith.mulf %159, %158 : vector<8x32xf32>
    %161 = vector.extract_strided_slice %152 {offsets = [0, 32], sizes = [8, 32], strides = [1, 1]} : vector<8x128xf32> to vector<8x32xf32>
    %cst_83 = arith.constant 5.000000e-01 : f32
    %162 = vector.broadcast %cst_83 : f32 to vector<8x32xf32>
    %163 = arith.mulf %162, %161 : vector<8x32xf32>
    %164 = math.tanh %163 : vector<8x32xf32>
    %cst_84 = arith.constant 1.000000e+00 : f32
    %165 = vector.broadcast %cst_84 : f32 to vector<8x32xf32>
    %166 = arith.addf %164, %165 : vector<8x32xf32>
    %cst_85 = arith.constant 5.000000e-01 : f32
    %167 = vector.broadcast %cst_85 : f32 to vector<8x32xf32>
    %168 = arith.mulf %167, %166 : vector<8x32xf32>
    %169 = vector.extract_strided_slice %152 {offsets = [0, 64], sizes = [8, 32], strides = [1, 1]} : vector<8x128xf32> to vector<8x32xf32>
    %170 = math.tanh %169 : vector<8x32xf32>
    %171 = vector.extract_strided_slice %152 {offsets = [0, 96], sizes = [8, 32], strides = [1, 1]} : vector<8x128xf32> to vector<8x32xf32>
    %cst_86 = arith.constant 5.000000e-01 : f32
    %172 = vector.broadcast %cst_86 : f32 to vector<8x32xf32>
    %173 = arith.mulf %172, %171 : vector<8x32xf32>
    %174 = math.tanh %173 : vector<8x32xf32>
    %cst_87 = arith.constant 1.000000e+00 : f32
    %175 = vector.broadcast %cst_87 : f32 to vector<8x32xf32>
    %176 = arith.addf %174, %175 : vector<8x32xf32>
    %cst_88 = arith.constant 5.000000e-01 : f32
    %177 = vector.broadcast %cst_88 : f32 to vector<8x32xf32>
    %178 = arith.mulf %177, %176 : vector<8x32xf32>
    %179 = arith.mulf %168, %83 : vector<8x32xf32>
    %180 = arith.mulf %160, %170 : vector<8x32xf32>
    %181 = arith.addf %179, %180 : vector<8x32xf32>
    %182 = math.tanh %181 : vector<8x32xf32>
    %183 = arith.mulf %178, %182 : vector<8x32xf32>
    %184 = tpu.concatenate %183, %120 in 1 : vector<8x32xf32>, vector<8x32xf32> -> vector<8x64xf32>
    %cst_89 = arith.constant dense<0.000000e+00> : vector<8x128xf32>
    %185 = tpu.matmul %184, %16, %cst_89 {dimension_numbers = #tpu.dot_dimension_numbers<[1], [0], [0], [1], [0, 0, 1, 1], [], []>} : vector<8x64xf32>, vector<64x128xf32>, vector<8x128xf32> -> vector<8x128xf32>
    %186 = vector.broadcast %18 : vector<1x128xf32> to vector<8x128xf32>
    %187 = arith.addf %185, %186 : vector<8x128xf32>
    %188 = vector.extract_strided_slice %187 {offsets = [0, 0], sizes = [8, 32], strides = [1, 1]} : vector<8x128xf32> to vector<8x32xf32>
    %cst_90 = arith.constant 5.000000e-01 : f32
    %189 = vector.broadcast %cst_90 : f32 to vector<8x32xf32>
    %190 = arith.mulf %189, %188 : vector<8x32xf32>
    %191 = math.tanh %190 : vector<8x32xf32>
    %cst_91 = arith.constant 1.000000e+00 : f32
    %192 = vector.broadcast %cst_91 : f32 to vector<8x32xf32>
    %193 = arith.addf %191, %192 : vector<8x32xf32>
    %cst_92 = arith.constant 5.000000e-01 : f32
    %194 = vector.broadcast %cst_92 : f32 to vector<8x32xf32>
    %195 = arith.mulf %194, %193 : vector<8x32xf32>
    %196 = vector.extract_strided_slice %187 {offsets = [0, 32], sizes = [8, 32], strides = [1, 1]} : vector<8x128xf32> to vector<8x32xf32>
    %cst_93 = arith.constant 5.000000e-01 : f32
    %197 = vector.broadcast %cst_93 : f32 to vector<8x32xf32>
    %198 = arith.mulf %197, %196 : vector<8x32xf32>
    %199 = math.tanh %198 : vector<8x32xf32>
    %cst_94 = arith.constant 1.000000e+00 : f32
    %200 = vector.broadcast %cst_94 : f32 to vector<8x32xf32>
    %201 = arith.addf %199, %200 : vector<8x32xf32>
    %cst_95 = arith.constant 5.000000e-01 : f32
    %202 = vector.broadcast %cst_95 : f32 to vector<8x32xf32>
    %203 = arith.mulf %202, %201 : vector<8x32xf32>
    %204 = vector.extract_strided_slice %187 {offsets = [0, 64], sizes = [8, 32], strides = [1, 1]} : vector<8x128xf32> to vector<8x32xf32>
    %205 = math.tanh %204 : vector<8x32xf32>
    %206 = vector.extract_strided_slice %187 {offsets = [0, 96], sizes = [8, 32], strides = [1, 1]} : vector<8x128xf32> to vector<8x32xf32>
    %cst_96 = arith.constant 5.000000e-01 : f32
    %207 = vector.broadcast %cst_96 : f32 to vector<8x32xf32>
    %208 = arith.mulf %207, %206 : vector<8x32xf32>
    %209 = math.tanh %208 : vector<8x32xf32>
    %cst_97 = arith.constant 1.000000e+00 : f32
    %210 = vector.broadcast %cst_97 : f32 to vector<8x32xf32>
    %211 = arith.addf %209, %210 : vector<8x32xf32>
    %cst_98 = arith.constant 5.000000e-01 : f32
    %212 = vector.broadcast %cst_98 : f32 to vector<8x32xf32>
    %213 = arith.mulf %212, %211 : vector<8x32xf32>
    %214 = arith.mulf %203, %118 : vector<8x32xf32>
    %215 = arith.mulf %195, %205 : vector<8x32xf32>
    %216 = arith.addf %214, %215 : vector<8x32xf32>
    %217 = math.tanh %216 : vector<8x32xf32>
    %218 = arith.mulf %213, %217 : vector<8x32xf32>
    %cst_99 = arith.constant dense<0.000000e+00> : vector<8x128xf32>
    %219 = tpu.matmul %218, %19, %cst_99 {dimension_numbers = #tpu.dot_dimension_numbers<[1], [0], [0], [1], [0, 0, 1, 1], [], []>} : vector<8x32xf32>, vector<32x128xf32>, vector<8x128xf32> -> vector<8x128xf32>
    %220 = vector.broadcast %20 : vector<1x128xf32> to vector<8x128xf32>
    %221 = arith.addf %219, %220 : vector<8x128xf32>
    %c0_100 = arith.constant 0 : index
    %c1_101 = arith.constant 1 : index
    %c0_102 = arith.constant 0 : index
    %c0_103 = arith.constant 0 : index
    %222 = vector.load %arg14[%c0_100, %c1_101, %c0_102, %c0_103] : memref<1x8x8x128xf32, #tpu.memory_space<vmem>>, vector<1x1x8x128xf32>
    %223 = vector.shape_cast %222 : vector<1x1x8x128xf32> to vector<8x128xf32>
    %224 = vector.shape_cast %221 : vector<8x128xf32> to vector<1x1x8x128xf32>
    tpu.vector_store %arg14[%c0_100, %c1_101, %c0_102, %c0_103], %224 {strides = array<i32>} : memref<1x8x8x128xf32, #tpu.memory_space<vmem>>, vector<1x1x8x128xf32>,
    %c0_104 = arith.constant 0 : index
    %c2 = arith.constant 2 : index
    %c0_105 = arith.constant 0 : index
    %c0_106 = arith.constant 0 : index
    %225 = vector.load %arg1[%c0_104, %c2, %c0_105, %c0_106] : memref<1x8x8x32xf32, #tpu.memory_space<vmem>>, vector<1x1x8x32xf32>
    %226 = vector.shape_cast %225 : vector<1x1x8x32xf32> to vector<8x32xf32>
    %227 = vector.broadcast %14 : vector<1x32xf32> to vector<8x32xf32>
    %228 = arith.mulf %218, %227 : vector<8x32xf32>
    %cst_107 = arith.constant dense<0.000000e+00> : vector<8xf32>
    %229 = vector.multi_reduction <add>, %228, %cst_107 [1] : vector<8x32xf32> to vector<8xf32>
    %230 = vector.shape_cast %229 : vector<8xf32> to vector<8x1xf32>
    %231 = vector.broadcast %230 : vector<8x1xf32> to vector<8x8xf32>
    %232 = arith.addf %231, %13 : vector<8x8xf32>
    %cst_108 = arith.constant dense<0xFF800000> : vector<8xf32>
    %233 = vector.multi_reduction <maximumf>, %232, %cst_108 [1] : vector<8x8xf32> to vector<8xf32>
    %234 = vector.shape_cast %233 : vector<8xf32> to vector<8x1xf32>
    %235 = vector.broadcast %234 : vector<8x1xf32> to vector<8x8xf32>
    %236 = arith.subf %232, %235 : vector<8x8xf32>
    %237 = math.exp %236 : vector<8x8xf32>
    %cst_109 = arith.constant dense<0.000000e+00> : vector<8xf32>
    %238 = vector.multi_reduction <add>, %237, %cst_109 [1] : vector<8x8xf32> to vector<8xf32>
    %239 = vector.shape_cast %238 : vector<8xf32> to vector<8x1xf32>
    %240 = tpu.reciprocal %239 {approx = true} : vector<8x1xf32> -> vector<8x1xf32>
    %241 = vector.broadcast %240 : vector<8x1xf32> to vector<8x8xf32>
    %242 = arith.mulf %237, %241 : vector<8x8xf32>
    %243 = vector.shape_cast %242 : vector<8x8xf32> to vector<8x8x1xf32>
    %244 = vector.broadcast %243 : vector<8x8x1xf32> to vector<8x8x32xf32>
    %245 = arith.mulf %244, %1 : vector<8x8x32xf32>
    %cst_110 = arith.constant dense<0.000000e+00> : vector<8x32xf32>
    %246 = vector.multi_reduction <add>, %245, %cst_110 [1] : vector<8x8x32xf32> to vector<8x32xf32>
    %247 = tpu.concatenate %246, %226, %183 in 1 : vector<8x32xf32>, vector<8x32xf32>, vector<8x32xf32> -> vector<8x96xf32>
    %cst_111 = arith.constant dense<0.000000e+00> : vector<8x128xf32>
    %248 = tpu.matmul %247, %15, %cst_111 {dimension_numbers = #tpu.dot_dimension_numbers<[1], [0], [0], [1], [0, 0, 1, 1], [], []>} : vector<8x96xf32>, vector<96x128xf32>, vector<8x128xf32> -> vector<8x128xf32>
    %249 = vector.broadcast %17 : vector<1x128xf32> to vector<8x128xf32>
    %250 = arith.addf %248, %249 : vector<8x128xf32>
    %251 = vector.extract_strided_slice %250 {offsets = [0, 0], sizes = [8, 32], strides = [1, 1]} : vector<8x128xf32> to vector<8x32xf32>
    %cst_112 = arith.constant 5.000000e-01 : f32
    %252 = vector.broadcast %cst_112 : f32 to vector<8x32xf32>
    %253 = arith.mulf %252, %251 : vector<8x32xf32>
    %254 = math.tanh %253 : vector<8x32xf32>
    %cst_113 = arith.constant 1.000000e+00 : f32
    %255 = vector.broadcast %cst_113 : f32 to vector<8x32xf32>
    %256 = arith.addf %254, %255 : vector<8x32xf32>
    %cst_114 = arith.constant 5.000000e-01 : f32
    %257 = vector.broadcast %cst_114 : f32 to vector<8x32xf32>
    %258 = arith.mulf %257, %256 : vector<8x32xf32>
    %259 = vector.extract_strided_slice %250 {offsets = [0, 32], sizes = [8, 32], strides = [1, 1]} : vector<8x128xf32> to vector<8x32xf32>
    %cst_115 = arith.constant 5.000000e-01 : f32
    %260 = vector.broadcast %cst_115 : f32 to vector<8x32xf32>
    %261 = arith.mulf %260, %259 : vector<8x32xf32>
    %262 = math.tanh %261 : vector<8x32xf32>
    %cst_116 = arith.constant 1.000000e+00 : f32
    %263 = vector.broadcast %cst_116 : f32 to vector<8x32xf32>
    %264 = arith.addf %262, %263 : vector<8x32xf32>
    %cst_117 = arith.constant 5.000000e-01 : f32
    %265 = vector.broadcast %cst_117 : f32 to vector<8x32xf32>
    %266 = arith.mulf %265, %264 : vector<8x32xf32>
    %267 = vector.extract_strided_slice %250 {offsets = [0, 64], sizes = [8, 32], strides = [1, 1]} : vector<8x128xf32> to vector<8x32xf32>
    %268 = math.tanh %267 : vector<8x32xf32>
    %269 = vector.extract_strided_slice %250 {offsets = [0, 96], sizes = [8, 32], strides = [1, 1]} : vector<8x128xf32> to vector<8x32xf32>
    %cst_118 = arith.constant 5.000000e-01 : f32
    %270 = vector.broadcast %cst_118 : f32 to vector<8x32xf32>
    %271 = arith.mulf %270, %269 : vector<8x32xf32>
    %272 = math.tanh %271 : vector<8x32xf32>
    %cst_119 = arith.constant 1.000000e+00 : f32
    %273 = vector.broadcast %cst_119 : f32 to vector<8x32xf32>
    %274 = arith.addf %272, %273 : vector<8x32xf32>
    %cst_120 = arith.constant 5.000000e-01 : f32
    %275 = vector.broadcast %cst_120 : f32 to vector<8x32xf32>
    %276 = arith.mulf %275, %274 : vector<8x32xf32>
    %277 = arith.mulf %266, %181 : vector<8x32xf32>
    %278 = arith.mulf %258, %268 : vector<8x32xf32>
    %279 = arith.addf %277, %278 : vector<8x32xf32>
    %280 = math.tanh %279 : vector<8x32xf32>
    %281 = arith.mulf %276, %280 : vector<8x32xf32>
    %282 = tpu.concatenate %281, %218 in 1 : vector<8x32xf32>, vector<8x32xf32> -> vector<8x64xf32>
    %cst_121 = arith.constant dense<0.000000e+00> : vector<8x128xf32>
    %283 = tpu.matmul %282, %16, %cst_121 {dimension_numbers = #tpu.dot_dimension_numbers<[1], [0], [0], [1], [0, 0, 1, 1], [], []>} : vector<8x64xf32>, vector<64x128xf32>, vector<8x128xf32> -> vector<8x128xf32>
    %284 = vector.broadcast %18 : vector<1x128xf32> to vector<8x128xf32>
    %285 = arith.addf %283, %284 : vector<8x128xf32>
    %286 = vector.extract_strided_slice %285 {offsets = [0, 0], sizes = [8, 32], strides = [1, 1]} : vector<8x128xf32> to vector<8x32xf32>
    %cst_122 = arith.constant 5.000000e-01 : f32
    %287 = vector.broadcast %cst_122 : f32 to vector<8x32xf32>
    %288 = arith.mulf %287, %286 : vector<8x32xf32>
    %289 = math.tanh %288 : vector<8x32xf32>
    %cst_123 = arith.constant 1.000000e+00 : f32
    %290 = vector.broadcast %cst_123 : f32 to vector<8x32xf32>
    %291 = arith.addf %289, %290 : vector<8x32xf32>
    %cst_124 = arith.constant 5.000000e-01 : f32
    %292 = vector.broadcast %cst_124 : f32 to vector<8x32xf32>
    %293 = arith.mulf %292, %291 : vector<8x32xf32>
    %294 = vector.extract_strided_slice %285 {offsets = [0, 32], sizes = [8, 32], strides = [1, 1]} : vector<8x128xf32> to vector<8x32xf32>
    %cst_125 = arith.constant 5.000000e-01 : f32
    %295 = vector.broadcast %cst_125 : f32 to vector<8x32xf32>
    %296 = arith.mulf %295, %294 : vector<8x32xf32>
    %297 = math.tanh %296 : vector<8x32xf32>
    %cst_126 = arith.constant 1.000000e+00 : f32
    %298 = vector.broadcast %cst_126 : f32 to vector<8x32xf32>
    %299 = arith.addf %297, %298 : vector<8x32xf32>
    %cst_127 = arith.constant 5.000000e-01 : f32
    %300 = vector.broadcast %cst_127 : f32 to vector<8x32xf32>
    %301 = arith.mulf %300, %299 : vector<8x32xf32>
    %302 = vector.extract_strided_slice %285 {offsets = [0, 64], sizes = [8, 32], strides = [1, 1]} : vector<8x128xf32> to vector<8x32xf32>
    %303 = math.tanh %302 : vector<8x32xf32>
    %304 = vector.extract_strided_slice %285 {offsets = [0, 96], sizes = [8, 32], strides = [1, 1]} : vector<8x128xf32> to vector<8x32xf32>
    %cst_128 = arith.constant 5.000000e-01 : f32
    %305 = vector.broadcast %cst_128 : f32 to vector<8x32xf32>
    %306 = arith.mulf %305, %304 : vector<8x32xf32>
    %307 = math.tanh %306 : vector<8x32xf32>
    %cst_129 = arith.constant 1.000000e+00 : f32
    %308 = vector.broadcast %cst_129 : f32 to vector<8x32xf32>
    %309 = arith.addf %307, %308 : vector<8x32xf32>
    %cst_130 = arith.constant 5.000000e-01 : f32
    %310 = vector.broadcast %cst_130 : f32 to vector<8x32xf32>
    %311 = arith.mulf %310, %309 : vector<8x32xf32>
    %312 = arith.mulf %301, %216 : vector<8x32xf32>
    %313 = arith.mulf %293, %303 : vector<8x32xf32>
    %314 = arith.addf %312, %313 : vector<8x32xf32>
    %315 = math.tanh %314 : vector<8x32xf32>
    %316 = arith.mulf %311, %315 : vector<8x32xf32>
    %cst_131 = arith.constant dense<0.000000e+00> : vector<8x128xf32>
    %317 = tpu.matmul %316, %19, %cst_131 {dimension_numbers = #tpu.dot_dimension_numbers<[1], [0], [0], [1], [0, 0, 1, 1], [], []>} : vector<8x32xf32>, vector<32x128xf32>, vector<8x128xf32> -> vector<8x128xf32>
    %318 = vector.broadcast %20 : vector<1x128xf32> to vector<8x128xf32>
    %319 = arith.addf %317, %318 : vector<8x128xf32>
    %c0_132 = arith.constant 0 : index
    %c2_133 = arith.constant 2 : index
    %c0_134 = arith.constant 0 : index
    %c0_135 = arith.constant 0 : index
    %320 = vector.load %arg14[%c0_132, %c2_133, %c0_134, %c0_135] : memref<1x8x8x128xf32, #tpu.memory_space<vmem>>, vector<1x1x8x128xf32>
    %321 = vector.shape_cast %320 : vector<1x1x8x128xf32> to vector<8x128xf32>
    %322 = vector.shape_cast %319 : vector<8x128xf32> to vector<1x1x8x128xf32>
    tpu.vector_store %arg14[%c0_132, %c2_133, %c0_134, %c0_135], %322 {strides = array<i32>} : memref<1x8x8x128xf32, #tpu.memory_space<vmem>>, vector<1x1x8x128xf32>,
    %c0_136 = arith.constant 0 : index
    %c3 = arith.constant 3 : index
    %c0_137 = arith.constant 0 : index
    %c0_138 = arith.constant 0 : index
    %323 = vector.load %arg1[%c0_136, %c3, %c0_137, %c0_138] : memref<1x8x8x32xf32, #tpu.memory_space<vmem>>, vector<1x1x8x32xf32>
    %324 = vector.shape_cast %323 : vector<1x1x8x32xf32> to vector<8x32xf32>
    %325 = vector.broadcast %14 : vector<1x32xf32> to vector<8x32xf32>
    %326 = arith.mulf %316, %325 : vector<8x32xf32>
    %cst_139 = arith.constant dense<0.000000e+00> : vector<8xf32>
    %327 = vector.multi_reduction <add>, %326, %cst_139 [1] : vector<8x32xf32> to vector<8xf32>
    %328 = vector.shape_cast %327 : vector<8xf32> to vector<8x1xf32>
    %329 = vector.broadcast %328 : vector<8x1xf32> to vector<8x8xf32>
    %330 = arith.addf %329, %13 : vector<8x8xf32>
    %cst_140 = arith.constant dense<0xFF800000> : vector<8xf32>
    %331 = vector.multi_reduction <maximumf>, %330, %cst_140 [1] : vector<8x8xf32> to vector<8xf32>
    %332 = vector.shape_cast %331 : vector<8xf32> to vector<8x1xf32>
    %333 = vector.broadcast %332 : vector<8x1xf32> to vector<8x8xf32>
    %334 = arith.subf %330, %333 : vector<8x8xf32>
    %335 = math.exp %334 : vector<8x8xf32>
    %cst_141 = arith.constant dense<0.000000e+00> : vector<8xf32>
    %336 = vector.multi_reduction <add>, %335, %cst_141 [1] : vector<8x8xf32> to vector<8xf32>
    %337 = vector.shape_cast %336 : vector<8xf32> to vector<8x1xf32>
    %338 = tpu.reciprocal %337 {approx = true} : vector<8x1xf32> -> vector<8x1xf32>
    %339 = vector.broadcast %338 : vector<8x1xf32> to vector<8x8xf32>
    %340 = arith.mulf %335, %339 : vector<8x8xf32>
    %341 = vector.shape_cast %340 : vector<8x8xf32> to vector<8x8x1xf32>
    %342 = vector.broadcast %341 : vector<8x8x1xf32> to vector<8x8x32xf32>
    %343 = arith.mulf %342, %1 : vector<8x8x32xf32>
    %cst_142 = arith.constant dense<0.000000e+00> : vector<8x32xf32>
    %344 = vector.multi_reduction <add>, %343, %cst_142 [1] : vector<8x8x32xf32> to vector<8x32xf32>
    %345 = tpu.concatenate %344, %324, %281 in 1 : vector<8x32xf32>, vector<8x32xf32>, vector<8x32xf32> -> vector<8x96xf32>
    %cst_143 = arith.constant dense<0.000000e+00> : vector<8x128xf32>
    %346 = tpu.matmul %345, %15, %cst_143 {dimension_numbers = #tpu.dot_dimension_numbers<[1], [0], [0], [1], [0, 0, 1, 1], [], []>} : vector<8x96xf32>, vector<96x128xf32>, vector<8x128xf32> -> vector<8x128xf32>
    %347 = vector.broadcast %17 : vector<1x128xf32> to vector<8x128xf32>
    %348 = arith.addf %346, %347 : vector<8x128xf32>
    %349 = vector.extract_strided_slice %348 {offsets = [0, 0], sizes = [8, 32], strides = [1, 1]} : vector<8x128xf32> to vector<8x32xf32>
    %cst_144 = arith.constant 5.000000e-01 : f32
    %350 = vector.broadcast %cst_144 : f32 to vector<8x32xf32>
    %351 = arith.mulf %350, %349 : vector<8x32xf32>
    %352 = math.tanh %351 : vector<8x32xf32>
    %cst_145 = arith.constant 1.000000e+00 : f32
    %353 = vector.broadcast %cst_145 : f32 to vector<8x32xf32>
    %354 = arith.addf %352, %353 : vector<8x32xf32>
    %cst_146 = arith.constant 5.000000e-01 : f32
    %355 = vector.broadcast %cst_146 : f32 to vector<8x32xf32>
    %356 = arith.mulf %355, %354 : vector<8x32xf32>
    %357 = vector.extract_strided_slice %348 {offsets = [0, 32], sizes = [8, 32], strides = [1, 1]} : vector<8x128xf32> to vector<8x32xf32>
    %cst_147 = arith.constant 5.000000e-01 : f32
    %358 = vector.broadcast %cst_147 : f32 to vector<8x32xf32>
    %359 = arith.mulf %358, %357 : vector<8x32xf32>
    %360 = math.tanh %359 : vector<8x32xf32>
    %cst_148 = arith.constant 1.000000e+00 : f32
    %361 = vector.broadcast %cst_148 : f32 to vector<8x32xf32>
    %362 = arith.addf %360, %361 : vector<8x32xf32>
    %cst_149 = arith.constant 5.000000e-01 : f32
    %363 = vector.broadcast %cst_149 : f32 to vector<8x32xf32>
    %364 = arith.mulf %363, %362 : vector<8x32xf32>
    %365 = vector.extract_strided_slice %348 {offsets = [0, 64], sizes = [8, 32], strides = [1, 1]} : vector<8x128xf32> to vector<8x32xf32>
    %366 = math.tanh %365 : vector<8x32xf32>
    %367 = vector.extract_strided_slice %348 {offsets = [0, 96], sizes = [8, 32], strides = [1, 1]} : vector<8x128xf32> to vector<8x32xf32>
    %cst_150 = arith.constant 5.000000e-01 : f32
    %368 = vector.broadcast %cst_150 : f32 to vector<8x32xf32>
    %369 = arith.mulf %368, %367 : vector<8x32xf32>
    %370 = math.tanh %369 : vector<8x32xf32>
    %cst_151 = arith.constant 1.000000e+00 : f32
    %371 = vector.broadcast %cst_151 : f32 to vector<8x32xf32>
    %372 = arith.addf %370, %371 : vector<8x32xf32>
    %cst_152 = arith.constant 5.000000e-01 : f32
    %373 = vector.broadcast %cst_152 : f32 to vector<8x32xf32>
    %374 = arith.mulf %373, %372 : vector<8x32xf32>
    %375 = arith.mulf %364, %279 : vector<8x32xf32>
    %376 = arith.mulf %356, %366 : vector<8x32xf32>
    %377 = arith.addf %375, %376 : vector<8x32xf32>
    %378 = math.tanh %377 : vector<8x32xf32>
    %379 = arith.mulf %374, %378 : vector<8x32xf32>
    %380 = tpu.concatenate %379, %316 in 1 : vector<8x32xf32>, vector<8x32xf32> -> vector<8x64xf32>
    %cst_153 = arith.constant dense<0.000000e+00> : vector<8x128xf32>
    %381 = tpu.matmul %380, %16, %cst_153 {dimension_numbers = #tpu.dot_dimension_numbers<[1], [0], [0], [1], [0, 0, 1, 1], [], []>} : vector<8x64xf32>, vector<64x128xf32>, vector<8x128xf32> -> vector<8x128xf32>
    %382 = vector.broadcast %18 : vector<1x128xf32> to vector<8x128xf32>
    %383 = arith.addf %381, %382 : vector<8x128xf32>
    %384 = vector.extract_strided_slice %383 {offsets = [0, 0], sizes = [8, 32], strides = [1, 1]} : vector<8x128xf32> to vector<8x32xf32>
    %cst_154 = arith.constant 5.000000e-01 : f32
    %385 = vector.broadcast %cst_154 : f32 to vector<8x32xf32>
    %386 = arith.mulf %385, %384 : vector<8x32xf32>
    %387 = math.tanh %386 : vector<8x32xf32>
    %cst_155 = arith.constant 1.000000e+00 : f32
    %388 = vector.broadcast %cst_155 : f32 to vector<8x32xf32>
    %389 = arith.addf %387, %388 : vector<8x32xf32>
    %cst_156 = arith.constant 5.000000e-01 : f32
    %390 = vector.broadcast %cst_156 : f32 to vector<8x32xf32>
    %391 = arith.mulf %390, %389 : vector<8x32xf32>
    %392 = vector.extract_strided_slice %383 {offsets = [0, 32], sizes = [8, 32], strides = [1, 1]} : vector<8x128xf32> to vector<8x32xf32>
    %cst_157 = arith.constant 5.000000e-01 : f32
    %393 = vector.broadcast %cst_157 : f32 to vector<8x32xf32>
    %394 = arith.mulf %393, %392 : vector<8x32xf32>
    %395 = math.tanh %394 : vector<8x32xf32>
    %cst_158 = arith.constant 1.000000e+00 : f32
    %396 = vector.broadcast %cst_158 : f32 to vector<8x32xf32>
    %397 = arith.addf %395, %396 : vector<8x32xf32>
    %cst_159 = arith.constant 5.000000e-01 : f32
    %398 = vector.broadcast %cst_159 : f32 to vector<8x32xf32>
    %399 = arith.mulf %398, %397 : vector<8x32xf32>
    %400 = vector.extract_strided_slice %383 {offsets = [0, 64], sizes = [8, 32], strides = [1, 1]} : vector<8x128xf32> to vector<8x32xf32>
    %401 = math.tanh %400 : vector<8x32xf32>
    %402 = vector.extract_strided_slice %383 {offsets = [0, 96], sizes = [8, 32], strides = [1, 1]} : vector<8x128xf32> to vector<8x32xf32>
    %cst_160 = arith.constant 5.000000e-01 : f32
    %403 = vector.broadcast %cst_160 : f32 to vector<8x32xf32>
    %404 = arith.mulf %403, %402 : vector<8x32xf32>
    %405 = math.tanh %404 : vector<8x32xf32>
    %cst_161 = arith.constant 1.000000e+00 : f32
    %406 = vector.broadcast %cst_161 : f32 to vector<8x32xf32>
    %407 = arith.addf %405, %406 : vector<8x32xf32>
    %cst_162 = arith.constant 5.000000e-01 : f32
    %408 = vector.broadcast %cst_162 : f32 to vector<8x32xf32>
    %409 = arith.mulf %408, %407 : vector<8x32xf32>
    %410 = arith.mulf %399, %314 : vector<8x32xf32>
    %411 = arith.mulf %391, %401 : vector<8x32xf32>
    %412 = arith.addf %410, %411 : vector<8x32xf32>
    %413 = math.tanh %412 : vector<8x32xf32>
    %414 = arith.mulf %409, %413 : vector<8x32xf32>
    %cst_163 = arith.constant dense<0.000000e+00> : vector<8x128xf32>
    %415 = tpu.matmul %414, %19, %cst_163 {dimension_numbers = #tpu.dot_dimension_numbers<[1], [0], [0], [1], [0, 0, 1, 1], [], []>} : vector<8x32xf32>, vector<32x128xf32>, vector<8x128xf32> -> vector<8x128xf32>
    %416 = vector.broadcast %20 : vector<1x128xf32> to vector<8x128xf32>
    %417 = arith.addf %415, %416 : vector<8x128xf32>
    %c0_164 = arith.constant 0 : index
    %c3_165 = arith.constant 3 : index
    %c0_166 = arith.constant 0 : index
    %c0_167 = arith.constant 0 : index
    %418 = vector.load %arg14[%c0_164, %c3_165, %c0_166, %c0_167] : memref<1x8x8x128xf32, #tpu.memory_space<vmem>>, vector<1x1x8x128xf32>
    %419 = vector.shape_cast %418 : vector<1x1x8x128xf32> to vector<8x128xf32>
    %420 = vector.shape_cast %417 : vector<8x128xf32> to vector<1x1x8x128xf32>
    tpu.vector_store %arg14[%c0_164, %c3_165, %c0_166, %c0_167], %420 {strides = array<i32>} : memref<1x8x8x128xf32, #tpu.memory_space<vmem>>, vector<1x1x8x128xf32>,
    %c0_168 = arith.constant 0 : index
    %c4 = arith.constant 4 : index
    %c0_169 = arith.constant 0 : index
    %c0_170 = arith.constant 0 : index
    %421 = vector.load %arg1[%c0_168, %c4, %c0_169, %c0_170] : memref<1x8x8x32xf32, #tpu.memory_space<vmem>>, vector<1x1x8x32xf32>
    %422 = vector.shape_cast %421 : vector<1x1x8x32xf32> to vector<8x32xf32>
    %423 = vector.broadcast %14 : vector<1x32xf32> to vector<8x32xf32>
    %424 = arith.mulf %414, %423 : vector<8x32xf32>
    %cst_171 = arith.constant dense<0.000000e+00> : vector<8xf32>
    %425 = vector.multi_reduction <add>, %424, %cst_171 [1] : vector<8x32xf32> to vector<8xf32>
    %426 = vector.shape_cast %425 : vector<8xf32> to vector<8x1xf32>
    %427 = vector.broadcast %426 : vector<8x1xf32> to vector<8x8xf32>
    %428 = arith.addf %427, %13 : vector<8x8xf32>
    %cst_172 = arith.constant dense<0xFF800000> : vector<8xf32>
    %429 = vector.multi_reduction <maximumf>, %428, %cst_172 [1] : vector<8x8xf32> to vector<8xf32>
    %430 = vector.shape_cast %429 : vector<8xf32> to vector<8x1xf32>
    %431 = vector.broadcast %430 : vector<8x1xf32> to vector<8x8xf32>
    %432 = arith.subf %428, %431 : vector<8x8xf32>
    %433 = math.exp %432 : vector<8x8xf32>
    %cst_173 = arith.constant dense<0.000000e+00> : vector<8xf32>
    %434 = vector.multi_reduction <add>, %433, %cst_173 [1] : vector<8x8xf32> to vector<8xf32>
    %435 = vector.shape_cast %434 : vector<8xf32> to vector<8x1xf32>
    %436 = tpu.reciprocal %435 {approx = true} : vector<8x1xf32> -> vector<8x1xf32>
    %437 = vector.broadcast %436 : vector<8x1xf32> to vector<8x8xf32>
    %438 = arith.mulf %433, %437 : vector<8x8xf32>
    %439 = vector.shape_cast %438 : vector<8x8xf32> to vector<8x8x1xf32>
    %440 = vector.broadcast %439 : vector<8x8x1xf32> to vector<8x8x32xf32>
    %441 = arith.mulf %440, %1 : vector<8x8x32xf32>
    %cst_174 = arith.constant dense<0.000000e+00> : vector<8x32xf32>
    %442 = vector.multi_reduction <add>, %441, %cst_174 [1] : vector<8x8x32xf32> to vector<8x32xf32>
    %443 = tpu.concatenate %442, %422, %379 in 1 : vector<8x32xf32>, vector<8x32xf32>, vector<8x32xf32> -> vector<8x96xf32>
    %cst_175 = arith.constant dense<0.000000e+00> : vector<8x128xf32>
    %444 = tpu.matmul %443, %15, %cst_175 {dimension_numbers = #tpu.dot_dimension_numbers<[1], [0], [0], [1], [0, 0, 1, 1], [], []>} : vector<8x96xf32>, vector<96x128xf32>, vector<8x128xf32> -> vector<8x128xf32>
    %445 = vector.broadcast %17 : vector<1x128xf32> to vector<8x128xf32>
    %446 = arith.addf %444, %445 : vector<8x128xf32>
    %447 = vector.extract_strided_slice %446 {offsets = [0, 0], sizes = [8, 32], strides = [1, 1]} : vector<8x128xf32> to vector<8x32xf32>
    %cst_176 = arith.constant 5.000000e-01 : f32
    %448 = vector.broadcast %cst_176 : f32 to vector<8x32xf32>
    %449 = arith.mulf %448, %447 : vector<8x32xf32>
    %450 = math.tanh %449 : vector<8x32xf32>
    %cst_177 = arith.constant 1.000000e+00 : f32
    %451 = vector.broadcast %cst_177 : f32 to vector<8x32xf32>
    %452 = arith.addf %450, %451 : vector<8x32xf32>
    %cst_178 = arith.constant 5.000000e-01 : f32
    %453 = vector.broadcast %cst_178 : f32 to vector<8x32xf32>
    %454 = arith.mulf %453, %452 : vector<8x32xf32>
    %455 = vector.extract_strided_slice %446 {offsets = [0, 32], sizes = [8, 32], strides = [1, 1]} : vector<8x128xf32> to vector<8x32xf32>
    %cst_179 = arith.constant 5.000000e-01 : f32
    %456 = vector.broadcast %cst_179 : f32 to vector<8x32xf32>
    %457 = arith.mulf %456, %455 : vector<8x32xf32>
    %458 = math.tanh %457 : vector<8x32xf32>
    %cst_180 = arith.constant 1.000000e+00 : f32
    %459 = vector.broadcast %cst_180 : f32 to vector<8x32xf32>
    %460 = arith.addf %458, %459 : vector<8x32xf32>
    %cst_181 = arith.constant 5.000000e-01 : f32
    %461 = vector.broadcast %cst_181 : f32 to vector<8x32xf32>
    %462 = arith.mulf %461, %460 : vector<8x32xf32>
    %463 = vector.extract_strided_slice %446 {offsets = [0, 64], sizes = [8, 32], strides = [1, 1]} : vector<8x128xf32> to vector<8x32xf32>
    %464 = math.tanh %463 : vector<8x32xf32>
    %465 = vector.extract_strided_slice %446 {offsets = [0, 96], sizes = [8, 32], strides = [1, 1]} : vector<8x128xf32> to vector<8x32xf32>
    %cst_182 = arith.constant 5.000000e-01 : f32
    %466 = vector.broadcast %cst_182 : f32 to vector<8x32xf32>
    %467 = arith.mulf %466, %465 : vector<8x32xf32>
    %468 = math.tanh %467 : vector<8x32xf32>
    %cst_183 = arith.constant 1.000000e+00 : f32
    %469 = vector.broadcast %cst_183 : f32 to vector<8x32xf32>
    %470 = arith.addf %468, %469 : vector<8x32xf32>
    %cst_184 = arith.constant 5.000000e-01 : f32
    %471 = vector.broadcast %cst_184 : f32 to vector<8x32xf32>
    %472 = arith.mulf %471, %470 : vector<8x32xf32>
    %473 = arith.mulf %462, %377 : vector<8x32xf32>
    %474 = arith.mulf %454, %464 : vector<8x32xf32>
    %475 = arith.addf %473, %474 : vector<8x32xf32>
    %476 = math.tanh %475 : vector<8x32xf32>
    %477 = arith.mulf %472, %476 : vector<8x32xf32>
    %478 = tpu.concatenate %477, %414 in 1 : vector<8x32xf32>, vector<8x32xf32> -> vector<8x64xf32>
    %cst_185 = arith.constant dense<0.000000e+00> : vector<8x128xf32>
    %479 = tpu.matmul %478, %16, %cst_185 {dimension_numbers = #tpu.dot_dimension_numbers<[1], [0], [0], [1], [0, 0, 1, 1], [], []>} : vector<8x64xf32>, vector<64x128xf32>, vector<8x128xf32> -> vector<8x128xf32>
    %480 = vector.broadcast %18 : vector<1x128xf32> to vector<8x128xf32>
    %481 = arith.addf %479, %480 : vector<8x128xf32>
    %482 = vector.extract_strided_slice %481 {offsets = [0, 0], sizes = [8, 32], strides = [1, 1]} : vector<8x128xf32> to vector<8x32xf32>
    %cst_186 = arith.constant 5.000000e-01 : f32
    %483 = vector.broadcast %cst_186 : f32 to vector<8x32xf32>
    %484 = arith.mulf %483, %482 : vector<8x32xf32>
    %485 = math.tanh %484 : vector<8x32xf32>
    %cst_187 = arith.constant 1.000000e+00 : f32
    %486 = vector.broadcast %cst_187 : f32 to vector<8x32xf32>
    %487 = arith.addf %485, %486 : vector<8x32xf32>
    %cst_188 = arith.constant 5.000000e-01 : f32
    %488 = vector.broadcast %cst_188 : f32 to vector<8x32xf32>
    %489 = arith.mulf %488, %487 : vector<8x32xf32>
    %490 = vector.extract_strided_slice %481 {offsets = [0, 32], sizes = [8, 32], strides = [1, 1]} : vector<8x128xf32> to vector<8x32xf32>
    %cst_189 = arith.constant 5.000000e-01 : f32
    %491 = vector.broadcast %cst_189 : f32 to vector<8x32xf32>
    %492 = arith.mulf %491, %490 : vector<8x32xf32>
    %493 = math.tanh %492 : vector<8x32xf32>
    %cst_190 = arith.constant 1.000000e+00 : f32
    %494 = vector.broadcast %cst_190 : f32 to vector<8x32xf32>
    %495 = arith.addf %493, %494 : vector<8x32xf32>
    %cst_191 = arith.constant 5.000000e-01 : f32
    %496 = vector.broadcast %cst_191 : f32 to vector<8x32xf32>
    %497 = arith.mulf %496, %495 : vector<8x32xf32>
    %498 = vector.extract_strided_slice %481 {offsets = [0, 64], sizes = [8, 32], strides = [1, 1]} : vector<8x128xf32> to vector<8x32xf32>
    %499 = math.tanh %498 : vector<8x32xf32>
    %500 = vector.extract_strided_slice %481 {offsets = [0, 96], sizes = [8, 32], strides = [1, 1]} : vector<8x128xf32> to vector<8x32xf32>
    %cst_192 = arith.constant 5.000000e-01 : f32
    %501 = vector.broadcast %cst_192 : f32 to vector<8x32xf32>
    %502 = arith.mulf %501, %500 : vector<8x32xf32>
    %503 = math.tanh %502 : vector<8x32xf32>
    %cst_193 = arith.constant 1.000000e+00 : f32
    %504 = vector.broadcast %cst_193 : f32 to vector<8x32xf32>
    %505 = arith.addf %503, %504 : vector<8x32xf32>
    %cst_194 = arith.constant 5.000000e-01 : f32
    %506 = vector.broadcast %cst_194 : f32 to vector<8x32xf32>
    %507 = arith.mulf %506, %505 : vector<8x32xf32>
    %508 = arith.mulf %497, %412 : vector<8x32xf32>
    %509 = arith.mulf %489, %499 : vector<8x32xf32>
    %510 = arith.addf %508, %509 : vector<8x32xf32>
    %511 = math.tanh %510 : vector<8x32xf32>
    %512 = arith.mulf %507, %511 : vector<8x32xf32>
    %cst_195 = arith.constant dense<0.000000e+00> : vector<8x128xf32>
    %513 = tpu.matmul %512, %19, %cst_195 {dimension_numbers = #tpu.dot_dimension_numbers<[1], [0], [0], [1], [0, 0, 1, 1], [], []>} : vector<8x32xf32>, vector<32x128xf32>, vector<8x128xf32> -> vector<8x128xf32>
    %514 = vector.broadcast %20 : vector<1x128xf32> to vector<8x128xf32>
    %515 = arith.addf %513, %514 : vector<8x128xf32>
    %c0_196 = arith.constant 0 : index
    %c4_197 = arith.constant 4 : index
    %c0_198 = arith.constant 0 : index
    %c0_199 = arith.constant 0 : index
    %516 = vector.load %arg14[%c0_196, %c4_197, %c0_198, %c0_199] : memref<1x8x8x128xf32, #tpu.memory_space<vmem>>, vector<1x1x8x128xf32>
    %517 = vector.shape_cast %516 : vector<1x1x8x128xf32> to vector<8x128xf32>
    %518 = vector.shape_cast %515 : vector<8x128xf32> to vector<1x1x8x128xf32>
    tpu.vector_store %arg14[%c0_196, %c4_197, %c0_198, %c0_199], %518 {strides = array<i32>} : memref<1x8x8x128xf32, #tpu.memory_space<vmem>>, vector<1x1x8x128xf32>,
    %c0_200 = arith.constant 0 : index
    %c5 = arith.constant 5 : index
    %c0_201 = arith.constant 0 : index
    %c0_202 = arith.constant 0 : index
    %519 = vector.load %arg1[%c0_200, %c5, %c0_201, %c0_202] : memref<1x8x8x32xf32, #tpu.memory_space<vmem>>, vector<1x1x8x32xf32>
    %520 = vector.shape_cast %519 : vector<1x1x8x32xf32> to vector<8x32xf32>
    %521 = vector.broadcast %14 : vector<1x32xf32> to vector<8x32xf32>
    %522 = arith.mulf %512, %521 : vector<8x32xf32>
    %cst_203 = arith.constant dense<0.000000e+00> : vector<8xf32>
    %523 = vector.multi_reduction <add>, %522, %cst_203 [1] : vector<8x32xf32> to vector<8xf32>
    %524 = vector.shape_cast %523 : vector<8xf32> to vector<8x1xf32>
    %525 = vector.broadcast %524 : vector<8x1xf32> to vector<8x8xf32>
    %526 = arith.addf %525, %13 : vector<8x8xf32>
    %cst_204 = arith.constant dense<0xFF800000> : vector<8xf32>
    %527 = vector.multi_reduction <maximumf>, %526, %cst_204 [1] : vector<8x8xf32> to vector<8xf32>
    %528 = vector.shape_cast %527 : vector<8xf32> to vector<8x1xf32>
    %529 = vector.broadcast %528 : vector<8x1xf32> to vector<8x8xf32>
    %530 = arith.subf %526, %529 : vector<8x8xf32>
    %531 = math.exp %530 : vector<8x8xf32>
    %cst_205 = arith.constant dense<0.000000e+00> : vector<8xf32>
    %532 = vector.multi_reduction <add>, %531, %cst_205 [1] : vector<8x8xf32> to vector<8xf32>
    %533 = vector.shape_cast %532 : vector<8xf32> to vector<8x1xf32>
    %534 = tpu.reciprocal %533 {approx = true} : vector<8x1xf32> -> vector<8x1xf32>
    %535 = vector.broadcast %534 : vector<8x1xf32> to vector<8x8xf32>
    %536 = arith.mulf %531, %535 : vector<8x8xf32>
    %537 = vector.shape_cast %536 : vector<8x8xf32> to vector<8x8x1xf32>
    %538 = vector.broadcast %537 : vector<8x8x1xf32> to vector<8x8x32xf32>
    %539 = arith.mulf %538, %1 : vector<8x8x32xf32>
    %cst_206 = arith.constant dense<0.000000e+00> : vector<8x32xf32>
    %540 = vector.multi_reduction <add>, %539, %cst_206 [1] : vector<8x8x32xf32> to vector<8x32xf32>
    %541 = tpu.concatenate %540, %520, %477 in 1 : vector<8x32xf32>, vector<8x32xf32>, vector<8x32xf32> -> vector<8x96xf32>
    %cst_207 = arith.constant dense<0.000000e+00> : vector<8x128xf32>
    %542 = tpu.matmul %541, %15, %cst_207 {dimension_numbers = #tpu.dot_dimension_numbers<[1], [0], [0], [1], [0, 0, 1, 1], [], []>} : vector<8x96xf32>, vector<96x128xf32>, vector<8x128xf32> -> vector<8x128xf32>
    %543 = vector.broadcast %17 : vector<1x128xf32> to vector<8x128xf32>
    %544 = arith.addf %542, %543 : vector<8x128xf32>
    %545 = vector.extract_strided_slice %544 {offsets = [0, 0], sizes = [8, 32], strides = [1, 1]} : vector<8x128xf32> to vector<8x32xf32>
    %cst_208 = arith.constant 5.000000e-01 : f32
    %546 = vector.broadcast %cst_208 : f32 to vector<8x32xf32>
    %547 = arith.mulf %546, %545 : vector<8x32xf32>
    %548 = math.tanh %547 : vector<8x32xf32>
    %cst_209 = arith.constant 1.000000e+00 : f32
    %549 = vector.broadcast %cst_209 : f32 to vector<8x32xf32>
    %550 = arith.addf %548, %549 : vector<8x32xf32>
    %cst_210 = arith.constant 5.000000e-01 : f32
    %551 = vector.broadcast %cst_210 : f32 to vector<8x32xf32>
    %552 = arith.mulf %551, %550 : vector<8x32xf32>
    %553 = vector.extract_strided_slice %544 {offsets = [0, 32], sizes = [8, 32], strides = [1, 1]} : vector<8x128xf32> to vector<8x32xf32>
    %cst_211 = arith.constant 5.000000e-01 : f32
    %554 = vector.broadcast %cst_211 : f32 to vector<8x32xf32>
    %555 = arith.mulf %554, %553 : vector<8x32xf32>
    %556 = math.tanh %555 : vector<8x32xf32>
    %cst_212 = arith.constant 1.000000e+00 : f32
    %557 = vector.broadcast %cst_212 : f32 to vector<8x32xf32>
    %558 = arith.addf %556, %557 : vector<8x32xf32>
    %cst_213 = arith.constant 5.000000e-01 : f32
    %559 = vector.broadcast %cst_213 : f32 to vector<8x32xf32>
    %560 = arith.mulf %559, %558 : vector<8x32xf32>
    %561 = vector.extract_strided_slice %544 {offsets = [0, 64], sizes = [8, 32], strides = [1, 1]} : vector<8x128xf32> to vector<8x32xf32>
    %562 = math.tanh %561 : vector<8x32xf32>
    %563 = vector.extract_strided_slice %544 {offsets = [0, 96], sizes = [8, 32], strides = [1, 1]} : vector<8x128xf32> to vector<8x32xf32>
    %cst_214 = arith.constant 5.000000e-01 : f32
    %564 = vector.broadcast %cst_214 : f32 to vector<8x32xf32>
    %565 = arith.mulf %564, %563 : vector<8x32xf32>
    %566 = math.tanh %565 : vector<8x32xf32>
    %cst_215 = arith.constant 1.000000e+00 : f32
    %567 = vector.broadcast %cst_215 : f32 to vector<8x32xf32>
    %568 = arith.addf %566, %567 : vector<8x32xf32>
    %cst_216 = arith.constant 5.000000e-01 : f32
    %569 = vector.broadcast %cst_216 : f32 to vector<8x32xf32>
    %570 = arith.mulf %569, %568 : vector<8x32xf32>
    %571 = arith.mulf %560, %475 : vector<8x32xf32>
    %572 = arith.mulf %552, %562 : vector<8x32xf32>
    %573 = arith.addf %571, %572 : vector<8x32xf32>
    %574 = math.tanh %573 : vector<8x32xf32>
    %575 = arith.mulf %570, %574 : vector<8x32xf32>
    %576 = tpu.concatenate %575, %512 in 1 : vector<8x32xf32>, vector<8x32xf32> -> vector<8x64xf32>
    %cst_217 = arith.constant dense<0.000000e+00> : vector<8x128xf32>
    %577 = tpu.matmul %576, %16, %cst_217 {dimension_numbers = #tpu.dot_dimension_numbers<[1], [0], [0], [1], [0, 0, 1, 1], [], []>} : vector<8x64xf32>, vector<64x128xf32>, vector<8x128xf32> -> vector<8x128xf32>
    %578 = vector.broadcast %18 : vector<1x128xf32> to vector<8x128xf32>
    %579 = arith.addf %577, %578 : vector<8x128xf32>
    %580 = vector.extract_strided_slice %579 {offsets = [0, 0], sizes = [8, 32], strides = [1, 1]} : vector<8x128xf32> to vector<8x32xf32>
    %cst_218 = arith.constant 5.000000e-01 : f32
    %581 = vector.broadcast %cst_218 : f32 to vector<8x32xf32>
    %582 = arith.mulf %581, %580 : vector<8x32xf32>
    %583 = math.tanh %582 : vector<8x32xf32>
    %cst_219 = arith.constant 1.000000e+00 : f32
    %584 = vector.broadcast %cst_219 : f32 to vector<8x32xf32>
    %585 = arith.addf %583, %584 : vector<8x32xf32>
    %cst_220 = arith.constant 5.000000e-01 : f32
    %586 = vector.broadcast %cst_220 : f32 to vector<8x32xf32>
    %587 = arith.mulf %586, %585 : vector<8x32xf32>
    %588 = vector.extract_strided_slice %579 {offsets = [0, 32], sizes = [8, 32], strides = [1, 1]} : vector<8x128xf32> to vector<8x32xf32>
    %cst_221 = arith.constant 5.000000e-01 : f32
    %589 = vector.broadcast %cst_221 : f32 to vector<8x32xf32>
    %590 = arith.mulf %589, %588 : vector<8x32xf32>
    %591 = math.tanh %590 : vector<8x32xf32>
    %cst_222 = arith.constant 1.000000e+00 : f32
    %592 = vector.broadcast %cst_222 : f32 to vector<8x32xf32>
    %593 = arith.addf %591, %592 : vector<8x32xf32>
    %cst_223 = arith.constant 5.000000e-01 : f32
    %594 = vector.broadcast %cst_223 : f32 to vector<8x32xf32>
    %595 = arith.mulf %594, %593 : vector<8x32xf32>
    %596 = vector.extract_strided_slice %579 {offsets = [0, 64], sizes = [8, 32], strides = [1, 1]} : vector<8x128xf32> to vector<8x32xf32>
    %597 = math.tanh %596 : vector<8x32xf32>
    %598 = vector.extract_strided_slice %579 {offsets = [0, 96], sizes = [8, 32], strides = [1, 1]} : vector<8x128xf32> to vector<8x32xf32>
    %cst_224 = arith.constant 5.000000e-01 : f32
    %599 = vector.broadcast %cst_224 : f32 to vector<8x32xf32>
    %600 = arith.mulf %599, %598 : vector<8x32xf32>
    %601 = math.tanh %600 : vector<8x32xf32>
    %cst_225 = arith.constant 1.000000e+00 : f32
    %602 = vector.broadcast %cst_225 : f32 to vector<8x32xf32>
    %603 = arith.addf %601, %602 : vector<8x32xf32>
    %cst_226 = arith.constant 5.000000e-01 : f32
    %604 = vector.broadcast %cst_226 : f32 to vector<8x32xf32>
    %605 = arith.mulf %604, %603 : vector<8x32xf32>
    %606 = arith.mulf %595, %510 : vector<8x32xf32>
    %607 = arith.mulf %587, %597 : vector<8x32xf32>
    %608 = arith.addf %606, %607 : vector<8x32xf32>
    %609 = math.tanh %608 : vector<8x32xf32>
    %610 = arith.mulf %605, %609 : vector<8x32xf32>
    %cst_227 = arith.constant dense<0.000000e+00> : vector<8x128xf32>
    %611 = tpu.matmul %610, %19, %cst_227 {dimension_numbers = #tpu.dot_dimension_numbers<[1], [0], [0], [1], [0, 0, 1, 1], [], []>} : vector<8x32xf32>, vector<32x128xf32>, vector<8x128xf32> -> vector<8x128xf32>
    %612 = vector.broadcast %20 : vector<1x128xf32> to vector<8x128xf32>
    %613 = arith.addf %611, %612 : vector<8x128xf32>
    %c0_228 = arith.constant 0 : index
    %c5_229 = arith.constant 5 : index
    %c0_230 = arith.constant 0 : index
    %c0_231 = arith.constant 0 : index
    %614 = vector.load %arg14[%c0_228, %c5_229, %c0_230, %c0_231] : memref<1x8x8x128xf32, #tpu.memory_space<vmem>>, vector<1x1x8x128xf32>
    %615 = vector.shape_cast %614 : vector<1x1x8x128xf32> to vector<8x128xf32>
    %616 = vector.shape_cast %613 : vector<8x128xf32> to vector<1x1x8x128xf32>
    tpu.vector_store %arg14[%c0_228, %c5_229, %c0_230, %c0_231], %616 {strides = array<i32>} : memref<1x8x8x128xf32, #tpu.memory_space<vmem>>, vector<1x1x8x128xf32>,
    %c0_232 = arith.constant 0 : index
    %c6 = arith.constant 6 : index
    %c0_233 = arith.constant 0 : index
    %c0_234 = arith.constant 0 : index
    %617 = vector.load %arg1[%c0_232, %c6, %c0_233, %c0_234] : memref<1x8x8x32xf32, #tpu.memory_space<vmem>>, vector<1x1x8x32xf32>
    %618 = vector.shape_cast %617 : vector<1x1x8x32xf32> to vector<8x32xf32>
    %619 = vector.broadcast %14 : vector<1x32xf32> to vector<8x32xf32>
    %620 = arith.mulf %610, %619 : vector<8x32xf32>
    %cst_235 = arith.constant dense<0.000000e+00> : vector<8xf32>
    %621 = vector.multi_reduction <add>, %620, %cst_235 [1] : vector<8x32xf32> to vector<8xf32>
    %622 = vector.shape_cast %621 : vector<8xf32> to vector<8x1xf32>
    %623 = vector.broadcast %622 : vector<8x1xf32> to vector<8x8xf32>
    %624 = arith.addf %623, %13 : vector<8x8xf32>
    %cst_236 = arith.constant dense<0xFF800000> : vector<8xf32>
    %625 = vector.multi_reduction <maximumf>, %624, %cst_236 [1] : vector<8x8xf32> to vector<8xf32>
    %626 = vector.shape_cast %625 : vector<8xf32> to vector<8x1xf32>
    %627 = vector.broadcast %626 : vector<8x1xf32> to vector<8x8xf32>
    %628 = arith.subf %624, %627 : vector<8x8xf32>
    %629 = math.exp %628 : vector<8x8xf32>
    %cst_237 = arith.constant dense<0.000000e+00> : vector<8xf32>
    %630 = vector.multi_reduction <add>, %629, %cst_237 [1] : vector<8x8xf32> to vector<8xf32>
    %631 = vector.shape_cast %630 : vector<8xf32> to vector<8x1xf32>
    %632 = tpu.reciprocal %631 {approx = true} : vector<8x1xf32> -> vector<8x1xf32>
    %633 = vector.broadcast %632 : vector<8x1xf32> to vector<8x8xf32>
    %634 = arith.mulf %629, %633 : vector<8x8xf32>
    %635 = vector.shape_cast %634 : vector<8x8xf32> to vector<8x8x1xf32>
    %636 = vector.broadcast %635 : vector<8x8x1xf32> to vector<8x8x32xf32>
    %637 = arith.mulf %636, %1 : vector<8x8x32xf32>
    %cst_238 = arith.constant dense<0.000000e+00> : vector<8x32xf32>
    %638 = vector.multi_reduction <add>, %637, %cst_238 [1] : vector<8x8x32xf32> to vector<8x32xf32>
    %639 = tpu.concatenate %638, %618, %575 in 1 : vector<8x32xf32>, vector<8x32xf32>, vector<8x32xf32> -> vector<8x96xf32>
    %cst_239 = arith.constant dense<0.000000e+00> : vector<8x128xf32>
    %640 = tpu.matmul %639, %15, %cst_239 {dimension_numbers = #tpu.dot_dimension_numbers<[1], [0], [0], [1], [0, 0, 1, 1], [], []>} : vector<8x96xf32>, vector<96x128xf32>, vector<8x128xf32> -> vector<8x128xf32>
    %641 = vector.broadcast %17 : vector<1x128xf32> to vector<8x128xf32>
    %642 = arith.addf %640, %641 : vector<8x128xf32>
    %643 = vector.extract_strided_slice %642 {offsets = [0, 0], sizes = [8, 32], strides = [1, 1]} : vector<8x128xf32> to vector<8x32xf32>
    %cst_240 = arith.constant 5.000000e-01 : f32
    %644 = vector.broadcast %cst_240 : f32 to vector<8x32xf32>
    %645 = arith.mulf %644, %643 : vector<8x32xf32>
    %646 = math.tanh %645 : vector<8x32xf32>
    %cst_241 = arith.constant 1.000000e+00 : f32
    %647 = vector.broadcast %cst_241 : f32 to vector<8x32xf32>
    %648 = arith.addf %646, %647 : vector<8x32xf32>
    %cst_242 = arith.constant 5.000000e-01 : f32
    %649 = vector.broadcast %cst_242 : f32 to vector<8x32xf32>
    %650 = arith.mulf %649, %648 : vector<8x32xf32>
    %651 = vector.extract_strided_slice %642 {offsets = [0, 32], sizes = [8, 32], strides = [1, 1]} : vector<8x128xf32> to vector<8x32xf32>
    %cst_243 = arith.constant 5.000000e-01 : f32
    %652 = vector.broadcast %cst_243 : f32 to vector<8x32xf32>
    %653 = arith.mulf %652, %651 : vector<8x32xf32>
    %654 = math.tanh %653 : vector<8x32xf32>
    %cst_244 = arith.constant 1.000000e+00 : f32
    %655 = vector.broadcast %cst_244 : f32 to vector<8x32xf32>
    %656 = arith.addf %654, %655 : vector<8x32xf32>
    %cst_245 = arith.constant 5.000000e-01 : f32
    %657 = vector.broadcast %cst_245 : f32 to vector<8x32xf32>
    %658 = arith.mulf %657, %656 : vector<8x32xf32>
    %659 = vector.extract_strided_slice %642 {offsets = [0, 64], sizes = [8, 32], strides = [1, 1]} : vector<8x128xf32> to vector<8x32xf32>
    %660 = math.tanh %659 : vector<8x32xf32>
    %661 = vector.extract_strided_slice %642 {offsets = [0, 96], sizes = [8, 32], strides = [1, 1]} : vector<8x128xf32> to vector<8x32xf32>
    %cst_246 = arith.constant 5.000000e-01 : f32
    %662 = vector.broadcast %cst_246 : f32 to vector<8x32xf32>
    %663 = arith.mulf %662, %661 : vector<8x32xf32>
    %664 = math.tanh %663 : vector<8x32xf32>
    %cst_247 = arith.constant 1.000000e+00 : f32
    %665 = vector.broadcast %cst_247 : f32 to vector<8x32xf32>
    %666 = arith.addf %664, %665 : vector<8x32xf32>
    %cst_248 = arith.constant 5.000000e-01 : f32
    %667 = vector.broadcast %cst_248 : f32 to vector<8x32xf32>
    %668 = arith.mulf %667, %666 : vector<8x32xf32>
    %669 = arith.mulf %658, %573 : vector<8x32xf32>
    %670 = arith.mulf %650, %660 : vector<8x32xf32>
    %671 = arith.addf %669, %670 : vector<8x32xf32>
    %672 = math.tanh %671 : vector<8x32xf32>
    %673 = arith.mulf %668, %672 : vector<8x32xf32>
    %674 = tpu.concatenate %673, %610 in 1 : vector<8x32xf32>, vector<8x32xf32> -> vector<8x64xf32>
    %cst_249 = arith.constant dense<0.000000e+00> : vector<8x128xf32>
    %675 = tpu.matmul %674, %16, %cst_249 {dimension_numbers = #tpu.dot_dimension_numbers<[1], [0], [0], [1], [0, 0, 1, 1], [], []>} : vector<8x64xf32>, vector<64x128xf32>, vector<8x128xf32> -> vector<8x128xf32>
    %676 = vector.broadcast %18 : vector<1x128xf32> to vector<8x128xf32>
    %677 = arith.addf %675, %676 : vector<8x128xf32>
    %678 = vector.extract_strided_slice %677 {offsets = [0, 0], sizes = [8, 32], strides = [1, 1]} : vector<8x128xf32> to vector<8x32xf32>
    %cst_250 = arith.constant 5.000000e-01 : f32
    %679 = vector.broadcast %cst_250 : f32 to vector<8x32xf32>
    %680 = arith.mulf %679, %678 : vector<8x32xf32>
    %681 = math.tanh %680 : vector<8x32xf32>
    %cst_251 = arith.constant 1.000000e+00 : f32
    %682 = vector.broadcast %cst_251 : f32 to vector<8x32xf32>
    %683 = arith.addf %681, %682 : vector<8x32xf32>
    %cst_252 = arith.constant 5.000000e-01 : f32
    %684 = vector.broadcast %cst_252 : f32 to vector<8x32xf32>
    %685 = arith.mulf %684, %683 : vector<8x32xf32>
    %686 = vector.extract_strided_slice %677 {offsets = [0, 32], sizes = [8, 32], strides = [1, 1]} : vector<8x128xf32> to vector<8x32xf32>
    %cst_253 = arith.constant 5.000000e-01 : f32
    %687 = vector.broadcast %cst_253 : f32 to vector<8x32xf32>
    %688 = arith.mulf %687, %686 : vector<8x32xf32>
    %689 = math.tanh %688 : vector<8x32xf32>
    %cst_254 = arith.constant 1.000000e+00 : f32
    %690 = vector.broadcast %cst_254 : f32 to vector<8x32xf32>
    %691 = arith.addf %689, %690 : vector<8x32xf32>
    %cst_255 = arith.constant 5.000000e-01 : f32
    %692 = vector.broadcast %cst_255 : f32 to vector<8x32xf32>
    %693 = arith.mulf %692, %691 : vector<8x32xf32>
    %694 = vector.extract_strided_slice %677 {offsets = [0, 64], sizes = [8, 32], strides = [1, 1]} : vector<8x128xf32> to vector<8x32xf32>
    %695 = math.tanh %694 : vector<8x32xf32>
    %696 = vector.extract_strided_slice %677 {offsets = [0, 96], sizes = [8, 32], strides = [1, 1]} : vector<8x128xf32> to vector<8x32xf32>
    %cst_256 = arith.constant 5.000000e-01 : f32
    %697 = vector.broadcast %cst_256 : f32 to vector<8x32xf32>
    %698 = arith.mulf %697, %696 : vector<8x32xf32>
    %699 = math.tanh %698 : vector<8x32xf32>
    %cst_257 = arith.constant 1.000000e+00 : f32
    %700 = vector.broadcast %cst_257 : f32 to vector<8x32xf32>
    %701 = arith.addf %699, %700 : vector<8x32xf32>
    %cst_258 = arith.constant 5.000000e-01 : f32
    %702 = vector.broadcast %cst_258 : f32 to vector<8x32xf32>
    %703 = arith.mulf %702, %701 : vector<8x32xf32>
    %704 = arith.mulf %693, %608 : vector<8x32xf32>
    %705 = arith.mulf %685, %695 : vector<8x32xf32>
    %706 = arith.addf %704, %705 : vector<8x32xf32>
    %707 = math.tanh %706 : vector<8x32xf32>
    %708 = arith.mulf %703, %707 : vector<8x32xf32>
    %cst_259 = arith.constant dense<0.000000e+00> : vector<8x128xf32>
    %709 = tpu.matmul %708, %19, %cst_259 {dimension_numbers = #tpu.dot_dimension_numbers<[1], [0], [0], [1], [0, 0, 1, 1], [], []>} : vector<8x32xf32>, vector<32x128xf32>, vector<8x128xf32> -> vector<8x128xf32>
    %710 = vector.broadcast %20 : vector<1x128xf32> to vector<8x128xf32>
    %711 = arith.addf %709, %710 : vector<8x128xf32>
    %c0_260 = arith.constant 0 : index
    %c6_261 = arith.constant 6 : index
    %c0_262 = arith.constant 0 : index
    %c0_263 = arith.constant 0 : index
    %712 = vector.load %arg14[%c0_260, %c6_261, %c0_262, %c0_263] : memref<1x8x8x128xf32, #tpu.memory_space<vmem>>, vector<1x1x8x128xf32>
    %713 = vector.shape_cast %712 : vector<1x1x8x128xf32> to vector<8x128xf32>
    %714 = vector.shape_cast %711 : vector<8x128xf32> to vector<1x1x8x128xf32>
    tpu.vector_store %arg14[%c0_260, %c6_261, %c0_262, %c0_263], %714 {strides = array<i32>} : memref<1x8x8x128xf32, #tpu.memory_space<vmem>>, vector<1x1x8x128xf32>,
    %c0_264 = arith.constant 0 : index
    %c7 = arith.constant 7 : index
    %c0_265 = arith.constant 0 : index
    %c0_266 = arith.constant 0 : index
    %715 = vector.load %arg1[%c0_264, %c7, %c0_265, %c0_266] : memref<1x8x8x32xf32, #tpu.memory_space<vmem>>, vector<1x1x8x32xf32>
    %716 = vector.shape_cast %715 : vector<1x1x8x32xf32> to vector<8x32xf32>
    %717 = vector.broadcast %14 : vector<1x32xf32> to vector<8x32xf32>
    %718 = arith.mulf %708, %717 : vector<8x32xf32>
    %cst_267 = arith.constant dense<0.000000e+00> : vector<8xf32>
    %719 = vector.multi_reduction <add>, %718, %cst_267 [1] : vector<8x32xf32> to vector<8xf32>
    %720 = vector.shape_cast %719 : vector<8xf32> to vector<8x1xf32>
    %721 = vector.broadcast %720 : vector<8x1xf32> to vector<8x8xf32>
    %722 = arith.addf %721, %13 : vector<8x8xf32>
    %cst_268 = arith.constant dense<0xFF800000> : vector<8xf32>
    %723 = vector.multi_reduction <maximumf>, %722, %cst_268 [1] : vector<8x8xf32> to vector<8xf32>
    %724 = vector.shape_cast %723 : vector<8xf32> to vector<8x1xf32>
    %725 = vector.broadcast %724 : vector<8x1xf32> to vector<8x8xf32>
    %726 = arith.subf %722, %725 : vector<8x8xf32>
    %727 = math.exp %726 : vector<8x8xf32>
    %cst_269 = arith.constant dense<0.000000e+00> : vector<8xf32>
    %728 = vector.multi_reduction <add>, %727, %cst_269 [1] : vector<8x8xf32> to vector<8xf32>
    %729 = vector.shape_cast %728 : vector<8xf32> to vector<8x1xf32>
    %730 = tpu.reciprocal %729 {approx = true} : vector<8x1xf32> -> vector<8x1xf32>
    %731 = vector.broadcast %730 : vector<8x1xf32> to vector<8x8xf32>
    %732 = arith.mulf %727, %731 : vector<8x8xf32>
    %733 = vector.shape_cast %732 : vector<8x8xf32> to vector<8x8x1xf32>
    %734 = vector.broadcast %733 : vector<8x8x1xf32> to vector<8x8x32xf32>
    %735 = arith.mulf %734, %1 : vector<8x8x32xf32>
    %cst_270 = arith.constant dense<0.000000e+00> : vector<8x32xf32>
    %736 = vector.multi_reduction <add>, %735, %cst_270 [1] : vector<8x8x32xf32> to vector<8x32xf32>
    %737 = tpu.concatenate %736, %716, %673 in 1 : vector<8x32xf32>, vector<8x32xf32>, vector<8x32xf32> -> vector<8x96xf32>
    %cst_271 = arith.constant dense<0.000000e+00> : vector<8x128xf32>
    %738 = tpu.matmul %737, %15, %cst_271 {dimension_numbers = #tpu.dot_dimension_numbers<[1], [0], [0], [1], [0, 0, 1, 1], [], []>} : vector<8x96xf32>, vector<96x128xf32>, vector<8x128xf32> -> vector<8x128xf32>
    %739 = vector.broadcast %17 : vector<1x128xf32> to vector<8x128xf32>
    %740 = arith.addf %738, %739 : vector<8x128xf32>
    %741 = vector.extract_strided_slice %740 {offsets = [0, 0], sizes = [8, 32], strides = [1, 1]} : vector<8x128xf32> to vector<8x32xf32>
    %cst_272 = arith.constant 5.000000e-01 : f32
    %742 = vector.broadcast %cst_272 : f32 to vector<8x32xf32>
    %743 = arith.mulf %742, %741 : vector<8x32xf32>
    %744 = math.tanh %743 : vector<8x32xf32>
    %cst_273 = arith.constant 1.000000e+00 : f32
    %745 = vector.broadcast %cst_273 : f32 to vector<8x32xf32>
    %746 = arith.addf %744, %745 : vector<8x32xf32>
    %cst_274 = arith.constant 5.000000e-01 : f32
    %747 = vector.broadcast %cst_274 : f32 to vector<8x32xf32>
    %748 = arith.mulf %747, %746 : vector<8x32xf32>
    %749 = vector.extract_strided_slice %740 {offsets = [0, 32], sizes = [8, 32], strides = [1, 1]} : vector<8x128xf32> to vector<8x32xf32>
    %cst_275 = arith.constant 5.000000e-01 : f32
    %750 = vector.broadcast %cst_275 : f32 to vector<8x32xf32>
    %751 = arith.mulf %750, %749 : vector<8x32xf32>
    %752 = math.tanh %751 : vector<8x32xf32>
    %cst_276 = arith.constant 1.000000e+00 : f32
    %753 = vector.broadcast %cst_276 : f32 to vector<8x32xf32>
    %754 = arith.addf %752, %753 : vector<8x32xf32>
    %cst_277 = arith.constant 5.000000e-01 : f32
    %755 = vector.broadcast %cst_277 : f32 to vector<8x32xf32>
    %756 = arith.mulf %755, %754 : vector<8x32xf32>
    %757 = vector.extract_strided_slice %740 {offsets = [0, 64], sizes = [8, 32], strides = [1, 1]} : vector<8x128xf32> to vector<8x32xf32>
    %758 = math.tanh %757 : vector<8x32xf32>
    %759 = vector.extract_strided_slice %740 {offsets = [0, 96], sizes = [8, 32], strides = [1, 1]} : vector<8x128xf32> to vector<8x32xf32>
    %cst_278 = arith.constant 5.000000e-01 : f32
    %760 = vector.broadcast %cst_278 : f32 to vector<8x32xf32>
    %761 = arith.mulf %760, %759 : vector<8x32xf32>
    %762 = math.tanh %761 : vector<8x32xf32>
    %cst_279 = arith.constant 1.000000e+00 : f32
    %763 = vector.broadcast %cst_279 : f32 to vector<8x32xf32>
    %764 = arith.addf %762, %763 : vector<8x32xf32>
    %cst_280 = arith.constant 5.000000e-01 : f32
    %765 = vector.broadcast %cst_280 : f32 to vector<8x32xf32>
    %766 = arith.mulf %765, %764 : vector<8x32xf32>
    %767 = arith.mulf %756, %671 : vector<8x32xf32>
    %768 = arith.mulf %748, %758 : vector<8x32xf32>
    %769 = arith.addf %767, %768 : vector<8x32xf32>
    %770 = math.tanh %769 : vector<8x32xf32>
    %771 = arith.mulf %766, %770 : vector<8x32xf32>
    %772 = tpu.concatenate %771, %708 in 1 : vector<8x32xf32>, vector<8x32xf32> -> vector<8x64xf32>
    %cst_281 = arith.constant dense<0.000000e+00> : vector<8x128xf32>
    %773 = tpu.matmul %772, %16, %cst_281 {dimension_numbers = #tpu.dot_dimension_numbers<[1], [0], [0], [1], [0, 0, 1, 1], [], []>} : vector<8x64xf32>, vector<64x128xf32>, vector<8x128xf32> -> vector<8x128xf32>
    %774 = vector.broadcast %18 : vector<1x128xf32> to vector<8x128xf32>
    %775 = arith.addf %773, %774 : vector<8x128xf32>
    %776 = vector.extract_strided_slice %775 {offsets = [0, 0], sizes = [8, 32], strides = [1, 1]} : vector<8x128xf32> to vector<8x32xf32>
    %cst_282 = arith.constant 5.000000e-01 : f32
    %777 = vector.broadcast %cst_282 : f32 to vector<8x32xf32>
    %778 = arith.mulf %777, %776 : vector<8x32xf32>
    %779 = math.tanh %778 : vector<8x32xf32>
    %cst_283 = arith.constant 1.000000e+00 : f32
    %780 = vector.broadcast %cst_283 : f32 to vector<8x32xf32>
    %781 = arith.addf %779, %780 : vector<8x32xf32>
    %cst_284 = arith.constant 5.000000e-01 : f32
    %782 = vector.broadcast %cst_284 : f32 to vector<8x32xf32>
    %783 = arith.mulf %782, %781 : vector<8x32xf32>
    %784 = vector.extract_strided_slice %775 {offsets = [0, 32], sizes = [8, 32], strides = [1, 1]} : vector<8x128xf32> to vector<8x32xf32>
    %cst_285 = arith.constant 5.000000e-01 : f32
    %785 = vector.broadcast %cst_285 : f32 to vector<8x32xf32>
    %786 = arith.mulf %785, %784 : vector<8x32xf32>
    %787 = math.tanh %786 : vector<8x32xf32>
    %cst_286 = arith.constant 1.000000e+00 : f32
    %788 = vector.broadcast %cst_286 : f32 to vector<8x32xf32>
    %789 = arith.addf %787, %788 : vector<8x32xf32>
    %cst_287 = arith.constant 5.000000e-01 : f32
    %790 = vector.broadcast %cst_287 : f32 to vector<8x32xf32>
    %791 = arith.mulf %790, %789 : vector<8x32xf32>
    %792 = vector.extract_strided_slice %775 {offsets = [0, 64], sizes = [8, 32], strides = [1, 1]} : vector<8x128xf32> to vector<8x32xf32>
    %793 = math.tanh %792 : vector<8x32xf32>
    %794 = vector.extract_strided_slice %775 {offsets = [0, 96], sizes = [8, 32], strides = [1, 1]} : vector<8x128xf32> to vector<8x32xf32>
    %cst_288 = arith.constant 5.000000e-01 : f32
    %795 = vector.broadcast %cst_288 : f32 to vector<8x32xf32>
    %796 = arith.mulf %795, %794 : vector<8x32xf32>
    %797 = math.tanh %796 : vector<8x32xf32>
    %cst_289 = arith.constant 1.000000e+00 : f32
    %798 = vector.broadcast %cst_289 : f32 to vector<8x32xf32>
    %799 = arith.addf %797, %798 : vector<8x32xf32>
    %cst_290 = arith.constant 5.000000e-01 : f32
    %800 = vector.broadcast %cst_290 : f32 to vector<8x32xf32>
    %801 = arith.mulf %800, %799 : vector<8x32xf32>
    %802 = arith.mulf %791, %706 : vector<8x32xf32>
    %803 = arith.mulf %783, %793 : vector<8x32xf32>
    %804 = arith.addf %802, %803 : vector<8x32xf32>
    %805 = math.tanh %804 : vector<8x32xf32>
    %806 = arith.mulf %801, %805 : vector<8x32xf32>
    %cst_291 = arith.constant dense<0.000000e+00> : vector<8x128xf32>
    %807 = tpu.matmul %806, %19, %cst_291 {dimension_numbers = #tpu.dot_dimension_numbers<[1], [0], [0], [1], [0, 0, 1, 1], [], []>} : vector<8x32xf32>, vector<32x128xf32>, vector<8x128xf32> -> vector<8x128xf32>
    %808 = vector.broadcast %20 : vector<1x128xf32> to vector<8x128xf32>
    %809 = arith.addf %807, %808 : vector<8x128xf32>
    %c0_292 = arith.constant 0 : index
    %c7_293 = arith.constant 7 : index
    %c0_294 = arith.constant 0 : index
    %c0_295 = arith.constant 0 : index
    %810 = vector.load %arg14[%c0_292, %c7_293, %c0_294, %c0_295] : memref<1x8x8x128xf32, #tpu.memory_space<vmem>>, vector<1x1x8x128xf32>
    %811 = vector.shape_cast %810 : vector<1x1x8x128xf32> to vector<8x128xf32>
    %812 = vector.shape_cast %809 : vector<8x128xf32> to vector<1x1x8x128xf32>
    tpu.vector_store %arg14[%c0_292, %c7_293, %c0_294, %c0_295], %812 {strides = array<i32>} : memref<1x8x8x128xf32, #tpu.memory_space<vmem>>, vector<1x1x8x128xf32>,
    %c0_296 = arith.constant 0 : index
    %c0_297 = arith.constant 0 : index
    %c0_298 = arith.constant 0 : index
    %c0_299 = arith.constant 0 : index
    %813 = vector.load %arg15[%c0_296, %c0_297, %c0_298, %c0_299] : memref<1x2x8x32xf32, #tpu.memory_space<vmem>>, vector<1x1x8x32xf32>
    %814 = vector.shape_cast %813 : vector<1x1x8x32xf32> to vector<8x32xf32>
    %815 = vector.shape_cast %771 : vector<8x32xf32> to vector<1x1x8x32xf32>
    tpu.vector_store %arg15[%c0_296, %c0_297, %c0_298, %c0_299], %815 {strides = array<i32>} : memref<1x2x8x32xf32, #tpu.memory_space<vmem>>, vector<1x1x8x32xf32>,
    %c0_300 = arith.constant 0 : index
    %c0_301 = arith.constant 0 : index
    %c0_302 = arith.constant 0 : index
    %c0_303 = arith.constant 0 : index
    %816 = vector.load %arg16[%c0_300, %c0_301, %c0_302, %c0_303] : memref<1x2x8x32xf32, #tpu.memory_space<vmem>>, vector<1x1x8x32xf32>
    %817 = vector.shape_cast %816 : vector<1x1x8x32xf32> to vector<8x32xf32>
    %818 = vector.shape_cast %769 : vector<8x32xf32> to vector<1x1x8x32xf32>
    tpu.vector_store %arg16[%c0_300, %c0_301, %c0_302, %c0_303], %818 {strides = array<i32>} : memref<1x2x8x32xf32, #tpu.memory_space<vmem>>, vector<1x1x8x32xf32>,
    %c0_304 = arith.constant 0 : index
    %c1_305 = arith.constant 1 : index
    %c0_306 = arith.constant 0 : index
    %c0_307 = arith.constant 0 : index
    %819 = vector.load %arg15[%c0_304, %c1_305, %c0_306, %c0_307] : memref<1x2x8x32xf32, #tpu.memory_space<vmem>>, vector<1x1x8x32xf32>
    %820 = vector.shape_cast %819 : vector<1x1x8x32xf32> to vector<8x32xf32>
    %821 = vector.shape_cast %806 : vector<8x32xf32> to vector<1x1x8x32xf32>
    tpu.vector_store %arg15[%c0_304, %c1_305, %c0_306, %c0_307], %821 {strides = array<i32>} : memref<1x2x8x32xf32, #tpu.memory_space<vmem>>, vector<1x1x8x32xf32>,
    %c0_308 = arith.constant 0 : index
    %c1_309 = arith.constant 1 : index
    %c0_310 = arith.constant 0 : index
    %c0_311 = arith.constant 0 : index
    %822 = vector.load %arg16[%c0_308, %c1_309, %c0_310, %c0_311] : memref<1x2x8x32xf32, #tpu.memory_space<vmem>>, vector<1x1x8x32xf32>
    %823 = vector.shape_cast %822 : vector<1x1x8x32xf32> to vector<8x32xf32>
    %824 = vector.shape_cast %804 : vector<8x32xf32> to vector<1x1x8x32xf32>
    tpu.vector_store %arg16[%c0_308, %c1_309, %c0_310, %c0_311], %824 {strides = array<i32>} : memref<1x2x8x32xf32, #tpu.memory_space<vmem>>, vector<1x1x8x32xf32>,
    return
  }
  func.func @transform_0(%arg0: i32) -> (i32, i32, i32, i32) {
    %c0_i32 = arith.constant 0 : i32
    %c0_i32_0 = arith.constant 0 : i32
    %c0_i32_1 = arith.constant 0 : i32
    %c0_i32_2 = arith.constant 0 : i32
    return %arg0, %c0_i32, %c0_i32_0, %c0_i32_1 : i32, i32, i32, i32
  }
  func.func @transform_1(%arg0: i32) -> (i32, i32, i32, i32) {
    %c0_i32 = arith.constant 0 : i32
    %c0_i32_0 = arith.constant 0 : i32
    %c0_i32_1 = arith.constant 0 : i32
    %c0_i32_2 = arith.constant 0 : i32
    return %arg0, %c0_i32, %c0_i32_0, %c0_i32_1 : i32, i32, i32, i32
  }
  func.func @transform_2(%arg0: i32) -> (i32, i32, i32) {
    %c0_i32 = arith.constant 0 : i32
    %c0_i32_0 = arith.constant 0 : i32
    %c0_i32_1 = arith.constant 0 : i32
    return %arg0, %c0_i32, %c0_i32_0 : i32, i32, i32
  }
  func.func @transform_3(%arg0: i32) -> (i32, i32, i32, i32) {
    %c0_i32 = arith.constant 0 : i32
    %c0_i32_0 = arith.constant 0 : i32
    %c0_i32_1 = arith.constant 0 : i32
    %c0_i32_2 = arith.constant 0 : i32
    return %arg0, %c0_i32, %c0_i32_0, %c0_i32_1 : i32, i32, i32, i32
  }
  func.func @transform_4(%arg0: i32) -> (i32, i32, i32, i32) {
    %c0_i32 = arith.constant 0 : i32
    %c0_i32_0 = arith.constant 0 : i32
    %c0_i32_1 = arith.constant 0 : i32
    %c0_i32_2 = arith.constant 0 : i32
    return %arg0, %c0_i32, %c0_i32_0, %c0_i32_1 : i32, i32, i32, i32
  }
  func.func @transform_5(%arg0: i32) -> (i32, i32) {
    %c0_i32 = arith.constant 0 : i32
    %c0_i32_0 = arith.constant 0 : i32
    %c0_i32_1 = arith.constant 0 : i32
    return %c0_i32, %c0_i32_0 : i32, i32
  }
  func.func @transform_6(%arg0: i32) -> (i32, i32) {
    %c0_i32 = arith.constant 0 : i32
    %c0_i32_0 = arith.constant 0 : i32
    %c0_i32_1 = arith.constant 0 : i32
    return %c0_i32, %c0_i32_0 : i32, i32
  }
  func.func @transform_7(%arg0: i32) -> (i32, i32) {
    %c0_i32 = arith.constant 0 : i32
    %c0_i32_0 = arith.constant 0 : i32
    %c0_i32_1 = arith.constant 0 : i32
    return %c0_i32, %c0_i32_0 : i32, i32
  }
  func.func @transform_8(%arg0: i32) -> (i32, i32) {
    %c0_i32 = arith.constant 0 : i32
    %c0_i32_0 = arith.constant 0 : i32
    %c0_i32_1 = arith.constant 0 : i32
    return %c0_i32, %c0_i32_0 : i32, i32
  }
  func.func @transform_9(%arg0: i32) -> (i32, i32) {
    %c0_i32 = arith.constant 0 : i32
    %c0_i32_0 = arith.constant 0 : i32
    %c0_i32_1 = arith.constant 0 : i32
    return %c0_i32, %c0_i32_0 : i32, i32
  }
  func.func @transform_10(%arg0: i32) -> (i32, i32) {
    %c0_i32 = arith.constant 0 : i32
    %c0_i32_0 = arith.constant 0 : i32
    %c0_i32_1 = arith.constant 0 : i32
    return %c0_i32, %c0_i32_0 : i32, i32
  }
  func.func @transform_11(%arg0: i32) -> (i32, i32) {
    %c0_i32 = arith.constant 0 : i32
    %c0_i32_0 = arith.constant 0 : i32
    %c0_i32_1 = arith.constant 0 : i32
    return %c0_i32, %c0_i32_0 : i32, i32
  }
  func.func @transform_12(%arg0: i32) -> (i32, i32) {
    %c0_i32 = arith.constant 0 : i32
    %c0_i32_0 = arith.constant 0 : i32
    %c0_i32_1 = arith.constant 0 : i32
    return %c0_i32, %c0_i32_0 : i32, i32
  }
  func.func @transform_13(%arg0: i32) -> (i32, i32, i32, i32) {
    %c0_i32 = arith.constant 0 : i32
    %c0_i32_0 = arith.constant 0 : i32
    %c0_i32_1 = arith.constant 0 : i32
    %c0_i32_2 = arith.constant 0 : i32
    return %arg0, %c0_i32, %c0_i32_0, %c0_i32_1 : i32, i32, i32, i32
  }
  func.func @transform_14(%arg0: i32) -> (i32, i32, i32, i32) {
    %c0_i32 = arith.constant 0 : i32
    %c0_i32_0 = arith.constant 0 : i32
    %c0_i32_1 = arith.constant 0 : i32
    %c0_i32_2 = arith.constant 0 : i32
    return %arg0, %c0_i32, %c0_i32_0, %c0_i32_1 : i32, i32, i32, i32
  }
  func.func @transform_15(%arg0: i32) -> (i32, i32, i32, i32) {
    %c0_i32 = arith.constant 0 : i32
    %c0_i32_0 = arith.constant 0 : i32
    %c0_i32_1 = arith.constant 0 : i32
    %c0_i32_2 = arith.constant 0 : i32
    return %arg0, %c0_i32, %c0_i32_0, %c0_i32_1 : i32, i32, i32, i32
  }
}

</mosaic_0001>

<bundles_post_ra>
// kernel: _lambda_.1
= control target key start
LH: loop header
LB: loop body
LE: loop exit
PB: predicated region body
PF: predicated region fallthrough
CT: control target
= control target key end

     0   :  { %vm70_vm0 = vcmask 261120   ;;  %v4955_v3 = vmov 0   ;;  %v95_v31 = vlaneseq  ;;  %vm142_vm1 = vcmask 1041409   ;;  %s4957_s18 = smov 32   ;;  %s4958_s20 = smov 64   ;;  %s6264_s1 = inlined_call_operand.vmem [shape: f32[1,8,8,32], index: 1, kind: input, shape index: {}]   ;;  %s6265_s6 = inlined_call_operand.vmem [shape: f32[1,32], index: 6, kind: input, shape index: {}]   ;;  %s6266_s3 = inlined_call_operand.vmem [shape: f32[1,2,8,32], index: 3, kind: input, shape index: {}]   ;;  %s6267_s5 = inlined_call_operand.vmem [shape: f32[1,32], index: 5, kind: input, shape index: {}]   ;;  %s6268_s2 = inlined_call_operand.vmem [shape: s32[1,8,1], index: 2, kind: input, shape index: {}]   ;;  %s6269_s7 = inlined_call_operand.vmem [shape: f32[96,128], index: 7, kind: input, shape index: {}]   ;;  %s6270_s0 = inlined_call_operand.vmem [shape: f32[1,8,8,32], index: 0, kind: input, shape index: {}]   ;;  %s6271_s4 = inlined_call_operand.vmem [shape: f32[1,2,8,32], index: 4, kind: input, shape index: {}]   ;;  %s6272_s9 = inlined_call_operand.vmem [shape: f32[1,128], index: 9, kind: input, shape index: {}]   ;;  %s6273_s8 = inlined_call_operand.vmem [shape: f32[64,128], index: 8, kind: input, shape index: {}]   ;;  %s6274_s10 = inlined_call_operand.vmem [shape: f32[1,128], index: 10, kind: input, shape index: {}]   ;;  %s6275_s11 = inlined_call_operand.vmem [shape: f32[32,128], index: 11, kind: input, shape index: {}]   ;;  %s6276_s12 = inlined_call_operand.vmem [shape: f32[1,128], index: 12, kind: input, shape index: {}]   ;;  %s6277_s13 = inlined_call_operand.vmem [shape: f32[1,8,8,128], index: 13, kind: output, shape index: {0}]   ;;  %s6278_s14 = inlined_call_operand.vmem [shape: f32[1,2,8,32], index: 14, kind: output, shape index: {1}]   ;;  %s6279_s15 = inlined_call_operand.vmem [shape: f32[1,2,8,32], index: 15, kind: output, shape index: {2}]  }
   0x1   :  { %v5045_v0 = vld [vmem:[%s6264_s1 + $0x10] sm:$0xff]  ;;  %v3789_v1 = vld [vmem:[%s6265_s6] ss:$0 sm:$0xff]  ;;  %4803 = vset.pattern.permute.xlu1 %v4955_v3  ;;  %4804 = vset.pattern.permute.xlu0 %v4955_v3  ;;  %v5060_v6 = vld [vmem:[%s6264_s1 + $0x18] sm:$0xff]  ;;  %vm144_vm2 = vcmask 1042434   ;;  %vm146_vm3 = vcmask 1043459  }
   0x2   :  { %v5053_v2 = vld [vmem:[%s6264_s1] sm:$0xff]  ;;  %v64_v4 = vmul.f32 %v3789_v1, %v5045_v0  ;;  %v5065_v7 = vld [vmem:[%s6264_s1 + $0x8] sm:$0xff]  ;;  %v65_v8 = vmul.f32 %v3789_v1, %v5060_v6  ;;  %v5088_v18 = vld [vmem:[%s6264_s1 + $0x38] sm:$0xff]  ;;  %v96_v32 = vand.u32 127, %v95_v31  ;;  %v5117_v33 = vshrl.u32 %v95_v31, 7 }
   0x3   :  { %v62_v5 = vmul.f32 %v3789_v1, %v5053_v2  ;;  %v63_v9 = vmul.f32 %v3789_v1, %v5065_v7  ;;  %v5072_v10 = vld [vmem:[%s6264_s1 + $0x28] sm:$0xff]  ;;  %v5077_v11 = vld [vmem:[%s6264_s1 + $0x20] sm:$0xff]  ;;  %v5093_v19 = vld [vmem:[%s6264_s1 + $0x30] sm:$0xff]  ;;  %v69_v22 = vmul.f32 %v3789_v1, %v5088_v18  ;;  %vm148_vm4 = vcmask 1044484  }
   0x4   :  { %v77_v12 = vsel %vm70_vm0, %v64_v4, 0.0  ;;  %v80_v14 = vsel %vm70_vm0, %v65_v8, 0.0  ;;  %v67_v16 = vmul.f32 %v3789_v1, %v5072_v10  ;;  %v66_v17 = vmul.f32 %v3789_v1, %v5077_v11  ;;  %v5102_v24 = vld [vmem:[%s6267_s5] ss:$0 sm:$0xff]  ;;  %v5107_v25 = vld [vmem:[%s6266_s3 + $0x8] sm:$0xff]  ;;  %v162_v31 = vld [vmem:[%s6269_s7 + $0x18] sm:$0xff] }
   0x5   :  { %v71_v13 = vsel %vm70_vm0, %v62_v5, 0.0  ;;  %78 = vadd.xlane.f32.xlu1 %v77_v12  ;;  %v74_v15 = vsel %vm70_vm0, %v63_v9, 0.0  ;;  %v68_v23 = vmul.f32 %v3789_v1, %v5093_v19  ;;  %v92_v26 = vsel %vm70_vm0, %v69_v22, 0.0  ;;  %v97_v30 = vld [vmem:[%s6268_s2] sm:$0xff]  ;;  %v160_v22 = vld [vmem:[%s6269_s7 + $0x8] sm:$0xff] }
   0x6   :  { %72 = vadd.xlane.f32.xlu0 %v71_v13  ;;  %v86_v20 = vsel %vm70_vm0, %v67_v16, 0.0  ;;  %v83_v21 = vsel %vm70_vm0, %v66_v17, 0.0  ;;  %v199_v28 = vmul.f32 %v5102_v24, %v5107_v25  ;;  %v112_v36 = vsub.s32 %v96_v32, %v5117_v33 }
   0x7   :  { %v89_v27 = vsel %vm70_vm0, %v68_v23, 0.0  ;;  %vm150_vm5 = vcmask 1045509   ;;  %vm152_vm6 = vcmask 1046534   ;;  %vm154_vm7 = vcmask 1047559  }
   0x8   :  { %v200_v29 = vsel %vm70_vm0, %v199_v28, 0.0  ;;  %vm204_vm9 = vcmask 64512   ;;  %v5133_v9 = vsub.s32 1, %v5117_v33  ;;  %v5136_v12 = vsub.s32 0, %v5117_v33 }
   0x9   :  { %81 = vadd.xlane.f32.xlu1 %v80_v14  ;;  %v5141_v17 = vsub.s32 2, %v5117_v33  ;;  %v5157_v28 = vsub.s32 3, %v5117_v33  ;;  %vm4959_vm10 = vmmov 0   ;;  %vm361_vm11 = vcmask 523264  }
   0xa   :  { %75 = vadd.xlane.f32.xlu0 %v74_v15  ;;  %vm369_vm12 = vcmask 785408  }
   0xd   :  { %87 = vadd.xlane.f32.xlu1 %v86_v20  ;;  %v5144_v20 = vsub.s32 6, %v5117_v33 }
   0xe   :  { %84 = vadd.xlane.f32.xlu0 %v83_v21  ;;  %v159_v21 = vld [vmem:[%s6269_s7] sm:$0xff] }
   0xf   :  { %v5152_v23 = vpack.c.bf16 %v160_v22, %v159_v21 }
  0x11   :  { %93 = vadd.xlane.f32.xlu1 %v92_v26 }
  0x12   :  { %90 = vadd.xlane.f32.xlu0 %v89_v27 }
  0x16   :  { %201 = vadd.xlane.f32.xlu0 %v200_v29  ;;  %v6280_v29 = vmov 0.0|0.0  }
  0x17   :  { %4508 = vmatprep.subr.bf16.mxu0 %v6280_v29  ;;  %4526 = vmatprep.subr.bf16.mxu1 %v6280_v29 }
  0x18   :  { %4510 = vmatpush3.bf16.msra.mxu0 %v5152_v23 }
  0x19   :  { %4511 = vmatprep.subr.bf16.mxu0 %v6280_v29 }
  0x22   :  { %99 = vperm.xlu1 %4803, %v97_v30   ;;  %v161_v30 = vld [vmem:[%s6269_s7 + $0x10] sm:$0xff] }
  0x92   :  { %v79_v34 = vpop.xlane.xlu1 %78 }
  0x93   :  { %v73_v35 = vpop.xlane.xlu0 %72  ;;  %v121_v41 = vrot.slane %v79_v34, %v112_v36  ;;  %v5172_v34 = vpack.c.bf16 %v162_v31, %v161_v30 }
  0x94   :  { %v113_v39 = vrot.slane %v73_v35, %v112_v36 }
  0x95   :  { %4513 = vmatpush3.bf16.msra.mxu0 %v5172_v34 }
  0x96   :  { %v82_v37 = vpop.xlane.xlu1 %81  ;;  %4514 = vmatprep.subr.bf16.mxu0 %v6280_v29 }
  0x97   :  { %v76_v38 = vpop.xlane.xlu0 %75  ;;  %v125_v42 = vrot.slane %v82_v37, %v112_v36  ;;  %v163_v37 = vld [vmem:[%s6269_s7 + $0x20] sm:$0xff] }
  0x98   :  { %v117_v40 = vrot.slane %v76_v38, %v112_v36  ;;  %v164_v38 = vld [vmem:[%s6269_s7 + $0x28] sm:$0xff] }
  0x9a   :  { %v143_v43 = vsel %vm142_vm1, %v117_v40, %v113_v39  ;;  %v88_v45 = vpop.xlane.xlu1 %87  ;;  %v5187_v39 = vpack.c.bf16 %v164_v38, %v163_v37 }
  0x9b   :  { %v145_v44 = vsel %vm144_vm2, %v121_v41, %v143_v43  ;;  %v85_v46 = vpop.xlane.xlu0 %84  ;;  %v133_v49 = vrot.slane %v88_v45, %v112_v36  ;;  %v5191_v41 = vsub.s32 5, %v5117_v33  ;;  %v166_v43 = vld [vmem:[%s6269_s7 + $0x38] sm:$0xff] }
  0x9c   :  { %v147_v47 = vsel %vm146_vm3, %v125_v42, %v145_v44  ;;  %v129_v48 = vrot.slane %v85_v46, %v112_v36  ;;  %4516 = vmatpush3.bf16.msra.mxu0 %v5187_v39  ;;  %v165_v42 = vld [vmem:[%s6269_s7 + $0x30] sm:$0xff]  ;;  %v5205_v46 = vsub.s32 7, %v5117_v33 }
  0x9d   :  { %4517 = vmatprep.subr.bf16.mxu0 %v6280_v29  ;;  %v5201_v44 = vpack.c.bf16 %v166_v43, %v165_v42 }
  0x9e   :  { %v149_v50 = vsel %vm148_vm4, %v129_v48, %v147_v47  ;;  %v94_v51 = vpop.xlane.xlu1 %93  ;;  %v167_v47 = vld [vmem:[%s6269_s7 + $0x40] sm:$0xff]  ;;  %v168_v48 = vld [vmem:[%s6269_s7 + $0x48] sm:$0xff] }
  0x9f   :  { %v91_v52 = vpop.xlane.xlu0 %90  ;;  %v141_v53 = vrot.slane %v94_v51, %v112_v36  ;;  %v151_v55 = vsel %vm150_vm5, %v133_v49, %v149_v50  ;;  %v5215_v49 = vpack.c.bf16 %v168_v48, %v167_v47  ;;  %v170_v51 = vld [vmem:[%s6269_s7 + $0x58] sm:$0xff] }
  0xa0   :  { %v137_v54 = vrot.slane %v91_v52, %v112_v36  ;;  %v5176_v36 = vsub.s32 4, %v5117_v33  ;;  %4519 = vmatpush3.bf16.msra.mxu0 %v5201_v44  ;;  %v169_v33 = vld [vmem:[%s6269_s7 + $0x50] sm:$0xff] }
  0xa1   :  { %4520 = vmatprep.subr.bf16.mxu0 %v6280_v29  ;;  %v5225_v52 = vpack.c.bf16 %v170_v51, %v169_v33 }
  0xa2   :  { %v153_v56 = vsel %vm152_vm6, %v137_v54, %v151_v55  ;;  %v100_v57 = vpop.permute.xlu1 %99  ;;  %v6282_v54 = vmov 0.0   ;;  %v189_v55 = vld [vmem:[%s6271_s4] sm:$0xff] }
  0xa3   :  { %v155_v58 = vsel %vm154_vm7, %v141_v53, %v153_v56  ;;  %v202_v59 = vpop.xlane.xlu0 %201  ;;  %vm101_vm8 = vcmp.lt.s32.totalorder %v96_v32, %v100_v57  ;;  %v192_v32 = vld [vmem:[%s6270_s0] sm:$0xff]  ;;  %4076 = vmatprep.mubr.msk.f32.mxu0 %vm4959_vm10, %v6282_v54  ;;  %4095 = vmatprep.mubr.msk.f32.mxu1 %vm4959_vm10, %v6282_v54 }
  0xa4   :  { %v5127_v60 = vsel %vm101_vm8, %v155_v58, -1000000.0  ;;  %4522 = vmatpush3.bf16.msra.mxu0 %v5215_v49  ;;  %v186_v53 = vld [vmem:[%s6266_s3] sm:$0xff] }
  0xa5   :  { %v203_v61 = vadd.f32 %v202_v59, %v5127_v60  ;;  %4523 = vmatprep.subr.bf16.mxu0 %v6280_v29 }
  0xa7   :  { %v205_v62 = vsel %vm204_vm9, %v203_v61, -inf }
  0xa8   :  { %206 = vmax.xlane.f32.xlu0 %v205_v62  ;;  %4525 = vmatpush3.bf16.msra.mxu0 %v5225_v52 }
  0xa9   :  { %4544 = vmatprep.subr.bf16.mxu0 %v6280_v29 }
 0x135   :  { %v207_v63 = vpop.xlane.xlu0 %206 }
 0x136   :  { %v208_v1 = vsub.f32 %v203_v61, %v207_v63 }
 0x138   :  { %v209_v3 = vmul.f32 1.442695, %v208_v1 }
 0x13a   :  { %4805 = vpow2.f32 %v209_v3 }
 0x144   :  { %v4806_v4 = vpop.eup %4805 }
 0x145   :  { %v211_v5 = vsel %vm204_vm9, %v4806_v4, 0.0 }
 0x146   :  { %212 = vadd.xlane.f32.xlu0 %v211_v5 }
 0x1d3   :  { %v213_v8 = vpop.xlane.xlu0 %212 }
 0x1d4   :  { %4807 = vrcp.f32 %v213_v8 }
 0x1de   :  { %v4808_v13 = vpop.eup %4807 }
 0x1df   :  { %v215_v14 = vmul.f32 %v4808_v13, %v4806_v4 }
 0x1e1   :  { %v226_v15 = vrot.slane %v215_v14, %v5133_v9  ;;  %v219_v16 = vrot.slane %v215_v14, %v5136_v12  ;;  %v233_v26 = vrot.slane %v215_v14, %v5141_v17  ;;  %v261_v27 = vrot.slane %v215_v14, %v5144_v20 }
 0x1e2   :  { %v240_v35 = vrot.slane %v215_v14, %v5157_v28  ;;  %v247_v40 = vrot.slane %v215_v14, %v5176_v36  ;;  %v254_v45 = vrot.slane %v215_v14, %v5191_v41  ;;  %v268_v50 = vrot.slane %v215_v14, %v5205_v46 }
 0x1e3   :  { %228 = vbcast.lane.b32.xlu1 %v226_v15, 256  ;;  %221 = vbcast.lane.b32.xlu0 %v219_v16, 256 }
 0x1e7   :  { %235 = vbcast.lane.b32.xlu1 %v233_v26, 256  ;;  %263 = vbcast.lane.b32.xlu0 %v261_v27, 256 }
 0x1eb   :  { %242 = vbcast.lane.b32.xlu1 %v240_v35, 256  ;;  %353 = vrot.lane.b32.xlu0 %v192_v32, %s4957_s18 }
 0x1ef   :  { %249 = vbcast.lane.b32.xlu1 %v247_v40, 256 }
 0x1f3   :  { %256 = vbcast.lane.b32.xlu1 %v254_v45, 256 }
 0x1f7   :  { %270 = vbcast.lane.b32.xlu1 %v268_v50, 256 }
 0x1fb   :  { %357 = vrot.lane.b32.xlu1 %v186_v53, %s4958_s20 }
 0x1ff   :  { %449 = vrot.lane.b32.xlu1 %v189_v55, %s4957_s18 }
 0x255   :  { %v229_v56 = vpop.permute.xlu1 %228  ;;  %v222_v57 = vpop.permute.xlu0 %221 }
 0x256   :  { %v273_v58 = vmul.f32 %v229_v56, %v5065_v7  ;;  %v272_v59 = vmul.f32 %v222_v57, %v5053_v2 }
 0x258   :  { %v287_v61 = vsel %vm70_vm0, %v273_v58, 0.0  ;;  %v280_v62 = vsel %vm70_vm0, %v272_v59, 0.0 }
 0x259   :  { %v288_v63 = vrot.slane %v287_v61, 4  ;;  %v281_v1 = vrot.slane %v280_v62, 4  ;;  %v236_v3 = vpop.permute.xlu1 %235  ;;  %v264_v4 = vpop.permute.xlu0 %263 }
 0x25a   :  { %v274_v5 = vmul.f32 %v236_v3, %v5045_v0  ;;  %v278_v8 = vmul.f32 %v264_v4, %v5093_v19 }
 0x25b   :  { %v289_v13 = vadd.f32 %v288_v63, %v287_v61  ;;  %v282_v15 = vadd.f32 %v281_v1, %v280_v62 }
 0x25c   :  { %v294_v14 = vsel %vm70_vm0, %v274_v5, 0.0  ;;  %v322_v27 = vsel %vm70_vm0, %v278_v8, 0.0 }
 0x25d   :  { %v295_v16 = vrot.slane %v294_v14, 4  ;;  %v243_v21 = vpop.permute.xlu1 %242  ;;  %v290_v30 = vrot.slane %v289_v13, 2  ;;  %v283_v32 = vrot.slane %v282_v15, 2  ;;  %v323_v38 = vrot.slane %v322_v27, 4 }
 0x25e   :  { %v275_v22 = vmul.f32 %v243_v21, %v5060_v6 }
 0x25f   :  { %v296_v26 = vadd.f32 %v295_v16, %v294_v14  ;;  %v291_v43 = vadd.f32 %v290_v30, %v289_v13  ;;  %v284_v48 = vadd.f32 %v283_v32, %v282_v15  ;;  %v324_v53 = vadd.f32 %v323_v38, %v322_v27 }
 0x260   :  { %v301_v31 = vsel %vm70_vm0, %v275_v22, 0.0 }
 0x261   :  { %v250_v35 = vpop.permute.xlu1 %249  ;;  %v297_v37 = vrot.slane %v296_v26, 2  ;;  %v302_v40 = vrot.slane %v301_v31, 4  ;;  %v292_v58 = vrot.slane %v291_v43, 1  ;;  %v285_v62 = vrot.slane %v284_v48, 1 }
 0x262   :  { %v276_v42 = vmul.f32 %v250_v35, %v5077_v11  ;;  %v325_v5 = vrot.slane %v324_v53, 2 }
 0x263   :  { %v303_v45 = vadd.f32 %v302_v40, %v301_v31  ;;  %v298_v51 = vadd.f32 %v297_v37, %v296_v26  ;;  %v293_v16 = vadd.f32 %v292_v58, %v291_v43  ;;  %v286_v22 = vadd.f32 %v285_v62, %v284_v48 }
 0x264   :  { %v308_v47 = vsel %vm70_vm0, %v276_v42, 0.0  ;;  %v326_v32 = vadd.f32 %v325_v5, %v324_v53 }
 0x265   :  { %v309_v50 = vrot.slane %v308_v47, 4  ;;  %v257_v33 = vpop.permute.xlu1 %256  ;;  %v304_v55 = vrot.slane %v303_v45, 2  ;;  %v299_v4 = vrot.slane %v298_v51, 1  ;;  %v344_v42 = vsel %vm142_vm1, %v293_v16, %v286_v22 }
 0x266   :  { %v277_v56 = vmul.f32 %v257_v33, %v5072_v10  ;;  %v327_v33 = vrot.slane %v326_v32, 1 }
 0x267   :  { %v310_v57 = vadd.f32 %v309_v50, %v308_v47  ;;  %v305_v59 = vadd.f32 %v304_v55, %v303_v45  ;;  %v300_v31 = vadd.f32 %v299_v4, %v298_v51  ;;  %v5285_v4 = vld [vmem:[%s6272_s9] ss:$0 sm:$0xff] }
 0x268   :  { %v315_v61 = vsel %vm70_vm0, %v277_v56, 0.0  ;;  %v328_v53 = vadd.f32 %v327_v33, %v326_v32  ;;  %v176_v33 = vld [vmem:[%s6273_s8 + $0x28] sm:$0xff] }
 0x269   :  { %v311_v63 = vrot.slane %v310_v57, 2  ;;  %v316_v1 = vrot.slane %v315_v61, 4  ;;  %v271_v3 = vpop.permute.xlu1 %270  ;;  %v306_v13 = vrot.slane %v305_v59, 1  ;;  %v345_v50 = vsel %vm144_vm2, %v300_v31, %v344_v42 }
 0x26a   :  { %v279_v8 = vmul.f32 %v271_v3, %v5088_v18 }
 0x26b   :  { %v312_v14 = vadd.f32 %v311_v63, %v310_v57  ;;  %v317_v15 = vadd.f32 %v316_v1, %v315_v61  ;;  %v307_v35 = vadd.f32 %v306_v13, %v305_v59  ;;  %v354_v59 = vpop.permute.xlu0 %353 }
 0x26c   :  { %v329_v21 = vsel %vm70_vm0, %v279_v8, 0.0 }
 0x26d   :  { %v313_v26 = vrot.slane %v312_v14, 1  ;;  %v318_v27 = vrot.slane %v317_v15, 2  ;;  %v330_v30 = vrot.slane %v329_v21, 4  ;;  %v346_v48 = vsel %vm146_vm3, %v307_v35, %v345_v50  ;;  %v358_v62 = vpop.permute.xlu1 %357  ;;  %v175_v50 = vld [vmem:[%s6273_s8 + $0x20] sm:$0xff] }
 0x26f   :  { %v319_v37 = vadd.f32 %v318_v27, %v317_v15  ;;  %v331_v38 = vadd.f32 %v330_v30, %v329_v21  ;;  %v314_v40 = vadd.f32 %v313_v26, %v312_v14 }
 0x271   :  { %v320_v45 = vrot.slane %v319_v37, 1  ;;  %v332_v47 = vrot.slane %v331_v38, 2  ;;  %v347_v56 = vsel %vm148_vm4, %v314_v40, %v346_v48  ;;  %v450_v30 = vpop.permute.xlu1 %449  ;;  %v173_v40 = vld [vmem:[%s6273_s8 + $0x10] sm:$0xff]  ;;  %v178_v48 = vld [vmem:[%s6273_s8 + $0x38] sm:$0xff] }
 0x273   :  { %v321_v43 = vadd.f32 %v320_v45, %v319_v37  ;;  %v333_v55 = vadd.f32 %v332_v47, %v331_v38  ;;  %v171_v37 = vld [vmem:[%s6273_s8] sm:$0xff]  ;;  %v172_v38 = vld [vmem:[%s6273_s8 + $0x8] sm:$0xff]  ;;  %v174_v45 = vld [vmem:[%s6273_s8 + $0x18] sm:$0xff] }
 0x274   :  { %v5302_v42 = vpack.c.bf16 %v172_v38, %v171_v37  ;;  %v5308_v47 = vpack.c.bf16 %v174_v45, %v173_v40 }
 0x275   :  { %v334_v57 = vrot.slane %v333_v55, 1  ;;  %v348_v51 = vsel %vm150_vm5, %v321_v43, %v347_v56  ;;  %v5318_v43 = vpack.c.bf16 %v176_v33, %v175_v50 }
 0x276   :  { %v349_v61 = vsel %vm152_vm6, %v328_v53, %v348_v51  ;;  %4528 = vmatpush3.bf16.msra.mxu1 %v5302_v42  ;;  %v3791_v51 = vld [vmem:[%s6271_s4 + $0x8] sm:$0xff]  ;;  %s4961_s4 = smov 96  }
 0x277   :  { %v335_v58 = vadd.f32 %v334_v57, %v333_v55  ;;  %4529 = vmatprep.subr.bf16.mxu1 %v6280_v29  ;;  %v177_v55 = vld [vmem:[%s6273_s8 + $0x30] sm:$0xff] }
 0x278   :  { %v5329_v57 = vpack.c.bf16 %v178_v48, %v177_v55 }
 0x279   :  { %v350_v63 = vsel %vm154_vm7, %v335_v58, %v349_v61 }
 0x27a   :  { %v360_v1 = vsel %vm70_vm0, %v350_v63, %v354_v59  ;;  %4531 = vmatpush3.bf16.msra.mxu1 %v5308_v47 }
 0x27b   :  { %v362_v3 = vsel %vm361_vm11, %v360_v1, %v358_v62  ;;  %4532 = vmatprep.subr.bf16.mxu1 %v6280_v29  ;;  %v5351_v62 = vld [vmem:[%s6274_s10] ss:$0 sm:$0xff] }
 0x27c   :  { %4077 = vmatmul.mubr.msk.f32.vlgmr.msra.gmra.mrb[0].mxu0 %vm369_vm12, %v362_v3 }
 0x27d   :  { %4546 = vmatpush3.bf16.msra.mxu0 %v5152_v23  ;;  %4133 = vmatprep.mubr.msk.f32.mxu0 %vm4959_vm10, %v6282_v54 }
 0x27e   :  { %4547 = vmatprep.subr.bf16.mxu0 %v6280_v29  ;;  %4534 = vmatpush3.bf16.msra.mxu1 %v5318_v43 }
 0x27f   :  { %4535 = vmatprep.subr.bf16.mxu1 %v6280_v29 }
 0x281   :  { %4549 = vmatpush3.bf16.msra.mxu0 %v5172_v34 }
 0x282   :  { %4550 = vmatprep.subr.bf16.mxu0 %v6280_v29  ;;  %4537 = vmatpush3.bf16.msra.mxu1 %v5329_v57 }
 0x283   :  { %4538 = vmatprep.subr.bf16.mxu1 %v6280_v29 }
 0x285   :  { %4552 = vmatpush3.bf16.msra.mxu0 %v5187_v39 }
 0x286   :  { %4553 = vmatprep.subr.bf16.mxu0 %v6280_v29 }
 0x289   :  { %4555 = vmatpush3.bf16.msra.mxu0 %v5201_v44 }
 0x28a   :  { %4556 = vmatprep.subr.bf16.mxu0 %v6280_v29 }
 0x28d   :  { %4558 = vmatpush3.bf16.msra.mxu0 %v5215_v49 }
 0x28e   :  { %4559 = vmatprep.subr.bf16.mxu0 %v6280_v29 }
 0x291   :  { %4561 = vmatpush3.bf16.msra.mxu0 %v5225_v52 }
 0x292   :  { %4580 = vmatprep.subr.bf16.mxu0 %v6280_v29 }
 0x34f   :  { %v439_v5 = vpop.f32.mrb[0].mxu0 }
 0x350   :  { %v440_v8 = vadd.f32 %v5285_v4, %v439_v5  ;;  %v4078_v13 = vpop.f32.mrb[1].mxu0 }
 0x352   :  { %4809 = vtanh.f32 %v440_v8  ;;  %v443_v15 = vmul.f32 0.5, %v440_v8 }
 0x354   :  { %4811 = vtanh.f32 %v443_v15 }
 0x35c   :  { %v4810_v14 = vpop.eup %4809 }
 0x35d   :  { %454 = vrot.lane.b32.xlu0 %v4810_v14, %s4958_s20 }
 0x35e   :  { %v4812_v16 = vpop.eup %4811 }
 0x35f   :  { %v445_v21 = vadd.f32 1.0, %v4812_v16 }
 0x361   :  { %v446_v22 = vmul.f32 0.5, %v445_v21 }
 0x363   :  { %v452_v31 = vmul.f32 %v450_v30, %v446_v22 }
 0x3cf   :  { %v455_v26 = vpop.permute.xlu0 %454 }
 0x3d0   :  { %v457_v27 = vmul.f32 %v455_v26, %v446_v22 }
 0x3d2   :  { %459 = vrot.lane.b32.xlu0 %v457_v27, %s4957_s18 }
 0x444   :  { %v460_v32 = vpop.permute.xlu0 %459 }
 0x445   :  { %v5290_v35 = vadd.f32 %v460_v32, %v452_v31 }
 0x447   :  { %4813 = vtanh.f32 %v5290_v35 }
 0x451   :  { %v4814_v56 = vpop.eup %4813 }
 0x452   :  { %465 = vrot.lane.b32.xlu1 %v4814_v56, %s4958_s20 }
 0x456   :  { %474 = vrot.lane.b32.xlu1 %v5107_v25, %s4957_s18 }
 0x45a   :  { %563 = vrot.lane.b32.xlu1 %v3791_v51, %s4957_s18 }
 0x4c4   :  { %v466_v53 = vpop.permute.xlu1 %465 }
 0x4c5   :  { %v5340_v58 = vmul.f32 %v466_v53, %v446_v22 }
 0x4c7   :  { %470 = vrot.lane.b32.xlu0 %v5340_v58, %s4957_s18 }
 0x4c8   :  { %v475_v59 = vpop.permute.xlu1 %474 }
 0x4cc   :  { %v564_v22 = vpop.permute.xlu1 %563 }
 0x539   :  { %v471_v61 = vpop.permute.xlu0 %470 }
 0x53a   :  { %v477_v25 = vsel %vm70_vm0, %v471_v61, %v475_v59 }
 0x53b   :  { %4096 = vmatmul.mubr.msk.f32.vlgmr.msra.gmra.mrb[0].mxu1 %vm361_vm11, %v477_v25 }
 0x53c   :  { %4106 = vmatprep.mubr.msk.f32.mxu1 %vm4959_vm10, %v6282_v54 }
 0x60e   :  { %v553_v63 = vpop.f32.mrb[0].mxu1 }
 0x60f   :  { %v554_v1 = vadd.f32 %v5351_v62, %v553_v63  ;;  %v4097_v3 = vpop.f32.mrb[1].mxu1 }
 0x611   :  { %4815 = vtanh.f32 %v554_v1  ;;  %v557_v8 = vmul.f32 0.5, %v554_v1 }
 0x613   :  { %4817 = vtanh.f32 %v557_v8 }
 0x61b   :  { %v4816_v5 = vpop.eup %4815 }
 0x61c   :  { %568 = vrot.lane.b32.xlu0 %v4816_v5, %s4958_s20 }
 0x61d   :  { %v4818_v13 = vpop.eup %4817 }
 0x61e   :  { %v559_v14 = vadd.f32 1.0, %v4818_v13 }
 0x620   :  { %v560_v15 = vmul.f32 0.5, %v559_v14 }
 0x622   :  { %v566_v26 = vmul.f32 %v564_v22, %v560_v15 }
 0x68e   :  { %v569_v16 = vpop.permute.xlu0 %568 }
 0x68f   :  { %v571_v21 = vmul.f32 %v569_v16, %v560_v15 }
 0x691   :  { %573 = vrot.lane.b32.xlu0 %v571_v21, %s4957_s18  ;;  %v3799_v21 = vld [vmem:[%s6270_s0 + $0x8] sm:$0xff] }
 0x695   :  { %667 = vrot.lane.b32.xlu0 %v5102_v24, %s4961_s4 }
 0x703   :  { %v574_v27 = vpop.permute.xlu0 %573 }
 0x704   :  { %v5358_v30 = vadd.f32 %v574_v27, %v566_v26 }
 0x706   :  { %4819 = vtanh.f32 %v5358_v30 }
 0x707   :  { %v5362_v37 = vpop.permute.xlu0 %667 }
 0x710   :  { %v4820_v31 = vpop.eup %4819 }
 0x711   :  { %579 = vrot.lane.b32.xlu1 %v4820_v31, %s4958_s20 }
 0x783   :  { %v580_v32 = vpop.permute.xlu1 %579 }
 0x784   :  { %v5364_v38 = vmul.f32 %v580_v32, %v560_v15 }
 0x786   :  { %v670_v40 = vmul.f32 %v5362_v37, %v5364_v38 }
 0x788   :  { %672 = vrot.lane.b32.xlu1 %v670_v40, %s4957_s18 }
 0x7fa   :  { %v673_v24 = vpop.permute.xlu1 %672 }
 0x7fb   :  { %v675_v45 = vsel %vm70_vm0, %v673_v24, 0.0 }
 0x7fc   :  { %676 = vadd.xlane.f32.xlu0 %v675_v45 }
 0x889   :  { %v677_v50 = vpop.xlane.xlu0 %676 }
 0x88a   :  { %v678_v33 = vadd.f32 %v677_v50, %v5127_v60 }
 0x88c   :  { %v679_v55 = vsel %vm204_vm9, %v678_v33, -inf }
 0x88d   :  { %680 = vmax.xlane.f32.xlu1 %v679_v55 }
 0x91a   :  { %v681_v48 = vpop.xlane.xlu1 %680 }
 0x91b   :  { %v682_v56 = vsub.f32 %v678_v33, %v681_v48 }
 0x91d   :  { %v683_v51 = vmul.f32 1.442695, %v682_v56 }
 0x91f   :  { %4821 = vpow2.f32 %v683_v51 }
 0x929   :  { %v4822_v53 = vpop.eup %4821 }
 0x92a   :  { %v685_v59 = vsel %vm204_vm9, %v4822_v53, 0.0 }
 0x92b   :  { %686 = vadd.xlane.f32.xlu0 %v685_v59 }
 0x9b8   :  { %v687_v61 = vpop.xlane.xlu0 %686 }
 0x9b9   :  { %4823 = vrcp.f32 %v687_v61 }
 0x9c3   :  { %v4824_v25 = vpop.eup %4823 }
 0x9c4   :  { %v689_v63 = vmul.f32 %v4824_v25, %v4822_v53 }
 0x9c6   :  { %v700_v1 = vrot.slane %v689_v63, %v5133_v9  ;;  %v693_v3 = vrot.slane %v689_v63, %v5136_v12  ;;  %v707_v5 = vrot.slane %v689_v63, %v5141_v17  ;;  %v714_v8 = vrot.slane %v689_v63, %v5157_v28 }
 0x9c7   :  { %v721_v13 = vrot.slane %v689_v63, %v5176_v36  ;;  %v728_v14 = vrot.slane %v689_v63, %v5191_v41  ;;  %v735_v15 = vrot.slane %v689_v63, %v5144_v20  ;;  %v742_v16 = vrot.slane %v689_v63, %v5205_v46 }
 0x9c8   :  { %702 = vbcast.lane.b32.xlu1 %v700_v1, 256  ;;  %695 = vbcast.lane.b32.xlu0 %v693_v3, 256 }
 0x9cc   :  { %709 = vbcast.lane.b32.xlu1 %v707_v5, 256  ;;  %716 = vbcast.lane.b32.xlu0 %v714_v8, 256 }
 0x9d0   :  { %723 = vbcast.lane.b32.xlu1 %v721_v13, 256  ;;  %730 = vbcast.lane.b32.xlu0 %v728_v14, 256 }
 0x9d4   :  { %737 = vbcast.lane.b32.xlu1 %v735_v15, 256  ;;  %744 = vbcast.lane.b32.xlu0 %v742_v16, 256 }
 0x9d8   :  { %830 = vrot.lane.b32.xlu0 %v5340_v58, %s4961_s4  ;;  %827 = vrot.lane.b32.xlu1 %v3799_v21, %s4957_s18 }
 0xa3a   :  { %v703_v22 = vpop.permute.xlu1 %702  ;;  %v696_v26 = vpop.permute.xlu0 %695 }
 0xa3b   :  { %v747_v27 = vmul.f32 %v703_v22, %v5065_v7  ;;  %v746_v31 = vmul.f32 %v696_v26, %v5053_v2 }
 0xa3d   :  { %v761_v32 = vsel %vm70_vm0, %v747_v27, 0.0  ;;  %v754_v40 = vsel %vm70_vm0, %v746_v31, 0.0 }
 0xa3e   :  { %v762_v24 = vrot.slane %v761_v32, 4  ;;  %v755_v45 = vrot.slane %v754_v40, 4  ;;  %v710_v50 = vpop.permute.xlu1 %709  ;;  %v717_v33 = vpop.permute.xlu0 %716 }
 0xa3f   :  { %v748_v55 = vmul.f32 %v710_v50, %v5045_v0  ;;  %v749_v58 = vmul.f32 %v717_v33, %v5060_v6 }
 0xa40   :  { %v763_v48 = vadd.f32 %v762_v24, %v761_v32  ;;  %v756_v56 = vadd.f32 %v755_v45, %v754_v40 }
 0xa41   :  { %v768_v51 = vsel %vm70_vm0, %v748_v55, 0.0  ;;  %v775_v7 = vsel %vm70_vm0, %v749_v58, 0.0 }
 0xa42   :  { %v764_v53 = vrot.slane %v763_v48, 2  ;;  %v757_v2 = vrot.slane %v756_v56, 2  ;;  %v769_v59 = vrot.slane %v768_v51, 4  ;;  %v776_v61 = vrot.slane %v775_v7, 4  ;;  %v724_v25 = vpop.permute.xlu1 %723  ;;  %v731_v63 = vpop.permute.xlu0 %730 }
 0xa43   :  { %v750_v1 = vmul.f32 %v724_v25, %v5077_v11  ;;  %v751_v3 = vmul.f32 %v731_v63, %v5072_v10 }
 0xa44   :  { %v765_v5 = vadd.f32 %v764_v53, %v763_v48  ;;  %v758_v0 = vadd.f32 %v757_v2, %v756_v56  ;;  %v770_v8 = vadd.f32 %v769_v59, %v768_v51  ;;  %v777_v6 = vadd.f32 %v776_v61, %v775_v7 }
 0xa45   :  { %v782_v13 = vsel %vm70_vm0, %v750_v1, 0.0  ;;  %v789_v14 = vsel %vm70_vm0, %v751_v3, 0.0 }
 0xa46   :  { %v766_v15 = vrot.slane %v765_v5, 1  ;;  %v759_v16 = vrot.slane %v758_v0, 1  ;;  %v771_v21 = vrot.slane %v770_v8, 2  ;;  %v778_v22 = vrot.slane %v777_v6, 2  ;;  %v738_v26 = vpop.permute.xlu1 %737  ;;  %v745_v27 = vpop.permute.xlu0 %744 }
 0xa47   :  { %v783_v31 = vrot.slane %v782_v13, 4  ;;  %v790_v32 = vrot.slane %v789_v14, 4  ;;  %v752_v11 = vmul.f32 %v738_v26, %v5093_v19  ;;  %v753_v10 = vmul.f32 %v745_v27, %v5088_v18 }
 0xa48   :  { %v767_v40 = vadd.f32 %v766_v15, %v765_v5  ;;  %v772_v24 = vadd.f32 %v771_v21, %v770_v8  ;;  %v779_v45 = vadd.f32 %v778_v22, %v777_v6  ;;  %v760_v48 = vadd.f32 %v759_v16, %v758_v0 }
 0xa49   :  { %v784_v50 = vadd.f32 %v783_v31, %v782_v13  ;;  %v791_v33 = vadd.f32 %v790_v32, %v789_v14  ;;  %v796_v55 = vsel %vm70_vm0, %v752_v11, 0.0  ;;  %v803_v58 = vsel %vm70_vm0, %v753_v10, 0.0 }
 0xa4a   :  { %v773_v56 = vrot.slane %v772_v24, 1  ;;  %v780_v51 = vrot.slane %v779_v45, 1  ;;  %v797_v7 = vrot.slane %v796_v55, 4  ;;  %v804_v59 = vrot.slane %v803_v58, 4  ;;  %v828_v11 = vpop.permute.xlu1 %827 }
 0xa4b   :  { %v785_v53 = vrot.slane %v784_v50, 2  ;;  %v792_v2 = vrot.slane %v791_v33, 2  ;;  %v818_v1 = vsel %vm142_vm1, %v767_v40, %v760_v48 }
 0xa4c   :  { %v774_v61 = vadd.f32 %v773_v56, %v772_v24  ;;  %v798_v19 = vadd.f32 %v797_v7, %v796_v55  ;;  %v805_v63 = vadd.f32 %v804_v59, %v803_v58  ;;  %v781_v3 = vadd.f32 %v780_v51, %v779_v45  ;;  %v181_v51 = vld [vmem:[%s6275_s11] sm:$0xff]  ;;  %v182_v7 = vld [vmem:[%s6275_s11 + $0x8] sm:$0xff] }
 0xa4d   :  { %v786_v25 = vadd.f32 %v785_v53, %v784_v50  ;;  %v793_v18 = vadd.f32 %v792_v2, %v791_v33  ;;  %v831_v50 = vpop.permute.xlu0 %830  ;;  %v5434_v2 = vpack.c.bf16 %v182_v7, %v181_v51 }
 0xa4e   :  { %v799_v5 = vrot.slane %v798_v19, 2  ;;  %v819_v8 = vsel %vm144_vm2, %v774_v61, %v818_v1  ;;  %v806_v0 = vrot.slane %v805_v63, 2  ;;  %v183_v61 = vld [vmem:[%s6275_s11 + $0x10] sm:$0xff] }
 0xa4f   :  { %v787_v6 = vrot.slane %v786_v25, 1  ;;  %v794_v13 = vrot.slane %v793_v18, 1  ;;  %v820_v26 = vsel %vm146_vm3, %v781_v3, %v819_v8  ;;  %4540 = vmatpush3.bf16.msra.mxu1 %v5434_v2 }
 0xa50   :  { %v800_v14 = vadd.f32 %v799_v5, %v798_v19  ;;  %v807_v21 = vadd.f32 %v806_v0, %v805_v63  ;;  %4541 = vmatprep.subr.bf16.mxu1 %v6280_v29  ;;  %v184_v19 = vld [vmem:[%s6275_s11 + $0x18] sm:$0xff] }
 0xa51   :  { %v788_v15 = vadd.f32 %v787_v6, %v786_v25  ;;  %v795_v16 = vadd.f32 %v794_v13, %v793_v18  ;;  %v5445_v25 = vpack.c.bf16 %v184_v19, %v183_v61 }
 0xa52   :  { %v801_v22 = vrot.slane %v800_v14, 1  ;;  %v808_v27 = vrot.slane %v807_v21, 1 }
 0xa53   :  { %v821_v31 = vsel %vm148_vm4, %v788_v15, %v820_v26  ;;  %4543 = vmatpush3.bf16.msra.mxu1 %v5445_v25  ;;  %v5477_v15 = vld [vmem:[%s6276_s12] ss:$0 sm:$0xff] }
 0xa54   :  { %v802_v32 = vadd.f32 %v801_v22, %v800_v14  ;;  %v809_v10 = vadd.f32 %v808_v27, %v807_v21  ;;  %v822_v40 = vsel %vm150_vm5, %v795_v16, %v821_v31  ;;  %4562 = vmatprep.subr.bf16.mxu1 %v6280_v29 }
 0xa56   :  { %v823_v24 = vsel %vm152_vm6, %v802_v32, %v822_v40 }
 0xa57   :  { %v824_v45 = vsel %vm154_vm7, %v809_v10, %v823_v24 }
 0xa58   :  { %v833_v33 = vsel %vm70_vm0, %v824_v45, %v828_v11 }
 0xa59   :  { %v834_v55 = vsel %vm361_vm11, %v833_v33, %v831_v50 }
 0xa5a   :  { %4134 = vmatmul.mubr.msk.f32.vlgmr.msra.gmra.mrb[2].mxu0 %vm369_vm12, %v834_v55 }
 0xa5b   :  { %4582 = vmatpush3.bf16.msra.mxu0 %v5152_v23  ;;  %4190 = vmatprep.mubr.msk.f32.mxu0 %vm4959_vm10, %v6282_v54 }
 0xa5c   :  { %4583 = vmatprep.subr.bf16.mxu0 %v6280_v29 }
 0xa5f   :  { %4585 = vmatpush3.bf16.msra.mxu0 %v5172_v34 }
 0xa60   :  { %4586 = vmatprep.subr.bf16.mxu0 %v6280_v29 }
 0xa63   :  { %4588 = vmatpush3.bf16.msra.mxu0 %v5187_v39 }
 0xa64   :  { %4589 = vmatprep.subr.bf16.mxu0 %v6280_v29 }
 0xa67   :  { %4591 = vmatpush3.bf16.msra.mxu0 %v5201_v44 }
 0xa68   :  { %4592 = vmatprep.subr.bf16.mxu0 %v6280_v29 }
 0xa6b   :  { %4594 = vmatpush3.bf16.msra.mxu0 %v5215_v49 }
 0xa6c   :  { %4595 = vmatprep.subr.bf16.mxu0 %v6280_v29 }
 0xa6f   :  { %4597 = vmatpush3.bf16.msra.mxu0 %v5225_v52 }
 0xa70   :  { %4616 = vmatprep.subr.bf16.mxu0 %v6280_v29 }
 0xb2d   :  { %v904_v58 = vpop.f32.mrb[2].mxu0 }
 0xb2e   :  { %v905_v48 = vadd.f32 %v5285_v4, %v904_v58  ;;  %v4135_v56 = vpop.f32.mrb[3].mxu0 }
 0xb30   :  { %4825 = vtanh.f32 %v905_v48  ;;  %v908_v59 = vmul.f32 0.5, %v905_v48 }
 0xb32   :  { %4827 = vtanh.f32 %v908_v59 }
 0xb3a   :  { %v4826_v53 = vpop.eup %4825 }
 0xb3b   :  { %915 = vrot.lane.b32.xlu1 %v4826_v53, %s4958_s20 }
 0xb3c   :  { %v4828_v18 = vpop.eup %4827 }
 0xb3d   :  { %v910_v63 = vadd.f32 1.0, %v4828_v18 }
 0xb3f   :  { %v911_v1 = vmul.f32 0.5, %v910_v63 }
 0xb41   :  { %v913_v8 = vmul.f32 %v911_v1, %v5290_v35 }
 0xbad   :  { %v916_v3 = vpop.permute.xlu1 %915 }
 0xbae   :  { %v918_v5 = vmul.f32 %v916_v3, %v911_v1 }
 0xbb0   :  { %920 = vrot.lane.b32.xlu0 %v918_v5, %s4957_s18 }
 0xbb4   :  { %590 = vrot.lane.b32.xlu0 %v5364_v38, %s4957_s18 }
 0xbb8   :  { %934 = vrot.lane.b32.xlu0 %v5364_v38, %s4958_s20 }
 0xc22   :  { %v921_v6 = vpop.permute.xlu0 %920 }
 0xc23   :  { %v5455_v13 = vadd.f32 %v921_v6, %v913_v8 }
 0xc25   :  { %4829 = vtanh.f32 %v5455_v13 }
 0xc26   :  { %v591_v0 = vpop.permute.xlu0 %590 }
 0xc27   :  { %4107 = vmatmul.mubr.msk.f32.vlgmr.msra.gmra.mrb[2].mxu1 %vm70_vm0, %v591_v0 }
 0xc28   :  { %4564 = vmatpush3.bf16.msra.mxu1 %v5302_v42  ;;  %4152 = vmatprep.mubr.msk.f32.mxu1 %vm4959_vm10, %v6282_v54 }
 0xc29   :  { %4565 = vmatprep.subr.bf16.mxu1 %v6280_v29 }
 0xc2a   :  { %v935_v26 = vpop.permute.xlu0 %934 }
 0xc2c   :  { %4567 = vmatpush3.bf16.msra.mxu1 %v5308_v47 }
 0xc2d   :  { %4568 = vmatprep.subr.bf16.mxu1 %v6280_v29 }
 0xc2f   :  { %v4830_v35 = vpop.eup %4829 }
 0xc30   :  { %926 = vrot.lane.b32.xlu1 %v4830_v35, %s4958_s20  ;;  %4570 = vmatpush3.bf16.msra.mxu1 %v5318_v43 }
 0xc31   :  { %4571 = vmatprep.subr.bf16.mxu1 %v6280_v29 }
 0xc34   :  { %4573 = vmatpush3.bf16.msra.mxu1 %v5329_v57 }
 0xc35   :  { %4574 = vmatprep.subr.bf16.mxu1 %v6280_v29 }
 0xca2   :  { %v927_v38 = vpop.permute.xlu1 %926 }
 0xca3   :  { %v5470_v14 = vmul.f32 %v927_v38, %v911_v1 }
 0xca5   :  { %931 = vrot.lane.b32.xlu1 %v5470_v14, %s4957_s18 }
 0xcfa   :  { %v660_v16 = vpop.f32.mrb[2].mxu1 }
 0xcfb   :  { %v661_v21 = vadd.f32 %v5477_v15, %v660_v16  ;;  %v4108_v22 = vpop.f32.mrb[3].mxu1 }
 0xcfd   :  { %664 = vst [vmem:[%s6277_s13] sm:$0xff] %v661_v21 }
 0xd17   :  { %v932_v27 = vpop.permute.xlu1 %931 }
 0xd18   :  { %v937_v31 = vsel %vm70_vm0, %v932_v27, %v935_v26 }
 0xd19   :  { %4153 = vmatmul.mubr.msk.f32.vlgmr.msra.gmra.mrb[4].mxu1 %vm361_vm11, %v937_v31 }
 0xd1a   :  { %4576 = vmatpush3.bf16.msra.mxu1 %v5434_v2  ;;  %4163 = vmatprep.mubr.msk.f32.mxu1 %vm4959_vm10, %v6282_v54 }
 0xd1b   :  { %4577 = vmatprep.subr.bf16.mxu1 %v6280_v29 }
 0xd1e   :  { %4579 = vmatpush3.bf16.msra.mxu1 %v5445_v25 }
 0xd1f   :  { %4598 = vmatprep.subr.bf16.mxu1 %v6280_v29 }
 0xdec   :  { %v1007_v32 = vpop.f32.mrb[4].mxu1 }
 0xded   :  { %v1008_v11 = vadd.f32 %v5351_v62, %v1007_v32  ;;  %v4154_v10 = vpop.f32.mrb[5].mxu1 }
 0xdef   :  { %4831 = vtanh.f32 %v1008_v11  ;;  %v1011_v24 = vmul.f32 0.5, %v1008_v11  ;;  %v3804_v11 = vld [vmem:[%s6270_s0 + $0x10] sm:$0xff] }
 0xdf1   :  { %4833 = vtanh.f32 %v1011_v24 }
 0xdf9   :  { %v4832_v40 = vpop.eup %4831 }
 0xdfa   :  { %1018 = vrot.lane.b32.xlu1 %v4832_v40, %s4958_s20 }
 0xdfb   :  { %v4834_v45 = vpop.eup %4833 }
 0xdfc   :  { %v1013_v50 = vadd.f32 1.0, %v4834_v45 }
 0xdfe   :  { %v1014_v33 = vmul.f32 0.5, %v1013_v50  ;;  %v5525_v50 = vld [vmem:[%s6264_s1 + $0x8] sm:$0xff] }
 0xe00   :  { %v1016_v48 = vmul.f32 %v1014_v33, %v5358_v30 }
 0xe6c   :  { %v1019_v55 = vpop.permute.xlu1 %1018 }
 0xe6d   :  { %v1021_v58 = vmul.f32 %v1019_v55, %v1014_v33  ;;  %v5531_v55 = vld [vmem:[%s6264_s1] sm:$0xff] }
 0xe6f   :  { %1023 = vrot.lane.b32.xlu0 %v1021_v58, %s4957_s18 }
 0xee1   :  { %v1024_v56 = vpop.permute.xlu0 %1023 }
 0xee2   :  { %v5495_v51 = vadd.f32 %v1024_v56, %v1016_v48 }
 0xee4   :  { %4835 = vtanh.f32 %v5495_v51 }
 0xeee   :  { %v4836_v7 = vpop.eup %4835 }
 0xeef   :  { %1029 = vrot.lane.b32.xlu1 %v4836_v7, %s4958_s20 }
 0xf61   :  { %v1030_v53 = vpop.permute.xlu1 %1029 }
 0xf62   :  { %v5499_v59 = vmul.f32 %v1030_v53, %v1014_v33 }
 0xf64   :  { %v1112_v61 = vmul.f32 %v5499_v59, %v5362_v37 }
 0xf66   :  { %1114 = vrot.lane.b32.xlu0 %v1112_v61, %s4957_s18 }
 0xfd8   :  { %v1115_v19 = vpop.permute.xlu0 %1114 }
 0xfd9   :  { %v1117_v18 = vsel %vm70_vm0, %v1115_v19, 0.0  ;;  %v5539_v19 = vld [vmem:[%s6264_s1 + $0x10] sm:$0xff] }
 0xfda   :  { %1118 = vadd.xlane.f32.xlu1 %v1117_v18 }
0x1067   :  { %v1119_v30 = vpop.xlane.xlu1 %1118 }
0x1068   :  { %v1120_v63 = vadd.f32 %v1119_v30, %v5127_v60  ;;  %v5545_v30 = vld [vmem:[%s6264_s1 + $0x20] sm:$0xff] }
0x1069   :  { %6303 = vst [vmem:[#allocation2_spill] sm:$0xff] %v5545_v30 }
0x106a   :  { %v1121_v1 = vsel %vm204_vm9, %v1120_v63, -inf }
0x106b   :  { %1122 = vmax.xlane.f32.xlu0 %v1121_v1 }
0x10f8   :  { %v1123_v3 = vpop.xlane.xlu0 %1122 }
0x10f9   :  { %v1124_v5 = vsub.f32 %v1120_v63, %v1123_v3 }
0x10fb   :  { %v1125_v8 = vmul.f32 1.442695, %v1124_v5 }
0x10fd   :  { %4837 = vpow2.f32 %v1125_v8 }
0x1107   :  { %v4838_v6 = vpop.eup %4837 }
0x1108   :  { %v1127_v0 = vsel %vm204_vm9, %v4838_v6, 0.0 }
0x1109   :  { %1128 = vadd.xlane.f32.xlu0 %v1127_v0 }
0x1196   :  { %v1129_v35 = vpop.xlane.xlu0 %1128 }
0x1197   :  { %4839 = vrcp.f32 %v1129_v35 }
0x11a1   :  { %v4840_v38 = vpop.eup %4839 }
0x11a2   :  { %v1131_v16 = vmul.f32 %v4840_v38, %v4838_v6 }
0x11a4   :  { %v1142_v21 = vrot.slane %v1131_v16, %v5133_v9  ;;  %v1135_v22 = vrot.slane %v1131_v16, %v5136_v12  ;;  %v1149_v26 = vrot.slane %v1131_v16, %v5141_v17  ;;  %v1163_v27 = vrot.slane %v1131_v16, %v5176_v36 }
0x11a5   :  { %v1156_v31 = vrot.slane %v1131_v16, %v5157_v28  ;;  %v1177_v32 = vrot.slane %v1131_v16, %v5144_v20  ;;  %v1170_v10 = vrot.slane %v1131_v16, %v5191_v41  ;;  %v1184_v40 = vrot.slane %v1131_v16, %v5205_v46 }
0x11a6   :  { %1144 = vbcast.lane.b32.xlu1 %v1142_v21, 256  ;;  %1137 = vbcast.lane.b32.xlu0 %v1135_v22, 256  ;;  %v5553_v22 = vld [vmem:[%s6264_s1 + $0x18] sm:$0xff] }
0x11a7   :  { %6304 = vst [vmem:[#allocation3_spill] sm:$0xff] %v5553_v22 }
0x11aa   :  { %1151 = vbcast.lane.b32.xlu1 %v1149_v26, 256  ;;  %1165 = vbcast.lane.b32.xlu0 %v1163_v27, 256  ;;  %v5559_v27 = vld [vmem:[%s6264_s1 + $0x30] sm:$0xff] }
0x11ab   :  { %6305 = vst [vmem:[#allocation4_spill] sm:$0xff] %v5559_v27 }
0x11ae   :  { %1158 = vbcast.lane.b32.xlu1 %v1156_v31, 256  ;;  %1179 = vbcast.lane.b32.xlu0 %v1177_v32, 256 }
0x11b2   :  { %1172 = vbcast.lane.b32.xlu1 %v1170_v10, 256  ;;  %1269 = vrot.lane.b32.xlu0 %v3804_v11, %s4957_s18 }
0x11b6   :  { %1186 = vbcast.lane.b32.xlu1 %v1184_v40, 256 }
0x11ba   :  { %1272 = vrot.lane.b32.xlu1 %v5470_v14, %s4961_s4 }
0x1218   :  { %v1145_v24 = vpop.permute.xlu1 %1144  ;;  %v1138_v45 = vpop.permute.xlu0 %1137 }
0x1219   :  { %v1189_v33 = vmul.f32 %v5525_v50, %v1145_v24  ;;  %v1188_v58 = vmul.f32 %v5531_v55, %v1138_v45 }
0x121b   :  { %v1203_v48 = vsel %vm70_vm0, %v1189_v33, 0.0  ;;  %v1196_v14 = vsel %vm70_vm0, %v1188_v58, 0.0 }
0x121c   :  { %v1204_v56 = vrot.slane %v1203_v48, 4  ;;  %v1197_v7 = vrot.slane %v1196_v14, 4  ;;  %v1152_v53 = vpop.permute.xlu1 %1151  ;;  %v1166_v61 = vpop.permute.xlu0 %1165 }
0x121d   :  { %v1190_v18 = vmul.f32 %v5539_v19, %v1152_v53  ;;  %v1192_v63 = vmul.f32 %v5545_v30, %v1166_v61 }
0x121e   :  { %v1205_v1 = vadd.f32 %v1204_v56, %v1203_v48  ;;  %v1198_v3 = vadd.f32 %v1197_v7, %v1196_v14  ;;  %v5567_v7 = vld [vmem:[%s6264_s1 + $0x28] sm:$0xff] }
0x121f   :  { %v1210_v5 = vsel %vm70_vm0, %v1190_v18, 0.0  ;;  %v1224_v8 = vsel %vm70_vm0, %v1192_v63, 0.0  ;;  %6306 = vst [vmem:[#allocation5_spill] sm:$0xff] %v5567_v7 }
0x1220   :  { %v1206_v6 = vrot.slane %v1205_v1, 2  ;;  %v1199_v0 = vrot.slane %v1198_v3, 2  ;;  %v1211_v35 = vrot.slane %v1210_v5, 4  ;;  %v1225_v38 = vrot.slane %v1224_v8, 4  ;;  %v1159_v16 = vpop.permute.xlu1 %1158  ;;  %v1180_v21 = vpop.permute.xlu0 %1179 }
0x1221   :  { %v1191_v26 = vmul.f32 %v5553_v22, %v1159_v16  ;;  %v1194_v31 = vmul.f32 %v5559_v27, %v1180_v21  ;;  %v5574_v21 = vld [vmem:[%s6264_s1 + $0x38] sm:$0xff] }
0x1222   :  { %v1207_v32 = vadd.f32 %v1206_v6, %v1205_v1  ;;  %v1212_v11 = vadd.f32 %v1211_v35, %v1210_v5  ;;  %v1226_v10 = vadd.f32 %v1225_v38, %v1224_v8  ;;  %v1200_v40 = vadd.f32 %v1199_v0, %v1198_v3 }
0x1223   :  { %v1217_v24 = vsel %vm70_vm0, %v1191_v26, 0.0  ;;  %v1238_v45 = vsel %vm70_vm0, %v1194_v31, 0.0 }
0x1224   :  { %v1213_v33 = vrot.slane %v1212_v11, 2  ;;  %v1173_v58 = vpop.permute.xlu1 %1172  ;;  %v1227_v48 = vrot.slane %v1226_v10, 2  ;;  %v1218_v14 = vrot.slane %v1217_v24, 4  ;;  %v1239_v56 = vrot.slane %v1238_v45, 4 }
0x1225   :  { %v1193_v53 = vmul.f32 %v5567_v7, %v1173_v58  ;;  %v1208_v61 = vrot.slane %v1207_v32, 1  ;;  %v1201_v63 = vrot.slane %v1200_v40, 1 }
0x1226   :  { %v1214_v18 = vadd.f32 %v1213_v33, %v1212_v11  ;;  %v1219_v1 = vadd.f32 %v1218_v14, %v1217_v24  ;;  %v1240_v3 = vadd.f32 %v1239_v56, %v1238_v45  ;;  %v1228_v35 = vadd.f32 %v1227_v48, %v1226_v10 }
0x1227   :  { %v1231_v5 = vsel %vm70_vm0, %v1193_v53, 0.0  ;;  %v1209_v11 = vadd.f32 %v1208_v61, %v1207_v32  ;;  %v1202_v33 = vadd.f32 %v1201_v63, %v1200_v40 }
0x1228   :  { %v1215_v8 = vrot.slane %v1214_v18, 1  ;;  %v1232_v6 = vrot.slane %v1231_v5, 4  ;;  %v1187_v0 = vpop.permute.xlu1 %1186  ;;  %v1220_v38 = vrot.slane %v1219_v1, 2  ;;  %v1241_v16 = vrot.slane %v1240_v3, 2 }
0x1229   :  { %v1195_v26 = vmul.f32 %v5574_v21, %v1187_v0  ;;  %v1229_v53 = vrot.slane %v1228_v35, 1  ;;  %v1260_v27 = vsel %vm142_vm1, %v1209_v11, %v1202_v33 }
0x122a   :  { %v1233_v31 = vadd.f32 %v1232_v6, %v1231_v5  ;;  %v1221_v24 = vadd.f32 %v1220_v38, %v1219_v1  ;;  %v1216_v58 = vadd.f32 %v1215_v8, %v1214_v18  ;;  %v1242_v48 = vadd.f32 %v1241_v16, %v1240_v3  ;;  %v1270_v16 = vpop.permute.xlu0 %1269 }
0x122b   :  { %v1245_v45 = vsel %vm70_vm0, %v1195_v26, 0.0  ;;  %v1230_v32 = vadd.f32 %v1229_v53, %v1228_v35 }
0x122c   :  { %v1234_v14 = vrot.slane %v1233_v31, 2  ;;  %v1246_v56 = vrot.slane %v1245_v45, 4  ;;  %v1222_v10 = vrot.slane %v1221_v24, 1  ;;  %v1261_v30 = vsel %vm144_vm2, %v1216_v58, %v1260_v27 }
0x122d   :  { %v1243_v40 = vrot.slane %v1242_v48, 1 }
0x122e   :  { %v1235_v29 = vadd.f32 %v1234_v14, %v1233_v31  ;;  %v1247_v54 = vadd.f32 %v1246_v56, %v1245_v45  ;;  %v1223_v7 = vadd.f32 %v1222_v10, %v1221_v24  ;;  %v1273_v31 = vpop.permute.xlu1 %1272 }
0x122f   :  { %v1244_v6 = vadd.f32 %v1243_v40, %v1242_v48 }
0x1230   :  { %v1236_v0 = vrot.slane %v1235_v29, 1  ;;  %v1248_v5 = vrot.slane %v1247_v54, 2  ;;  %v1262_v61 = vsel %vm146_vm3, %v1223_v7, %v1261_v30 }
0x1231   :  { %v1263_v1 = vsel %vm148_vm4, %v1230_v32, %v1262_v61 }
0x1232   :  { %v1237_v63 = vadd.f32 %v1236_v0, %v1235_v29  ;;  %v1249_v18 = vadd.f32 %v1248_v5, %v1247_v54  ;;  %v6307_v29 = vmov 0.0   ;;  %v6308_v54 = vmov 0.0|0.0  }
0x1234   :  { %v1250_v8 = vrot.slane %v1249_v18, 1  ;;  %v1264_v3 = vsel %vm150_vm5, %v1237_v63, %v1263_v1 }
0x1235   :  { %v1265_v26 = vsel %vm152_vm6, %v1244_v6, %v1264_v3 }
0x1236   :  { %v1251_v38 = vadd.f32 %v1250_v8, %v1249_v18 }
0x1238   :  { %v1266_v27 = vsel %vm154_vm7, %v1251_v38, %v1265_v26 }
0x1239   :  { %v1275_v35 = vsel %vm70_vm0, %v1266_v27, %v1270_v16 }
0x123a   :  { %v1276_v11 = vsel %vm361_vm11, %v1275_v35, %v1273_v31 }
0x123b   :  { %4191 = vmatmul.mubr.msk.f32.vlgmr.msra.gmra.mrb[4].mxu0 %vm369_vm12, %v1276_v11 }
0x123c   :  { %4618 = vmatpush3.bf16.msra.mxu0 %v5152_v23  ;;  %4247 = vmatprep.mubr.msk.f32.mxu0 %vm4959_vm10, %v6307_v29 }
0x123d   :  { %4619 = vmatprep.subr.bf16.mxu0 %v6308_v54 }
0x1240   :  { %4621 = vmatpush3.bf16.msra.mxu0 %v5172_v34 }
0x1241   :  { %4622 = vmatprep.subr.bf16.mxu0 %v6308_v54 }
0x1244   :  { %4624 = vmatpush3.bf16.msra.mxu0 %v5187_v39 }
0x1245   :  { %4625 = vmatprep.subr.bf16.mxu0 %v6308_v54 }
0x1248   :  { %4627 = vmatpush3.bf16.msra.mxu0 %v5201_v44 }
0x1249   :  { %4628 = vmatprep.subr.bf16.mxu0 %v6308_v54 }
0x124c   :  { %4630 = vmatpush3.bf16.msra.mxu0 %v5215_v49 }
0x124d   :  { %4631 = vmatprep.subr.bf16.mxu0 %v6308_v54 }
0x1250   :  { %4633 = vmatpush3.bf16.msra.mxu0 %v5225_v52 }
0x1251   :  { %4652 = vmatprep.subr.bf16.mxu0 %v6308_v54 }
0x130e   :  { %v1346_v30 = vpop.f32.mrb[4].mxu0 }
0x130f   :  { %v1347_v7 = vadd.f32 %v5285_v4, %v1346_v30  ;;  %v4192_v33 = vpop.f32.mrb[5].mxu0 }
0x1311   :  { %4841 = vtanh.f32 %v1347_v7  ;;  %v1350_v45 = vmul.f32 0.5, %v1347_v7 }
0x1313   :  { %4843 = vtanh.f32 %v1350_v45 }
0x131b   :  { %v4842_v24 = vpop.eup %4841 }
0x131c   :  { %1357 = vrot.lane.b32.xlu0 %v4842_v24, %s4958_s20 }
0x131d   :  { %v4844_v58 = vpop.eup %4843 }
0x131e   :  { %v1352_v14 = vadd.f32 1.0, %v4844_v58 }
0x1320   :  { %v1353_v56 = vmul.f32 0.5, %v1352_v14 }
0x1322   :  { %v1355_v4 = vmul.f32 %v1353_v56, %v5455_v13 }
0x138e   :  { %v1358_v53 = vpop.permute.xlu0 %1357 }
0x138f   :  { %v1360_v10 = vmul.f32 %v1358_v53, %v1353_v56 }
0x1391   :  { %1362 = vrot.lane.b32.xlu1 %v1360_v10, %s4957_s18 }
0x1395   :  { %1034 = vrot.lane.b32.xlu1 %v5499_v59, %s4957_s18 }
0x1399   :  { %1376 = vrot.lane.b32.xlu1 %v5499_v59, %s4958_s20 }
0x1403   :  { %v1363_v48 = vpop.permute.xlu1 %1362 }
0x1404   :  { %v5610_v0 = vadd.f32 %v1363_v48, %v1355_v4 }
0x1406   :  { %4845 = vtanh.f32 %v5610_v0 }
0x1407   :  { %v1035_v5 = vpop.permute.xlu1 %1034 }
0x1408   :  { %4164 = vmatmul.mubr.msk.f32.vlgmr.msra.gmra.mrb[6].mxu1 %vm70_vm0, %v1035_v5 }
0x1409   :  { %4600 = vmatpush3.bf16.msra.mxu1 %v5302_v42  ;;  %4209 = vmatprep.mubr.msk.f32.mxu1 %vm4959_vm10, %v6307_v29 }
0x140a   :  { %4601 = vmatprep.subr.bf16.mxu1 %v6308_v54 }
0x140b   :  { %v1377_v18 = vpop.permute.xlu1 %1376 }
0x140d   :  { %4603 = vmatpush3.bf16.msra.mxu1 %v5308_v47 }
0x140e   :  { %4604 = vmatprep.subr.bf16.mxu1 %v6308_v54 }
0x1410   :  { %v4846_v13 = vpop.eup %4845 }
0x1411   :  { %1368 = vrot.lane.b32.xlu0 %v4846_v13, %s4958_s20  ;;  %4606 = vmatpush3.bf16.msra.mxu1 %v5318_v43 }
0x1412   :  { %4607 = vmatprep.subr.bf16.mxu1 %v6308_v54 }
0x1415   :  { %4609 = vmatpush3.bf16.msra.mxu1 %v5329_v57 }
0x1416   :  { %4610 = vmatprep.subr.bf16.mxu1 %v6308_v54 }
0x1483   :  { %v1369_v59 = vpop.permute.xlu0 %1368 }
0x1484   :  { %v5625_v32 = vmul.f32 %v1369_v59, %v1353_v56 }
0x1486   :  { %1373 = vrot.lane.b32.xlu0 %v5625_v32, %s4957_s18 }
0x14db   :  { %v1104_v40 = vpop.f32.mrb[6].mxu1 }
0x14dc   :  { %v1105_v61 = vadd.f32 %v5477_v15, %v1104_v40  ;;  %v4165_v63 = vpop.f32.mrb[7].mxu1 }
0x14de   :  { %3803 = vst [vmem:[%s6277_s13 + $0x8] sm:$0xff] %v1105_v61 }
0x14f8   :  { %v1374_v1 = vpop.permute.xlu0 %1373 }
0x14f9   :  { %v1379_v8 = vsel %vm70_vm0, %v1374_v1, %v1377_v18 }
0x14fa   :  { %4210 = vmatmul.mubr.msk.f32.vlgmr.msra.gmra.mrb[8].mxu1 %vm361_vm11, %v1379_v8 }
0x14fb   :  { %4612 = vmatpush3.bf16.msra.mxu1 %v5434_v2  ;;  %4220 = vmatprep.mubr.msk.f32.mxu1 %vm4959_vm10, %v6307_v29 }
0x14fc   :  { %4613 = vmatprep.subr.bf16.mxu1 %v6308_v54 }
0x14ff   :  { %4615 = vmatpush3.bf16.msra.mxu1 %v5445_v25 }
0x1500   :  { %4634 = vmatprep.subr.bf16.mxu1 %v6308_v54 }
0x15cd   :  { %v1449_v3 = vpop.f32.mrb[8].mxu1 }
0x15ce   :  { %v1450_v6 = vadd.f32 %v5351_v62, %v1449_v3  ;;  %v4211_v38 = vpop.f32.mrb[9].mxu1 }
0x15d0   :  { %4847 = vtanh.f32 %v1450_v6  ;;  %v1453_v26 = vmul.f32 0.5, %v1450_v6 }
0x15d2   :  { %4849 = vtanh.f32 %v1453_v26 }
0x15da   :  { %v4848_v16 = vpop.eup %4847 }
0x15db   :  { %1460 = vrot.lane.b32.xlu0 %v4848_v16, %s4958_s20 }
0x15dc   :  { %v4850_v27 = vpop.eup %4849 }
0x15dd   :  { %v1455_v31 = vadd.f32 1.0, %v4850_v27 }
0x15df   :  { %v1456_v35 = vmul.f32 0.5, %v1455_v31  ;;  %v3809_v31 = vld [vmem:[%s6270_s0 + $0x18] sm:$0xff] }
0x15e1   :  { %v1458_v7 = vmul.f32 %v1456_v35, %v5495_v51 }
0x164d   :  { %v1461_v11 = vpop.permute.xlu0 %1460 }
0x164e   :  { %v1463_v30 = vmul.f32 %v1461_v11, %v1456_v35 }
0x1650   :  { %1465 = vrot.lane.b32.xlu1 %v1463_v30, %s4957_s18 }
0x16c2   :  { %v1466_v33 = vpop.permute.xlu1 %1465 }
0x16c3   :  { %v5645_v24 = vadd.f32 %v1466_v33, %v1458_v7 }
0x16c5   :  { %4851 = vtanh.f32 %v5645_v24 }
0x16cf   :  { %v4852_v62 = vpop.eup %4851 }
0x16d0   :  { %1471 = vrot.lane.b32.xlu0 %v4852_v62, %s4958_s20 }
0x1742   :  { %v1472_v45 = vpop.permute.xlu0 %1471 }
0x1743   :  { %v5649_v58 = vmul.f32 %v1472_v45, %v1456_v35 }
0x1745   :  { %v1554_v14 = vmul.f32 %v5649_v58, %v5362_v37 }
0x1747   :  { %1556 = vrot.lane.b32.xlu1 %v1554_v14, %s4957_s18 }
0x17b9   :  { %v1557_v56 = vpop.permute.xlu1 %1556 }
0x17ba   :  { %v1559_v53 = vsel %vm70_vm0, %v1557_v56, 0.0 }
0x17bb   :  { %1560 = vadd.xlane.f32.xlu0 %v1559_v53 }
0x1848   :  { %v1561_v51 = vpop.xlane.xlu0 %1560 }
0x1849   :  { %v1562_v10 = vadd.f32 %v1561_v51, %v5127_v60 }
0x184b   :  { %v1563_v4 = vsel %vm204_vm9, %v1562_v10, -inf }
0x184c   :  { %1564 = vmax.xlane.f32.xlu1 %v1563_v4 }
0x18d9   :  { %v1565_v48 = vpop.xlane.xlu1 %1564 }
0x18da   :  { %v1566_v5 = vsub.f32 %v1562_v10, %v1565_v48 }
0x18dc   :  { %v1567_v13 = vmul.f32 1.442695, %v1566_v5 }
0x18de   :  { %4853 = vpow2.f32 %v1567_v13 }
0x18e8   :  { %v4854_v59 = vpop.eup %4853 }
0x18e9   :  { %v1569_v40 = vsel %vm204_vm9, %v4854_v59, 0.0 }
0x18ea   :  { %1570 = vadd.xlane.f32.xlu0 %v1569_v40 }
0x1977   :  { %v1571_v61 = vpop.xlane.xlu0 %1570 }
0x1978   :  { %4855 = vrcp.f32 %v1571_v61 }
0x1982   :  { %v4856_v63 = vpop.eup %4855 }
0x1983   :  { %v1573_v18 = vmul.f32 %v4856_v63, %v4854_v59 }
0x1985   :  { %v1584_v1 = vrot.slane %v1573_v18, %v5133_v9  ;;  %v1577_v8 = vrot.slane %v1573_v18, %v5136_v12  ;;  %v1591_v3 = vrot.slane %v1573_v18, %v5141_v17  ;;  %v1598_v6 = vrot.slane %v1573_v18, %v5157_v28 }
0x1986   :  { %v1605_v38 = vrot.slane %v1573_v18, %v5176_v36  ;;  %v1612_v16 = vrot.slane %v1573_v18, %v5191_v41  ;;  %v1619_v26 = vrot.slane %v1573_v18, %v5144_v20  ;;  %v1626_v27 = vrot.slane %v1573_v18, %v5205_v46 }
0x1987   :  { %1586 = vbcast.lane.b32.xlu1 %v1584_v1, 256  ;;  %1579 = vbcast.lane.b32.xlu0 %v1577_v8, 256  ;;  %v6309_v1 = vld [vmem:[#allocation2_spill] sm:$0xff] }
0x198b   :  { %1593 = vbcast.lane.b32.xlu1 %v1591_v3, 256  ;;  %1600 = vbcast.lane.b32.xlu0 %v1598_v6, 256  ;;  %v6310_v3 = vld [vmem:[#allocation5_spill] sm:$0xff] }
0x198f   :  { %1607 = vbcast.lane.b32.xlu1 %v1605_v38, 256  ;;  %1614 = vbcast.lane.b32.xlu0 %v1612_v16, 256 }
0x1993   :  { %1621 = vbcast.lane.b32.xlu1 %v1619_v26, 256  ;;  %1628 = vbcast.lane.b32.xlu0 %v1626_v27, 256 }
0x1997   :  { %1714 = vrot.lane.b32.xlu0 %v5625_v32, %s4961_s4  ;;  %1711 = vrot.lane.b32.xlu1 %v3809_v31, %s4957_s18 }
0x19f9   :  { %v1587_v35 = vpop.permute.xlu1 %1586  ;;  %v1580_v11 = vpop.permute.xlu0 %1579 }
0x19fa   :  { %v1631_v30 = vmul.f32 %v5525_v50, %v1587_v35  ;;  %v1630_v7 = vmul.f32 %v5531_v55, %v1580_v11 }
0x19fc   :  { %v1645_v33 = vsel %vm70_vm0, %v1631_v30, 0.0  ;;  %v1638_v62 = vsel %vm70_vm0, %v1630_v7, 0.0 }
0x19fd   :  { %v1646_v45 = vrot.slane %v1645_v33, 4  ;;  %v1639_v14 = vrot.slane %v1638_v62, 4  ;;  %v1594_v56 = vpop.permute.xlu1 %1593  ;;  %v1601_v53 = vpop.permute.xlu0 %1600 }
0x19fe   :  { %v1632_v51 = vmul.f32 %v5539_v19, %v1594_v56  ;;  %v1633_v32 = vmul.f32 %v5553_v22, %v1601_v53  ;;  %v6311_v53 = vld [vmem:[#allocation4_spill] sm:$0xff] }
0x19ff   :  { %v1647_v10 = vadd.f32 %v1646_v45, %v1645_v33  ;;  %v1640_v4 = vadd.f32 %v1639_v14, %v1638_v62 }
0x1a00   :  { %v1652_v48 = vsel %vm70_vm0, %v1632_v51, 0.0  ;;  %v1659_v5 = vsel %vm70_vm0, %v1633_v32, 0.0 }
0x1a01   :  { %v1648_v13 = vrot.slane %v1647_v10, 2  ;;  %v1641_v59 = vrot.slane %v1640_v4, 2  ;;  %v1653_v40 = vrot.slane %v1652_v48, 4  ;;  %v1660_v61 = vrot.slane %v1659_v5, 4  ;;  %v1608_v63 = vpop.permute.xlu1 %1607  ;;  %v1615_v18 = vpop.permute.xlu0 %1614 }
0x1a02   :  { %v1634_v8 = vmul.f32 %v6309_v1, %v1608_v63  ;;  %v1635_v6 = vmul.f32 %v6310_v3, %v1615_v18 }
0x1a03   :  { %v1649_v38 = vadd.f32 %v1648_v13, %v1647_v10  ;;  %v1642_v16 = vadd.f32 %v1641_v59, %v1640_v4  ;;  %v1654_v26 = vadd.f32 %v1653_v40, %v1652_v48  ;;  %v1661_v27 = vadd.f32 %v1660_v61, %v1659_v5 }
0x1a04   :  { %v1666_v31 = vsel %vm70_vm0, %v1634_v8, 0.0  ;;  %v1673_v35 = vsel %vm70_vm0, %v1635_v6, 0.0 }
0x1a05   :  { %v1650_v11 = vrot.slane %v1649_v38, 1  ;;  %v1643_v30 = vrot.slane %v1642_v16, 1  ;;  %v1655_v7 = vrot.slane %v1654_v26, 2  ;;  %v1662_v33 = vrot.slane %v1661_v27, 2  ;;  %v1622_v62 = vpop.permute.xlu1 %1621  ;;  %v1629_v45 = vpop.permute.xlu0 %1628 }
0x1a06   :  { %v1667_v14 = vrot.slane %v1666_v31, 4  ;;  %v1674_v56 = vrot.slane %v1673_v35, 4  ;;  %v1636_v51 = vmul.f32 %v6311_v53, %v1622_v62  ;;  %v1637_v32 = vmul.f32 %v5574_v21, %v1629_v45 }
0x1a07   :  { %v1651_v10 = vadd.f32 %v1650_v11, %v1649_v38  ;;  %v1656_v4 = vadd.f32 %v1655_v7, %v1654_v26  ;;  %v1663_v48 = vadd.f32 %v1662_v33, %v1661_v27  ;;  %v1644_v61 = vadd.f32 %v1643_v30, %v1642_v16 }
0x1a08   :  { %v1668_v5 = vadd.f32 %v1667_v14, %v1666_v31  ;;  %v1675_v13 = vadd.f32 %v1674_v56, %v1673_v35  ;;  %v1680_v59 = vsel %vm70_vm0, %v1636_v51, 0.0  ;;  %v1687_v40 = vsel %vm70_vm0, %v1637_v32, 0.0 }
0x1a09   :  { %v1657_v63 = vrot.slane %v1656_v4, 1  ;;  %v1664_v18 = vrot.slane %v1663_v48, 1  ;;  %v1681_v8 = vrot.slane %v1680_v59, 4  ;;  %v1688_v22 = vrot.slane %v1687_v40, 4 }
0x1a0a   :  { %v1669_v6 = vrot.slane %v1668_v5, 2  ;;  %v1676_v3 = vrot.slane %v1675_v13, 2  ;;  %v1702_v26 = vsel %vm142_vm1, %v1651_v10, %v1644_v61 }
0x1a0b   :  { %v1658_v1 = vadd.f32 %v1657_v63, %v1656_v4  ;;  %v1682_v62 = vadd.f32 %v1681_v8, %v1680_v59  ;;  %v1689_v38 = vadd.f32 %v1688_v22, %v1687_v40  ;;  %v1665_v27 = vadd.f32 %v1664_v18, %v1663_v48  ;;  %v1715_v59 = vpop.permute.xlu0 %1714  ;;  %v5715_v63 = vld [vmem:[%s6272_s9] ss:$0 sm:$0xff] }
0x1a0c   :  { %v1670_v53 = vadd.f32 %v1669_v6, %v1668_v5  ;;  %v1677_v45 = vadd.f32 %v1676_v3, %v1675_v13  ;;  %v1712_v5 = vpop.permute.xlu1 %1711 }
0x1a0d   :  { %v1683_v31 = vrot.slane %v1682_v62, 2  ;;  %v1703_v35 = vsel %vm144_vm2, %v1658_v1, %v1702_v26  ;;  %v1690_v16 = vrot.slane %v1689_v38, 2 }
0x1a0e   :  { %v1671_v11 = vrot.slane %v1670_v53, 1  ;;  %v1678_v7 = vrot.slane %v1677_v45, 1  ;;  %v1704_v32 = vsel %vm146_vm3, %v1665_v27, %v1703_v35 }
0x1a0f   :  { %v1684_v30 = vadd.f32 %v1683_v31, %v1682_v62  ;;  %v1691_v56 = vadd.f32 %v1690_v16, %v1689_v38 }
0x1a10   :  { %v1672_v33 = vadd.f32 %v1671_v11, %v1670_v53  ;;  %v1679_v14 = vadd.f32 %v1678_v7, %v1677_v45 }
0x1a11   :  { %v1685_v51 = vrot.slane %v1684_v30, 1  ;;  %v1692_v4 = vrot.slane %v1691_v56, 1 }
0x1a12   :  { %v1705_v3 = vsel %vm148_vm4, %v1672_v33, %v1704_v32 }
0x1a13   :  { %v1686_v22 = vadd.f32 %v1685_v51, %v1684_v30  ;;  %v1693_v10 = vadd.f32 %v1692_v4, %v1691_v56  ;;  %v1706_v48 = vsel %vm150_vm5, %v1679_v14, %v1705_v3  ;;  %v5759_v3 = vld [vmem:[%s6274_s10] ss:$0 sm:$0xff] }
0x1a15   :  { %v1707_v1 = vsel %vm152_vm6, %v1686_v22, %v1706_v48 }
0x1a16   :  { %v1708_v13 = vsel %vm154_vm7, %v1693_v10, %v1707_v1 }
0x1a17   :  { %v1717_v53 = vsel %vm70_vm0, %v1708_v13, %v1712_v5 }
0x1a18   :  { %v1718_v40 = vsel %vm361_vm11, %v1717_v53, %v1715_v59 }
0x1a19   :  { %4248 = vmatmul.mubr.msk.f32.vlgmr.msra.gmra.mrb[6].mxu0 %vm369_vm12, %v1718_v40 }
0x1a1a   :  { %4654 = vmatpush3.bf16.msra.mxu0 %v5152_v23  ;;  %4304 = vmatprep.mubr.msk.f32.mxu0 %vm4959_vm10, %v6307_v29 }
0x1a1b   :  { %4655 = vmatprep.subr.bf16.mxu0 %v6308_v54 }
0x1a1e   :  { %4657 = vmatpush3.bf16.msra.mxu0 %v5172_v34 }
0x1a1f   :  { %4658 = vmatprep.subr.bf16.mxu0 %v6308_v54 }
0x1a22   :  { %4660 = vmatpush3.bf16.msra.mxu0 %v5187_v39 }
0x1a23   :  { %4661 = vmatprep.subr.bf16.mxu0 %v6308_v54 }
0x1a26   :  { %4663 = vmatpush3.bf16.msra.mxu0 %v5201_v44 }
0x1a27   :  { %4664 = vmatprep.subr.bf16.mxu0 %v6308_v54 }
0x1a2a   :  { %4666 = vmatpush3.bf16.msra.mxu0 %v5215_v49 }
0x1a2b   :  { %4667 = vmatprep.subr.bf16.mxu0 %v6308_v54 }
0x1a2e   :  { %4669 = vmatpush3.bf16.msra.mxu0 %v5225_v52 }
0x1a2f   :  { %4688 = vmatprep.subr.bf16.mxu0 %v6308_v54 }
0x1aec   :  { %v1788_v61 = vpop.f32.mrb[6].mxu0 }
0x1aed   :  { %v1789_v18 = vadd.f32 %v5715_v63, %v1788_v61  ;;  %v4249_v8 = vpop.f32.mrb[7].mxu0 }
0x1aef   :  { %4857 = vtanh.f32 %v1789_v18  ;;  %v1792_v62 = vmul.f32 0.5, %v1789_v18 }
0x1af1   :  { %4859 = vtanh.f32 %v1792_v62 }
0x1af9   :  { %v4858_v6 = vpop.eup %4857 }
0x1afa   :  { %1799 = vrot.lane.b32.xlu1 %v4858_v6, %s4958_s20 }
0x1afb   :  { %v4860_v45 = vpop.eup %4859 }
0x1afc   :  { %v1794_v38 = vadd.f32 1.0, %v4860_v45 }
0x1afe   :  { %v1795_v26 = vmul.f32 0.5, %v1794_v38 }
0x1b00   :  { %v1797_v35 = vmul.f32 %v1795_v26, %v5610_v0 }
0x1b6c   :  { %v1800_v27 = vpop.permute.xlu1 %1799 }
0x1b6d   :  { %v1802_v31 = vmul.f32 %v1800_v27, %v1795_v26 }
0x1b6f   :  { %1804 = vrot.lane.b32.xlu0 %v1802_v31, %s4957_s18 }
0x1b73   :  { %1476 = vrot.lane.b32.xlu0 %v5649_v58, %s4957_s18 }
0x1b77   :  { %1818 = vrot.lane.b32.xlu0 %v5649_v58, %s4958_s20 }
0x1be1   :  { %v1805_v11 = vpop.permute.xlu0 %1804 }
0x1be2   :  { %v5725_v7 = vadd.f32 %v1805_v11, %v1797_v35 }
0x1be4   :  { %4861 = vtanh.f32 %v5725_v7 }
0x1be5   :  { %v1477_v16 = vpop.permute.xlu0 %1476 }
0x1be6   :  { %4221 = vmatmul.mubr.msk.f32.vlgmr.msra.gmra.mrb[10].mxu1 %vm70_vm0, %v1477_v16 }
0x1be7   :  { %4636 = vmatpush3.bf16.msra.mxu1 %v5302_v42  ;;  %4266 = vmatprep.mubr.msk.f32.mxu1 %vm4959_vm10, %v6307_v29 }
0x1be8   :  { %4637 = vmatprep.subr.bf16.mxu1 %v6308_v54 }
0x1be9   :  { %v1819_v51 = vpop.permute.xlu0 %1818 }
0x1beb   :  { %4639 = vmatpush3.bf16.msra.mxu1 %v5308_v47 }
0x1bec   :  { %4640 = vmatprep.subr.bf16.mxu1 %v6308_v54 }
0x1bee   :  { %v4862_v0 = vpop.eup %4861 }
0x1bef   :  { %1810 = vrot.lane.b32.xlu1 %v4862_v0, %s4958_s20  ;;  %4642 = vmatpush3.bf16.msra.mxu1 %v5318_v43 }
0x1bf0   :  { %4643 = vmatprep.subr.bf16.mxu1 %v6308_v54 }
0x1bf3   :  { %4645 = vmatpush3.bf16.msra.mxu1 %v5329_v57 }
0x1bf4   :  { %4646 = vmatprep.subr.bf16.mxu1 %v6308_v54 }
0x1c61   :  { %v1811_v58 = vpop.permute.xlu1 %1810 }
0x1c62   :  { %v5740_v30 = vmul.f32 %v1811_v58, %v1795_v26 }
0x1c64   :  { %1815 = vrot.lane.b32.xlu1 %v5740_v30, %s4957_s18 }
0x1cb9   :  { %v1546_v33 = vpop.f32.mrb[10].mxu1 }
0x1cba   :  { %v1547_v14 = vadd.f32 %v5477_v15, %v1546_v33  ;;  %v4222_v56 = vpop.f32.mrb[11].mxu1 }
0x1cbc   :  { %3808 = vst [vmem:[%s6277_s13 + $0x10] sm:$0xff] %v1547_v14 }
0x1cd6   :  { %v1816_v32 = vpop.permute.xlu1 %1815 }
0x1cd7   :  { %v1821_v4 = vsel %vm70_vm0, %v1816_v32, %v1819_v51 }
0x1cd8   :  { %4267 = vmatmul.mubr.msk.f32.vlgmr.msra.gmra.mrb[12].mxu1 %vm361_vm11, %v1821_v4 }
0x1cd9   :  { %4648 = vmatpush3.bf16.msra.mxu1 %v5434_v2  ;;  %4277 = vmatprep.mubr.msk.f32.mxu1 %vm4959_vm10, %v6307_v29 }
0x1cda   :  { %4649 = vmatprep.subr.bf16.mxu1 %v6308_v54 }
0x1cdd   :  { %4651 = vmatpush3.bf16.msra.mxu1 %v5445_v25 }
0x1cde   :  { %4670 = vmatprep.subr.bf16.mxu1 %v6308_v54 }
0x1dab   :  { %v1891_v15 = vpop.f32.mrb[12].mxu1 }
0x1dac   :  { %v1892_v22 = vadd.f32 %v5759_v3, %v1891_v15  ;;  %v4268_v5 = vpop.f32.mrb[13].mxu1 }
0x1dae   :  { %4863 = vtanh.f32 %v1892_v22  ;;  %v1895_v48 = vmul.f32 0.5, %v1892_v22 }
0x1db0   :  { %4865 = vtanh.f32 %v1895_v48  ;;  %v3814_v48 = vld [vmem:[%s6270_s0 + $0x20] sm:$0xff] }
0x1db8   :  { %v4864_v10 = vpop.eup %4863 }
0x1db9   :  { %1902 = vrot.lane.b32.xlu1 %v4864_v10, %s4958_s20 }
0x1dba   :  { %v4866_v1 = vpop.eup %4865 }
0x1dbb   :  { %v1897_v13 = vadd.f32 1.0, %v4866_v1 }
0x1dbd   :  { %v1898_v59 = vmul.f32 0.5, %v1897_v13 }
0x1dbf   :  { %v1900_v61 = vmul.f32 %v1898_v59, %v5645_v24 }
0x1e2b   :  { %v1903_v53 = vpop.permute.xlu1 %1902 }
0x1e2c   :  { %v1905_v40 = vmul.f32 %v1903_v53, %v1898_v59 }
0x1e2e   :  { %1907 = vrot.lane.b32.xlu0 %v1905_v40, %s4957_s18 }
0x1ea0   :  { %v1908_v18 = vpop.permute.xlu0 %1907 }
0x1ea1   :  { %v5765_v8 = vadd.f32 %v1908_v18, %v1900_v61 }
0x1ea3   :  { %4867 = vtanh.f32 %v5765_v8 }
0x1ead   :  { %v4868_v6 = vpop.eup %4867 }
0x1eae   :  { %1913 = vrot.lane.b32.xlu1 %v4868_v6, %s4958_s20 }
0x1f20   :  { %v1914_v62 = vpop.permute.xlu1 %1913 }
0x1f21   :  { %v5769_v45 = vmul.f32 %v1914_v62, %v1898_v59 }
0x1f23   :  { %v1996_v38 = vmul.f32 %v5769_v45, %v5362_v37 }
0x1f25   :  { %1998 = vrot.lane.b32.xlu0 %v1996_v38, %s4957_s18 }
0x1f97   :  { %v1999_v26 = vpop.permute.xlu0 %1998 }
0x1f98   :  { %v2001_v27 = vsel %vm70_vm0, %v1999_v26, 0.0 }
0x1f99   :  { %2002 = vadd.xlane.f32.xlu1 %v2001_v27 }
0x2026   :  { %v2003_v24 = vpop.xlane.xlu1 %2002 }
0x2027   :  { %v2004_v31 = vadd.f32 %v2003_v24, %v5127_v60 }
0x2029   :  { %v2005_v35 = vsel %vm204_vm9, %v2004_v31, -inf }
0x202a   :  { %2006 = vmax.xlane.f32.xlu0 %v2005_v35 }
0x20b7   :  { %v2007_v11 = vpop.xlane.xlu0 %2006 }
0x20b8   :  { %v2008_v16 = vsub.f32 %v2004_v31, %v2007_v11  ;;  %v6312_v31 = vld [vmem:[#allocation2_spill] sm:$0xff] }
0x20ba   :  { %v2009_v0 = vmul.f32 1.442695, %v2008_v16 }
0x20bc   :  { %4869 = vpow2.f32 %v2009_v0 }
0x20c6   :  { %v4870_v58 = vpop.eup %4869 }
0x20c7   :  { %v2011_v33 = vsel %vm204_vm9, %v4870_v58, 0.0 }
0x20c8   :  { %2012 = vadd.xlane.f32.xlu0 %v2011_v33 }
0x2155   :  { %v2013_v14 = vpop.xlane.xlu0 %2012 }
0x2156   :  { %4871 = vrcp.f32 %v2013_v14 }
0x2160   :  { %v4872_v56 = vpop.eup %4871 }
0x2161   :  { %v2015_v51 = vmul.f32 %v4872_v56, %v4870_v58 }
0x2163   :  { %v2026_v32 = vrot.slane %v2015_v51, %v5133_v9  ;;  %v2019_v4 = vrot.slane %v2015_v51, %v5136_v12  ;;  %v2033_v15 = vrot.slane %v2015_v51, %v5141_v17  ;;  %v2047_v22 = vrot.slane %v2015_v51, %v5176_v36 }
0x2164   :  { %v2040_v5 = vrot.slane %v2015_v51, %v5157_v28  ;;  %v2061_v10 = vrot.slane %v2015_v51, %v5144_v20  ;;  %v2054_v1 = vrot.slane %v2015_v51, %v5191_v41  ;;  %v2068_v13 = vrot.slane %v2015_v51, %v5205_v46  ;;  %v6313_v51 = vld [vmem:[#allocation3_spill] sm:$0xff] }
0x2165   :  { %2028 = vbcast.lane.b32.xlu1 %v2026_v32, 256  ;;  %2021 = vbcast.lane.b32.xlu0 %v2019_v4, 256  ;;  %v6314_v4 = vld [vmem:[#allocation4_spill] sm:$0xff] }
0x2169   :  { %2035 = vbcast.lane.b32.xlu1 %v2033_v15, 256  ;;  %2049 = vbcast.lane.b32.xlu0 %v2047_v22, 256 }
0x216d   :  { %2042 = vbcast.lane.b32.xlu1 %v2040_v5, 256  ;;  %2063 = vbcast.lane.b32.xlu0 %v2061_v10, 256 }
0x2171   :  { %2056 = vbcast.lane.b32.xlu1 %v2054_v1, 256  ;;  %2153 = vrot.lane.b32.xlu0 %v3814_v48, %s4957_s18 }
0x2175   :  { %2070 = vbcast.lane.b32.xlu1 %v2068_v13, 256 }
0x2179   :  { %2156 = vrot.lane.b32.xlu1 %v5740_v30, %s4961_s4 }
0x21d7   :  { %v2029_v59 = vpop.permute.xlu1 %2028  ;;  %v2022_v53 = vpop.permute.xlu0 %2021 }
0x21d8   :  { %v2073_v40 = vmul.f32 %v5525_v50, %v2029_v59  ;;  %v2072_v61 = vmul.f32 %v5531_v55, %v2022_v53 }
0x21da   :  { %v2087_v18 = vsel %vm70_vm0, %v2073_v40, 0.0  ;;  %v2080_v6 = vsel %vm70_vm0, %v2072_v61, 0.0 }
0x21db   :  { %v2088_v62 = vrot.slane %v2087_v18, 4  ;;  %v2081_v38 = vrot.slane %v2080_v6, 4  ;;  %v2036_v26 = vpop.permute.xlu1 %2035  ;;  %v2050_v27 = vpop.permute.xlu0 %2049 }
0x21dc   :  { %v2074_v24 = vmul.f32 %v5539_v19, %v2036_v26  ;;  %v2076_v35 = vmul.f32 %v6312_v31, %v2050_v27 }
0x21dd   :  { %v2089_v11 = vadd.f32 %v2088_v62, %v2087_v18  ;;  %v2082_v30 = vadd.f32 %v2081_v38, %v2080_v6  ;;  %v6315_v18 = vld [vmem:[#allocation5_spill] sm:$0xff] }
0x21de   :  { %v2094_v16 = vsel %vm70_vm0, %v2074_v24, 0.0  ;;  %v2108_v50 = vsel %vm70_vm0, %v2076_v35, 0.0 }
0x21df   :  { %v2090_v0 = vrot.slane %v2089_v11, 2  ;;  %v2083_v55 = vrot.slane %v2082_v30, 2  ;;  %v2095_v58 = vrot.slane %v2094_v16, 4  ;;  %v2109_v33 = vrot.slane %v2108_v50, 4  ;;  %v2043_v14 = vpop.permute.xlu1 %2042  ;;  %v2064_v56 = vpop.permute.xlu0 %2063 }
0x21e0   :  { %v2075_v32 = vmul.f32 %v6313_v51, %v2043_v14  ;;  %v2078_v15 = vmul.f32 %v6314_v4, %v2064_v56 }
0x21e1   :  { %v2091_v22 = vadd.f32 %v2090_v0, %v2089_v11  ;;  %v2096_v19 = vadd.f32 %v2095_v58, %v2094_v16  ;;  %v2110_v5 = vadd.f32 %v2109_v33, %v2108_v50  ;;  %v2084_v10 = vadd.f32 %v2083_v55, %v2082_v30 }
0x21e2   :  { %v2101_v48 = vsel %vm70_vm0, %v2075_v32, 0.0  ;;  %v2122_v1 = vsel %vm70_vm0, %v2078_v15, 0.0 }
0x21e3   :  { %v2097_v13 = vrot.slane %v2096_v19, 2  ;;  %v2057_v59 = vpop.permute.xlu1 %2056  ;;  %v2111_v53 = vrot.slane %v2110_v5, 2  ;;  %v2102_v40 = vrot.slane %v2101_v48, 4  ;;  %v2123_v61 = vrot.slane %v2122_v1, 4 }
0x21e4   :  { %v2077_v6 = vmul.f32 %v6315_v18, %v2057_v59  ;;  %v2092_v62 = vrot.slane %v2091_v22, 1  ;;  %v2085_v26 = vrot.slane %v2084_v10, 1 }
0x21e5   :  { %v2098_v38 = vadd.f32 %v2097_v13, %v2096_v19  ;;  %v2103_v27 = vadd.f32 %v2102_v40, %v2101_v48  ;;  %v2124_v24 = vadd.f32 %v2123_v61, %v2122_v1  ;;  %v2112_v16 = vadd.f32 %v2111_v53, %v2110_v5 }
0x21e6   :  { %v2115_v31 = vsel %vm70_vm0, %v2077_v6, 0.0  ;;  %v2093_v33 = vadd.f32 %v2092_v62, %v2091_v22  ;;  %v2086_v14 = vadd.f32 %v2085_v26, %v2084_v10 }
0x21e7   :  { %v2099_v35 = vrot.slane %v2098_v38, 1  ;;  %v2116_v11 = vrot.slane %v2115_v31, 4  ;;  %v2071_v30 = vpop.permute.xlu1 %2070  ;;  %v2104_v50 = vrot.slane %v2103_v27, 2  ;;  %v2125_v0 = vrot.slane %v2124_v24, 2 }
0x21e8   :  { %v2079_v55 = vmul.f32 %v5574_v21, %v2071_v30  ;;  %v2113_v19 = vrot.slane %v2112_v16, 1  ;;  %v2144_v5 = vsel %vm142_vm1, %v2093_v33, %v2086_v14 }
0x21e9   :  { %v2117_v58 = vadd.f32 %v2116_v11, %v2115_v31  ;;  %v2105_v56 = vadd.f32 %v2104_v50, %v2103_v27  ;;  %v2100_v32 = vadd.f32 %v2099_v35, %v2098_v38  ;;  %v2126_v1 = vadd.f32 %v2125_v0, %v2124_v24  ;;  %v2154_v35 = vpop.permute.xlu0 %2153 }
0x21ea   :  { %v2129_v51 = vsel %vm70_vm0, %v2079_v55, 0.0  ;;  %v2114_v22 = vadd.f32 %v2113_v19, %v2112_v16 }
0x21eb   :  { %v2118_v4 = vrot.slane %v2117_v58, 2  ;;  %v2130_v15 = vrot.slane %v2129_v51, 4  ;;  %v2106_v48 = vrot.slane %v2105_v56, 1  ;;  %v2145_v40 = vsel %vm144_vm2, %v2100_v32, %v2144_v5  ;;  %v2157_v50 = vpop.permute.xlu1 %2156 }
0x21ec   :  { %v2127_v18 = vrot.slane %v2126_v1, 1 }
0x21ed   :  { %v2119_v13 = vadd.f32 %v2118_v4, %v2117_v58  ;;  %v2131_v59 = vadd.f32 %v2130_v15, %v2129_v51  ;;  %v2107_v53 = vadd.f32 %v2106_v48, %v2105_v56 }
0x21ee   :  { %v2128_v24 = vadd.f32 %v2127_v18, %v2126_v1 }
0x21ef   :  { %v2120_v21 = vrot.slane %v2119_v13, 1  ;;  %v2132_v61 = vrot.slane %v2131_v59, 2  ;;  %v2146_v10 = vsel %vm146_vm3, %v2107_v53, %v2145_v40  ;;  %v5862_v40 = vld [vmem:[%s6276_s12] ss:$0 sm:$0xff] }
0x21f0   :  { %v2147_v38 = vsel %vm148_vm4, %v2114_v22, %v2146_v10 }
0x21f1   :  { %v2121_v6 = vadd.f32 %v2120_v21, %v2119_v13  ;;  %v2133_v62 = vadd.f32 %v2132_v61, %v2131_v59 }
0x21f3   :  { %v2134_v26 = vrot.slane %v2133_v62, 1  ;;  %v2148_v27 = vsel %vm150_vm5, %v2121_v6, %v2147_v38 }
0x21f4   :  { %v2149_v11 = vsel %vm152_vm6, %v2128_v24, %v2148_v27 }
0x21f5   :  { %v2135_v31 = vadd.f32 %v2134_v26, %v2133_v62 }
0x21f7   :  { %v2150_v30 = vsel %vm154_vm7, %v2135_v31, %v2149_v11 }
0x21f8   :  { %v2159_v16 = vsel %vm70_vm0, %v2150_v30, %v2154_v35 }
0x21f9   :  { %v2160_v0 = vsel %vm361_vm11, %v2159_v16, %v2157_v50 }
0x21fa   :  { %4305 = vmatmul.mubr.msk.f32.vlgmr.msra.gmra.mrb[8].mxu0 %vm369_vm12, %v2160_v0 }
0x21fb   :  { %4690 = vmatpush3.bf16.msra.mxu0 %v5152_v23  ;;  %4361 = vmatprep.mubr.msk.f32.mxu0 %vm4959_vm10, %v6307_v29 }
0x21fc   :  { %4691 = vmatprep.subr.bf16.mxu0 %v6308_v54 }
0x21ff   :  { %4693 = vmatpush3.bf16.msra.mxu0 %v5172_v34 }
0x2200   :  { %4694 = vmatprep.subr.bf16.mxu0 %v6308_v54 }
0x2203   :  { %4696 = vmatpush3.bf16.msra.mxu0 %v5187_v39 }
0x2204   :  { %4697 = vmatprep.subr.bf16.mxu0 %v6308_v54 }
0x2207   :  { %4699 = vmatpush3.bf16.msra.mxu0 %v5201_v44 }
0x2208   :  { %4700 = vmatprep.subr.bf16.mxu0 %v6308_v54 }
0x220b   :  { %4702 = vmatpush3.bf16.msra.mxu0 %v5215_v49 }
0x220c   :  { %4703 = vmatprep.subr.bf16.mxu0 %v6308_v54 }
0x220f   :  { %4705 = vmatpush3.bf16.msra.mxu0 %v5225_v52 }
0x2210   :  { %4724 = vmatprep.subr.bf16.mxu0 %v6308_v54 }
0x22cd   :  { %v2230_v55 = vpop.f32.mrb[8].mxu0 }
0x22ce   :  { %v2231_v58 = vadd.f32 %v5715_v63, %v2230_v55  ;;  %v4306_v33 = vpop.f32.mrb[9].mxu0 }
0x22d0   :  { %4873 = vtanh.f32 %v2231_v58  ;;  %v2234_v56 = vmul.f32 0.5, %v2231_v58 }
0x22d2   :  { %4875 = vtanh.f32 %v2234_v56 }
0x22da   :  { %v4874_v14 = vpop.eup %4873 }
0x22db   :  { %2241 = vrot.lane.b32.xlu0 %v4874_v14, %s4958_s20 }
0x22dc   :  { %v4876_v51 = vpop.eup %4875 }
0x22dd   :  { %v2236_v32 = vadd.f32 1.0, %v4876_v51 }
0x22df   :  { %v2237_v4 = vmul.f32 0.5, %v2236_v32 }
0x22e1   :  { %v2239_v48 = vmul.f32 %v2237_v4, %v5725_v7 }
0x234d   :  { %v2242_v15 = vpop.permute.xlu0 %2241 }
0x234e   :  { %v2244_v19 = vmul.f32 %v2242_v15, %v2237_v4 }
0x2350   :  { %2246 = vrot.lane.b32.xlu1 %v2244_v19, %s4957_s18 }
0x2354   :  { %1918 = vrot.lane.b32.xlu1 %v5769_v45, %s4957_s18 }
0x2358   :  { %2260 = vrot.lane.b32.xlu1 %v5769_v45, %s4958_s20 }
0x23c2   :  { %v2247_v1 = vpop.permute.xlu1 %2246 }
0x23c3   :  { %v5840_v13 = vadd.f32 %v2247_v1, %v2239_v48 }
0x23c5   :  { %4877 = vtanh.f32 %v5840_v13 }
0x23c6   :  { %v1919_v59 = vpop.permute.xlu1 %1918 }
0x23c7   :  { %4278 = vmatmul.mubr.msk.f32.vlgmr.msra.gmra.mrb[14].mxu1 %vm70_vm0, %v1919_v59 }
0x23c8   :  { %4672 = vmatpush3.bf16.msra.mxu1 %v5302_v42  ;;  %4323 = vmatprep.mubr.msk.f32.mxu1 %vm4959_vm10, %v6307_v29 }
0x23c9   :  { %4673 = vmatprep.subr.bf16.mxu1 %v6308_v54 }
0x23ca   :  { %v2261_v22 = vpop.permute.xlu1 %2260 }
0x23cc   :  { %4675 = vmatpush3.bf16.msra.mxu1 %v5308_v47 }
0x23cd   :  { %4676 = vmatprep.subr.bf16.mxu1 %v6308_v54 }
0x23cf   :  { %v4878_v7 = vpop.eup %4877 }
0x23d0   :  { %2252 = vrot.lane.b32.xlu0 %v4878_v7, %s4958_s20  ;;  %4678 = vmatpush3.bf16.msra.mxu1 %v5318_v43 }
0x23d1   :  { %4679 = vmatprep.subr.bf16.mxu1 %v6308_v54 }
0x23d4   :  { %4681 = vmatpush3.bf16.msra.mxu1 %v5329_v57 }
0x23d5   :  { %4682 = vmatprep.subr.bf16.mxu1 %v6308_v54 }
0x2442   :  { %v2253_v45 = vpop.permute.xlu0 %2252 }
0x2443   :  { %v5855_v5 = vmul.f32 %v2253_v45, %v2237_v4 }
0x2445   :  { %2257 = vrot.lane.b32.xlu0 %v5855_v5, %s4957_s18 }
0x249a   :  { %v1988_v53 = vpop.f32.mrb[14].mxu1 }
0x249b   :  { %v1989_v21 = vadd.f32 %v5862_v40, %v1988_v53  ;;  %v4279_v61 = vpop.f32.mrb[15].mxu1 }
0x249d   :  { %3813 = vst [vmem:[%s6277_s13 + $0x18] sm:$0xff] %v1989_v21 }
0x24b7   :  { %v2258_v10 = vpop.permute.xlu0 %2257 }
0x24b8   :  { %v2263_v18 = vsel %vm70_vm0, %v2258_v10, %v2261_v22 }
0x24b9   :  { %4324 = vmatmul.mubr.msk.f32.vlgmr.msra.gmra.mrb[16].mxu1 %vm361_vm11, %v2263_v18 }
0x24ba   :  { %4684 = vmatpush3.bf16.msra.mxu1 %v5434_v2  ;;  %4334 = vmatprep.mubr.msk.f32.mxu1 %vm4959_vm10, %v6307_v29 }
0x24bb   :  { %4685 = vmatprep.subr.bf16.mxu1 %v6308_v54 }
0x24be   :  { %4687 = vmatpush3.bf16.msra.mxu1 %v5445_v25 }
0x24bf   :  { %4706 = vmatprep.subr.bf16.mxu1 %v6308_v54 }
0x258c   :  { %v2333_v6 = vpop.f32.mrb[16].mxu1 }
0x258d   :  { %v2334_v62 = vadd.f32 %v5759_v3, %v2333_v6  ;;  %v4325_v38 = vpop.f32.mrb[17].mxu1 }
0x258f   :  { %4879 = vtanh.f32 %v2334_v62  ;;  %v2337_v27 = vmul.f32 0.5, %v2334_v62 }
0x2591   :  { %4881 = vtanh.f32 %v2337_v27 }
0x2599   :  { %v4880_v26 = vpop.eup %4879 }
0x259a   :  { %2344 = vrot.lane.b32.xlu0 %v4880_v26, %s4958_s20  ;;  %v3819_v26 = vld [vmem:[%s6270_s0 + $0x28] sm:$0xff] }
0x259b   :  { %v4882_v24 = vpop.eup %4881 }
0x259c   :  { %v2339_v31 = vadd.f32 1.0, %v4882_v24 }
0x259e   :  { %v2340_v35 = vmul.f32 0.5, %v2339_v31  ;;  %v5910_v31 = vld [vmem:[%s6264_s1 + $0x8] sm:$0xff] }
0x25a0   :  { %v2342_v50 = vmul.f32 %v2340_v35, %v5765_v8 }
0x260c   :  { %v2345_v11 = vpop.permute.xlu0 %2344 }
0x260d   :  { %v2347_v30 = vmul.f32 %v2345_v11, %v2340_v35  ;;  %v5916_v11 = vld [vmem:[%s6264_s1] sm:$0xff] }
0x260e   :  { %6316 = vst [vmem:[#allocation2_spill] sm:$0xff] %v5916_v11 }
0x260f   :  { %2349 = vrot.lane.b32.xlu1 %v2347_v30, %s4957_s18 }
0x2681   :  { %v2350_v16 = vpop.permute.xlu1 %2349 }
0x2682   :  { %v5880_v0 = vadd.f32 %v2350_v16, %v2342_v50 }
0x2684   :  { %4883 = vtanh.f32 %v5880_v0 }
0x268e   :  { %v4884_v55 = vpop.eup %4883 }
0x268f   :  { %2355 = vrot.lane.b32.xlu0 %v4884_v55, %s4958_s20 }
0x2701   :  { %v2356_v58 = vpop.permute.xlu0 %2355 }
0x2702   :  { %v5884_v33 = vmul.f32 %v2356_v58, %v2340_v35 }
0x2704   :  { %v2438_v14 = vmul.f32 %v5884_v33, %v5362_v37 }
0x2706   :  { %2440 = vrot.lane.b32.xlu1 %v2438_v14, %s4957_s18 }
0x2778   :  { %v2441_v56 = vpop.permute.xlu1 %2440 }
0x2779   :  { %v2443_v51 = vsel %vm70_vm0, %v2441_v56, 0.0  ;;  %v5924_v56 = vld [vmem:[%s6264_s1 + $0x10] sm:$0xff] }
0x277a   :  { %2444 = vadd.xlane.f32.xlu0 %v2443_v51  ;;  %6317 = vst [vmem:[#allocation3_spill] sm:$0xff] %v5924_v56 }
0x2807   :  { %v2445_v8 = vpop.xlane.xlu0 %2444 }
0x2808   :  { %v2446_v32 = vadd.f32 %v2445_v8, %v5127_v60  ;;  %v5930_v8 = vld [vmem:[%s6264_s1 + $0x18] sm:$0xff] }
0x2809   :  { %6318 = vst [vmem:[#allocation4_spill] sm:$0xff] %v5930_v8 }
0x280a   :  { %v2447_v4 = vsel %vm204_vm9, %v2446_v32, -inf }
0x280b   :  { %2448 = vmax.xlane.f32.xlu1 %v2447_v4 }
0x2898   :  { %v2449_v15 = vpop.xlane.xlu1 %2448 }
0x2899   :  { %v2450_v19 = vsub.f32 %v2446_v32, %v2449_v15 }
0x289b   :  { %v2451_v48 = vmul.f32 1.442695, %v2450_v19 }
0x289d   :  { %4885 = vpow2.f32 %v2451_v48 }
0x28a7   :  { %v4886_v1 = vpop.eup %4885 }
0x28a8   :  { %v2453_v59 = vsel %vm204_vm9, %v4886_v1, 0.0 }
0x28a9   :  { %2454 = vadd.xlane.f32.xlu0 %v2453_v59 }
0x2936   :  { %v2455_v7 = vpop.xlane.xlu0 %2454 }
0x2937   :  { %4887 = vrcp.f32 %v2455_v7 }
0x2941   :  { %v4888_v45 = vpop.eup %4887 }
0x2942   :  { %v2457_v53 = vmul.f32 %v4888_v45, %v4886_v1 }
0x2944   :  { %v2468_v21 = vrot.slane %v2457_v53, %v5133_v9  ;;  %v2461_v61 = vrot.slane %v2457_v53, %v5136_v12  ;;  %v2475_v22 = vrot.slane %v2457_v53, %v5141_v17  ;;  %v2482_v10 = vrot.slane %v2457_v53, %v5157_v28 }
0x2945   :  { %v2489_v18 = vrot.slane %v2457_v53, %v5176_v36  ;;  %v2496_v6 = vrot.slane %v2457_v53, %v5191_v41  ;;  %v2503_v62 = vrot.slane %v2457_v53, %v5144_v20  ;;  %v2510_v38 = vrot.slane %v2457_v53, %v5205_v46 }
0x2946   :  { %2470 = vbcast.lane.b32.xlu1 %v2468_v21, 256  ;;  %2463 = vbcast.lane.b32.xlu0 %v2461_v61, 256  ;;  %v5938_v61 = vld [vmem:[%s6264_s1 + $0x20] sm:$0xff] }
0x2947   :  { %6319 = vst [vmem:[#allocation5_spill] sm:$0xff] %v5938_v61 }
0x294a   :  { %2477 = vbcast.lane.b32.xlu1 %v2475_v22, 256  ;;  %2484 = vbcast.lane.b32.xlu0 %v2482_v10, 256  ;;  %v5944_v10 = vld [vmem:[%s6264_s1 + $0x28] sm:$0xff] }
0x294b   :  { %6320 = vst [vmem:[#allocation6_spill] sm:$0xff] %v5944_v10 }
0x294e   :  { %2491 = vbcast.lane.b32.xlu1 %v2489_v18, 256  ;;  %2498 = vbcast.lane.b32.xlu0 %v2496_v6, 256 }
0x2952   :  { %2505 = vbcast.lane.b32.xlu1 %v2503_v62, 256  ;;  %2512 = vbcast.lane.b32.xlu0 %v2510_v38, 256 }
0x2956   :  { %2598 = vrot.lane.b32.xlu0 %v5855_v5, %s4961_s4  ;;  %2595 = vrot.lane.b32.xlu1 %v3819_v26, %s4957_s18 }
0x29b8   :  { %v2471_v27 = vpop.permute.xlu1 %2470  ;;  %v2464_v24 = vpop.permute.xlu0 %2463 }
0x29b9   :  { %v2515_v35 = vmul.f32 %v5910_v31, %v2471_v27  ;;  %v2514_v30 = vmul.f32 %v5916_v11, %v2464_v24 }
0x29bb   :  { %v2529_v5 = vsel %vm70_vm0, %v2515_v35, 0.0  ;;  %v2522_v50 = vsel %vm70_vm0, %v2514_v30, 0.0 }
0x29bc   :  { %v2530_v16 = vrot.slane %v2529_v5, 4  ;;  %v2523_v55 = vrot.slane %v2522_v50, 4  ;;  %v2478_v58 = vpop.permute.xlu1 %2477  ;;  %v2485_v14 = vpop.permute.xlu0 %2484 }
0x29bd   :  { %v2516_v51 = vmul.f32 %v5924_v56, %v2478_v58  ;;  %v2517_v32 = vmul.f32 %v5930_v8, %v2485_v14 }
0x29be   :  { %v2531_v4 = vadd.f32 %v2530_v16, %v2529_v5  ;;  %v2524_v15 = vadd.f32 %v2523_v55, %v2522_v50 }
0x29bf   :  { %v2536_v19 = vsel %vm70_vm0, %v2516_v51, 0.0  ;;  %v2543_v48 = vsel %vm70_vm0, %v2517_v32, 0.0  ;;  %v5952_v51 = vld [vmem:[%s6264_s1 + $0x30] sm:$0xff] }
0x29c0   :  { %v2532_v1 = vrot.slane %v2531_v4, 2  ;;  %v2525_v59 = vrot.slane %v2524_v15, 2  ;;  %v2537_v7 = vrot.slane %v2536_v19, 4  ;;  %v2544_v45 = vrot.slane %v2543_v48, 4  ;;  %v2492_v53 = vpop.permute.xlu1 %2491  ;;  %v2499_v21 = vpop.permute.xlu0 %2498  ;;  %6321 = vst [vmem:[#allocation7_spill] sm:$0xff] %v5952_v51 }
0x29c1   :  { %v2518_v22 = vmul.f32 %v5938_v61, %v2492_v53  ;;  %v2519_v18 = vmul.f32 %v5944_v10, %v2499_v21 }
0x29c2   :  { %v2533_v6 = vadd.f32 %v2532_v1, %v2531_v4  ;;  %v2526_v62 = vadd.f32 %v2525_v59, %v2524_v15  ;;  %v2538_v38 = vadd.f32 %v2537_v7, %v2536_v19  ;;  %v2545_v26 = vadd.f32 %v2544_v45, %v2543_v48  ;;  %v5958_v4 = vld [vmem:[%s6264_s1 + $0x38] sm:$0xff] }
0x29c3   :  { %v2550_v27 = vsel %vm70_vm0, %v2518_v22, 0.0  ;;  %v2557_v24 = vsel %vm70_vm0, %v2519_v18, 0.0 }
0x29c4   :  { %v2534_v35 = vrot.slane %v2533_v6, 1  ;;  %v2527_v30 = vrot.slane %v2526_v62, 1  ;;  %v2539_v5 = vrot.slane %v2538_v38, 2  ;;  %v2546_v50 = vrot.slane %v2545_v26, 2  ;;  %v2506_v16 = vpop.permute.xlu1 %2505  ;;  %v2513_v55 = vpop.permute.xlu0 %2512 }
0x29c5   :  { %v2551_v58 = vrot.slane %v2550_v27, 4  ;;  %v2558_v14 = vrot.slane %v2557_v24, 4  ;;  %v2520_v32 = vmul.f32 %v5952_v51, %v2506_v16  ;;  %v2521_v15 = vmul.f32 %v5958_v4, %v2513_v55 }
0x29c6   :  { %v2535_v19 = vadd.f32 %v2534_v35, %v2533_v6  ;;  %v2540_v48 = vadd.f32 %v2539_v5, %v2538_v38  ;;  %v2547_v1 = vadd.f32 %v2546_v50, %v2545_v26  ;;  %v2528_v21 = vadd.f32 %v2527_v30, %v2526_v62 }
0x29c7   :  { %v2552_v59 = vadd.f32 %v2551_v58, %v2550_v27  ;;  %v2559_v7 = vadd.f32 %v2558_v14, %v2557_v24  ;;  %v2564_v45 = vsel %vm70_vm0, %v2520_v32, 0.0  ;;  %v2571_v53 = vsel %vm70_vm0, %v2521_v15, 0.0 }
0x29c8   :  { %v2541_v22 = vrot.slane %v2540_v48, 1  ;;  %v2548_v18 = vrot.slane %v2547_v1, 1  ;;  %v2565_v16 = vrot.slane %v2564_v45, 4  ;;  %v2572_v8 = vrot.slane %v2571_v53, 4 }
0x29c9   :  { %v2553_v10 = vrot.slane %v2552_v59, 2  ;;  %v2560_v51 = vrot.slane %v2559_v7, 2  ;;  %v2586_v38 = vsel %vm142_vm1, %v2535_v19, %v2528_v21  ;;  %v2596_v19 = vpop.permute.xlu1 %2595 }
0x29ca   :  { %v2542_v61 = vadd.f32 %v2541_v22, %v2540_v48  ;;  %v2566_v56 = vadd.f32 %v2565_v16, %v2564_v45  ;;  %v2573_v6 = vadd.f32 %v2572_v8, %v2571_v53  ;;  %v2549_v26 = vadd.f32 %v2548_v18, %v2547_v1 }
0x29cb   :  { %v2554_v11 = vadd.f32 %v2553_v10, %v2552_v59  ;;  %v2561_v55 = vadd.f32 %v2560_v51, %v2559_v7  ;;  %v2599_v7 = vpop.permute.xlu0 %2598 }
0x29cc   :  { %v2567_v27 = vrot.slane %v2566_v56, 2  ;;  %v2587_v24 = vsel %vm144_vm2, %v2542_v61, %v2586_v38  ;;  %v2574_v62 = vrot.slane %v2573_v6, 2 }
0x29cd   :  { %v2555_v35 = vrot.slane %v2554_v11, 1  ;;  %v2562_v5 = vrot.slane %v2561_v55, 1  ;;  %v2588_v32 = vsel %vm146_vm3, %v2549_v26, %v2587_v24 }
0x29ce   :  { %v2568_v30 = vadd.f32 %v2567_v27, %v2566_v56  ;;  %v2575_v14 = vadd.f32 %v2574_v62, %v2573_v6 }
0x29cf   :  { %v2556_v50 = vadd.f32 %v2555_v35, %v2554_v11  ;;  %v2563_v58 = vadd.f32 %v2562_v5, %v2561_v55 }
0x29d0   :  { %v2569_v15 = vrot.slane %v2568_v30, 1  ;;  %v2576_v48 = vrot.slane %v2575_v14, 1 }
0x29d1   :  { %v2589_v10 = vsel %vm148_vm4, %v2556_v50, %v2588_v32 }
0x29d2   :  { %v2570_v8 = vadd.f32 %v2569_v15, %v2568_v30  ;;  %v2577_v51 = vadd.f32 %v2576_v48, %v2575_v14  ;;  %v2590_v1 = vsel %vm150_vm5, %v2563_v58, %v2589_v10 }
0x29d4   :  { %v2591_v61 = vsel %vm152_vm6, %v2570_v8, %v2590_v1 }
0x29d5   :  { %v2592_v59 = vsel %vm154_vm7, %v2577_v51, %v2591_v61 }
0x29d6   :  { %v2601_v11 = vsel %vm70_vm0, %v2592_v59, %v2596_v19 }
0x29d7   :  { %v2602_v56 = vsel %vm361_vm11, %v2601_v11, %v2599_v7 }
0x29d8   :  { %4362 = vmatmul.mubr.msk.f32.vlgmr.msra.gmra.mrb[10].mxu0 %vm369_vm12, %v2602_v56 }
0x29d9   :  { %4726 = vmatpush3.bf16.msra.mxu0 %v5152_v23  ;;  %4418 = vmatprep.mubr.msk.f32.mxu0 %vm4959_vm10, %v6307_v29 }
0x29da   :  { %4727 = vmatprep.subr.bf16.mxu0 %v6308_v54 }
0x29dd   :  { %4729 = vmatpush3.bf16.msra.mxu0 %v5172_v34 }
0x29de   :  { %4730 = vmatprep.subr.bf16.mxu0 %v6308_v54 }
0x29e1   :  { %4732 = vmatpush3.bf16.msra.mxu0 %v5187_v39 }
0x29e2   :  { %4733 = vmatprep.subr.bf16.mxu0 %v6308_v54 }
0x29e5   :  { %4735 = vmatpush3.bf16.msra.mxu0 %v5201_v44 }
0x29e6   :  { %4736 = vmatprep.subr.bf16.mxu0 %v6308_v54 }
0x29e9   :  { %4738 = vmatpush3.bf16.msra.mxu0 %v5215_v49 }
0x29ea   :  { %4739 = vmatprep.subr.bf16.mxu0 %v6308_v54 }
0x29ed   :  { %4741 = vmatpush3.bf16.msra.mxu0 %v5225_v52 }
0x29ee   :  { %4760 = vmatprep.subr.bf16.mxu0 %v6308_v54 }
0x2aab   :  { %v2672_v45 = vpop.f32.mrb[10].mxu0 }
0x2aac   :  { %v2673_v53 = vadd.f32 %v5715_v63, %v2672_v45  ;;  %v4363_v21 = vpop.f32.mrb[11].mxu0 }
0x2aae   :  { %4889 = vtanh.f32 %v2673_v53  ;;  %v2676_v18 = vmul.f32 0.5, %v2673_v53 }
0x2ab0   :  { %4891 = vtanh.f32 %v2676_v18 }
0x2ab8   :  { %v4890_v22 = vpop.eup %4889 }
0x2ab9   :  { %2683 = vrot.lane.b32.xlu1 %v4890_v22, %s4958_s20 }
0x2aba   :  { %v4892_v16 = vpop.eup %4891 }
0x2abb   :  { %v2678_v55 = vadd.f32 1.0, %v4892_v16 }
0x2abd   :  { %v2679_v6 = vmul.f32 0.5, %v2678_v55 }
0x2abf   :  { %v2681_v63 = vmul.f32 %v2679_v6, %v5840_v13 }
0x2b2b   :  { %v2684_v38 = vpop.permute.xlu1 %2683 }
0x2b2c   :  { %v2686_v26 = vmul.f32 %v2684_v38, %v2679_v6 }
0x2b2e   :  { %2688 = vrot.lane.b32.xlu0 %v2686_v26, %s4957_s18 }
0x2b32   :  { %2360 = vrot.lane.b32.xlu0 %v5884_v33, %s4957_s18 }
0x2b36   :  { %2702 = vrot.lane.b32.xlu0 %v5884_v33, %s4958_s20 }
0x2ba0   :  { %v2689_v27 = vpop.permute.xlu0 %2688 }
0x2ba1   :  { %v5995_v24 = vadd.f32 %v2689_v27, %v2681_v63 }
0x2ba3   :  { %4893 = vtanh.f32 %v5995_v24 }
0x2ba4   :  { %v2361_v35 = vpop.permute.xlu0 %2360 }
0x2ba5   :  { %4335 = vmatmul.mubr.msk.f32.vlgmr.msra.gmra.mrb[18].mxu1 %vm70_vm0, %v2361_v35 }
0x2ba6   :  { %4708 = vmatpush3.bf16.msra.mxu1 %v5302_v42  ;;  %4380 = vmatprep.mubr.msk.f32.mxu1 %vm4959_vm10, %v6307_v29 }
0x2ba7   :  { %4709 = vmatprep.subr.bf16.mxu1 %v6308_v54 }
0x2ba8   :  { %v2703_v58 = vpop.permute.xlu0 %2702 }
0x2baa   :  { %4711 = vmatpush3.bf16.msra.mxu1 %v5308_v47 }
0x2bab   :  { %4712 = vmatprep.subr.bf16.mxu1 %v6308_v54 }
0x2bad   :  { %v4894_v13 = vpop.eup %4893 }
0x2bae   :  { %2694 = vrot.lane.b32.xlu1 %v4894_v13, %s4958_s20  ;;  %4714 = vmatpush3.bf16.msra.mxu1 %v5318_v43 }
0x2baf   :  { %4715 = vmatprep.subr.bf16.mxu1 %v6308_v54 }
0x2bb2   :  { %4717 = vmatpush3.bf16.msra.mxu1 %v5329_v57 }
0x2bb3   :  { %4718 = vmatprep.subr.bf16.mxu1 %v6308_v54 }
0x2c20   :  { %v2695_v33 = vpop.permute.xlu1 %2694 }
0x2c21   :  { %v6010_v5 = vmul.f32 %v2695_v33, %v2679_v6 }
0x2c23   :  { %2699 = vrot.lane.b32.xlu1 %v6010_v5, %s4957_s18 }
0x2c78   :  { %v2430_v62 = vpop.f32.mrb[18].mxu1 }
0x2c79   :  { %v2431_v30 = vadd.f32 %v5862_v40, %v2430_v62  ;;  %v4336_v50 = vpop.f32.mrb[19].mxu1 }
0x2c7b   :  { %3818 = vst [vmem:[%s6277_s13 + $0x20] sm:$0xff] %v2431_v30 }
0x2c95   :  { %v2700_v14 = vpop.permute.xlu1 %2699 }
0x2c96   :  { %v2705_v32 = vsel %vm70_vm0, %v2700_v14, %v2703_v58 }
0x2c97   :  { %4381 = vmatmul.mubr.msk.f32.vlgmr.msra.gmra.mrb[20].mxu1 %vm361_vm11, %v2705_v32 }
0x2c98   :  { %4720 = vmatpush3.bf16.msra.mxu1 %v5434_v2  ;;  %4391 = vmatprep.mubr.msk.f32.mxu1 %vm4959_vm10, %v6307_v29 }
0x2c99   :  { %4721 = vmatprep.subr.bf16.mxu1 %v6308_v54 }
0x2c9c   :  { %4723 = vmatpush3.bf16.msra.mxu1 %v5445_v25 }
0x2c9d   :  { %4742 = vmatprep.subr.bf16.mxu1 %v6308_v54 }
0x2d6a   :  { %v2775_v15 = vpop.f32.mrb[20].mxu1 }
0x2d6b   :  { %v2776_v48 = vadd.f32 %v5759_v3, %v2775_v15  ;;  %v4382_v10 = vpop.f32.mrb[21].mxu1 }
0x2d6d   :  { %4895 = vtanh.f32 %v2776_v48  ;;  %v2779_v51 = vmul.f32 0.5, %v2776_v48  ;;  %v3824_v48 = vld [vmem:[%s6270_s0 + $0x30] sm:$0xff] }
0x2d6f   :  { %4897 = vtanh.f32 %v2779_v51 }
0x2d77   :  { %v4896_v8 = vpop.eup %4895 }
0x2d78   :  { %2786 = vrot.lane.b32.xlu1 %v4896_v8, %s4958_s20 }
0x2d79   :  { %v4898_v19 = vpop.eup %4897 }
0x2d7a   :  { %v2781_v1 = vadd.f32 1.0, %v4898_v19 }
0x2d7c   :  { %v2782_v61 = vmul.f32 0.5, %v2781_v1 }
0x2d7e   :  { %v2784_v11 = vmul.f32 %v2782_v61, %v5880_v0 }
0x2dea   :  { %v2787_v59 = vpop.permute.xlu1 %2786 }
0x2deb   :  { %v2789_v7 = vmul.f32 %v2787_v59, %v2782_v61 }
0x2ded   :  { %2791 = vrot.lane.b32.xlu0 %v2789_v7, %s4957_s18 }
0x2e5f   :  { %v2792_v56 = vpop.permute.xlu0 %2791 }
0x2e60   :  { %v6030_v45 = vadd.f32 %v2792_v56, %v2784_v11 }
0x2e62   :  { %4899 = vtanh.f32 %v6030_v45 }
0x2e6c   :  { %v4900_v3 = vpop.eup %4899 }
0x2e6d   :  { %2797 = vrot.lane.b32.xlu1 %v4900_v3, %s4958_s20 }
0x2edf   :  { %v2798_v53 = vpop.permute.xlu1 %2797 }
0x2ee0   :  { %v6034_v21 = vmul.f32 %v2798_v53, %v2782_v61  ;;  %v6322_v61 = vld [vmem:[#allocation2_spill] sm:$0xff] }
0x2ee2   :  { %v2880_v22 = vmul.f32 %v6034_v21, %v5362_v37 }
0x2ee4   :  { %2882 = vrot.lane.b32.xlu0 %v2880_v22, %s4957_s18 }
0x2f56   :  { %v2883_v18 = vpop.permute.xlu0 %2882 }
0x2f57   :  { %v2885_v16 = vsel %vm70_vm0, %v2883_v18, 0.0  ;;  %v6323_v18 = vld [vmem:[#allocation3_spill] sm:$0xff] }
0x2f58   :  { %2886 = vadd.xlane.f32.xlu1 %v2885_v16 }
0x2fe5   :  { %v2887_v0 = vpop.xlane.xlu1 %2886 }
0x2fe6   :  { %v2888_v55 = vadd.f32 %v2887_v0, %v5127_v60  ;;  %v6324_v0 = vld [vmem:[#allocation5_spill] sm:$0xff] }
0x2fe8   :  { %v2889_v6 = vsel %vm204_vm9, %v2888_v55, -inf }
0x2fe9   :  { %2890 = vmax.xlane.f32.xlu0 %v2889_v6 }
0x3076   :  { %v2891_v38 = vpop.xlane.xlu0 %2890 }
0x3077   :  { %v2892_v26 = vsub.f32 %v2888_v55, %v2891_v38 }
0x3079   :  { %v2893_v63 = vmul.f32 1.442695, %v2892_v26 }
0x307b   :  { %4901 = vpow2.f32 %v2893_v63 }
0x3085   :  { %v4902_v27 = vpop.eup %4901 }
0x3086   :  { %v2895_v35 = vsel %vm204_vm9, %v4902_v27, 0.0 }
0x3087   :  { %2896 = vadd.xlane.f32.xlu0 %v2895_v35 }
0x3114   :  { %v2897_v13 = vpop.xlane.xlu0 %2896 }
0x3115   :  { %4903 = vrcp.f32 %v2897_v13 }
0x311f   :  { %v4904_v33 = vpop.eup %4903 }
0x3120   :  { %v2899_v62 = vmul.f32 %v4904_v33, %v4902_v27 }
0x3122   :  { %v2910_v30 = vrot.slane %v2899_v62, %v5133_v9  ;;  %v2903_v50 = vrot.slane %v2899_v62, %v5136_v12  ;;  %v2917_v58 = vrot.slane %v2899_v62, %v5141_v17  ;;  %v2931_v14 = vrot.slane %v2899_v62, %v5176_v36 }
0x3123   :  { %v2924_v32 = vrot.slane %v2899_v62, %v5157_v28  ;;  %v2945_v15 = vrot.slane %v2899_v62, %v5144_v20  ;;  %v2938_v10 = vrot.slane %v2899_v62, %v5191_v41  ;;  %v2952_v8 = vrot.slane %v2899_v62, %v5205_v46 }
0x3124   :  { %2912 = vbcast.lane.b32.xlu1 %v2910_v30, 256  ;;  %2905 = vbcast.lane.b32.xlu0 %v2903_v50, 256  ;;  %v6325_v30 = vld [vmem:[#allocation4_spill] sm:$0xff] }
0x3128   :  { %2919 = vbcast.lane.b32.xlu1 %v2917_v58, 256  ;;  %2933 = vbcast.lane.b32.xlu0 %v2931_v14, 256  ;;  %v6326_v58 = vld [vmem:[#allocation7_spill] sm:$0xff] }
0x312c   :  { %2926 = vbcast.lane.b32.xlu1 %v2924_v32, 256  ;;  %2947 = vbcast.lane.b32.xlu0 %v2945_v15, 256 }
0x3130   :  { %2940 = vbcast.lane.b32.xlu1 %v2938_v10, 256  ;;  %3037 = vrot.lane.b32.xlu0 %v3824_v48, %s4957_s18 }
0x3134   :  { %2954 = vbcast.lane.b32.xlu1 %v2952_v8, 256 }
0x3138   :  { %3040 = vrot.lane.b32.xlu1 %v6010_v5, %s4961_s4 }
0x3196   :  { %v2913_v51 = vpop.permute.xlu1 %2912  ;;  %v2906_v19 = vpop.permute.xlu0 %2905 }
0x3197   :  { %v2957_v1 = vmul.f32 %v5910_v31, %v2913_v51  ;;  %v2956_v59 = vmul.f32 %v6322_v61, %v2906_v19 }
0x3199   :  { %v2971_v7 = vsel %vm70_vm0, %v2957_v1, 0.0  ;;  %v2964_v11 = vsel %vm70_vm0, %v2956_v59, 0.0 }
0x319a   :  { %v2972_v56 = vrot.slane %v2971_v7, 4  ;;  %v2965_v3 = vrot.slane %v2964_v11, 4  ;;  %v2920_v53 = vpop.permute.xlu1 %2919  ;;  %v2934_v22 = vpop.permute.xlu0 %2933 }
0x319b   :  { %v2958_v16 = vmul.f32 %v6323_v18, %v2920_v53  ;;  %v2960_v55 = vmul.f32 %v6324_v0, %v2934_v22 }
0x319c   :  { %v2973_v6 = vadd.f32 %v2972_v56, %v2971_v7  ;;  %v2966_v5 = vadd.f32 %v2965_v3, %v2964_v11  ;;  %v6327_v56 = vld [vmem:[#allocation6_spill] sm:$0xff] }
0x319d   :  { %v2978_v38 = vsel %vm70_vm0, %v2958_v16, 0.0  ;;  %v2992_v26 = vsel %vm70_vm0, %v2960_v55, 0.0 }
0x319e   :  { %v2974_v63 = vrot.slane %v2973_v6, 2  ;;  %v2967_v27 = vrot.slane %v2966_v5, 2  ;;  %v2979_v35 = vrot.slane %v2978_v38, 4  ;;  %v2993_v13 = vrot.slane %v2992_v26, 4  ;;  %v2927_v33 = vpop.permute.xlu1 %2926  ;;  %v2948_v62 = vpop.permute.xlu0 %2947 }
0x319f   :  { %v2959_v50 = vmul.f32 %v6325_v30, %v2927_v33  ;;  %v2962_v14 = vmul.f32 %v6326_v58, %v2948_v62 }
0x31a0   :  { %v2975_v32 = vadd.f32 %v2974_v63, %v2973_v6  ;;  %v2980_v15 = vadd.f32 %v2979_v35, %v2978_v38  ;;  %v2994_v48 = vadd.f32 %v2993_v13, %v2992_v26  ;;  %v2968_v10 = vadd.f32 %v2967_v27, %v2966_v5 }
0x31a1   :  { %v2985_v8 = vsel %vm70_vm0, %v2959_v50, 0.0  ;;  %v3006_v51 = vsel %vm70_vm0, %v2962_v14, 0.0 }
0x31a2   :  { %v2981_v19 = vrot.slane %v2980_v15, 2  ;;  %v2941_v1 = vpop.permute.xlu1 %2940  ;;  %v2995_v59 = vrot.slane %v2994_v48, 2  ;;  %v2986_v7 = vrot.slane %v2985_v8, 4  ;;  %v3007_v11 = vrot.slane %v3006_v51, 4 }
0x31a3   :  { %v2961_v3 = vmul.f32 %v6327_v56, %v2941_v1  ;;  %v2976_v53 = vrot.slane %v2975_v32, 1  ;;  %v2969_v16 = vrot.slane %v2968_v10, 1 }
0x31a4   :  { %v2982_v22 = vadd.f32 %v2981_v19, %v2980_v15  ;;  %v2987_v55 = vadd.f32 %v2986_v7, %v2985_v8  ;;  %v3008_v33 = vadd.f32 %v3007_v11, %v3006_v51  ;;  %v2996_v63 = vadd.f32 %v2995_v59, %v2994_v48 }
0x31a5   :  { %v2999_v6 = vsel %vm70_vm0, %v2961_v3, 0.0  ;;  %v2977_v50 = vadd.f32 %v2976_v53, %v2975_v32  ;;  %v2970_v14 = vadd.f32 %v2969_v16, %v2968_v10 }
0x31a6   :  { %v2983_v38 = vrot.slane %v2982_v22, 1  ;;  %v3000_v5 = vrot.slane %v2999_v6, 4  ;;  %v2955_v26 = vpop.permute.xlu1 %2954  ;;  %v2988_v27 = vrot.slane %v2987_v55, 2  ;;  %v3009_v35 = vrot.slane %v3008_v33, 2 }
0x31a7   :  { %v2963_v13 = vmul.f32 %v5958_v4, %v2955_v26  ;;  %v2997_v51 = vrot.slane %v2996_v63, 1  ;;  %v3028_v48 = vsel %vm142_vm1, %v2977_v50, %v2970_v14 }
0x31a8   :  { %v3001_v62 = vadd.f32 %v3000_v5, %v2999_v6  ;;  %v2989_v58 = vadd.f32 %v2988_v27, %v2987_v55  ;;  %v2984_v15 = vadd.f32 %v2983_v38, %v2982_v22  ;;  %v3010_v11 = vadd.f32 %v3009_v35, %v3008_v33  ;;  %v3038_v35 = vpop.permute.xlu0 %3037 }
0x31a9   :  { %v3013_v1 = vsel %vm70_vm0, %v2963_v13, 0.0  ;;  %v2998_v32 = vadd.f32 %v2997_v51, %v2996_v63 }
0x31aa   :  { %v3002_v19 = vrot.slane %v3001_v62, 2  ;;  %v3014_v8 = vrot.slane %v3013_v1, 4  ;;  %v2990_v7 = vrot.slane %v2989_v58, 1  ;;  %v3029_v0 = vsel %vm144_vm2, %v2984_v15, %v3028_v48 }
0x31ab   :  { %v3011_v53 = vrot.slane %v3010_v11, 1 }
0x31ac   :  { %v3003_v3 = vadd.f32 %v3002_v19, %v3001_v62  ;;  %v3015_v56 = vadd.f32 %v3014_v8, %v3013_v1  ;;  %v2991_v59 = vadd.f32 %v2990_v7, %v2989_v58  ;;  %v3041_v62 = vpop.permute.xlu1 %3040 }
0x31ad   :  { %v3012_v5 = vadd.f32 %v3011_v53, %v3010_v11 }
0x31ae   :  { %v3004_v26 = vrot.slane %v3003_v3, 1  ;;  %v3016_v6 = vrot.slane %v3015_v56, 2  ;;  %v3030_v10 = vsel %vm146_vm3, %v2991_v59, %v3029_v0 }
0x31af   :  { %v3031_v55 = vsel %vm148_vm4, %v2998_v32, %v3030_v10  ;;  %v6143_v10 = vld [vmem:[%s6274_s10] ss:$0 sm:$0xff] }
0x31b0   :  { %v3005_v16 = vadd.f32 %v3004_v26, %v3003_v3  ;;  %v3017_v22 = vadd.f32 %v3016_v6, %v3015_v56 }
0x31b2   :  { %v3018_v38 = vrot.slane %v3017_v22, 1  ;;  %v3032_v33 = vsel %vm150_vm5, %v3005_v16, %v3031_v55 }
0x31b3   :  { %v3033_v58 = vsel %vm152_vm6, %v3012_v5, %v3032_v33 }
0x31b4   :  { %v3019_v27 = vadd.f32 %v3018_v38, %v3017_v22 }
0x31b6   :  { %v3034_v13 = vsel %vm154_vm7, %v3019_v27, %v3033_v58 }
0x31b7   :  { %v3043_v63 = vsel %vm70_vm0, %v3034_v13, %v3038_v35 }
0x31b8   :  { %v3044_v0 = vsel %vm361_vm11, %v3043_v63, %v3041_v62 }
0x31b9   :  { %4419 = vmatmul.mubr.msk.f32.vlgmr.msra.gmra.mrb[12].mxu0 %vm369_vm12, %v3044_v0 }
0x31ba   :  { %4762 = vmatpush3.bf16.msra.mxu0 %v5152_v23  ;;  %4475 = vmatprep.mubr.msk.f32.mxu0 %vm4959_vm10, %v6307_v29 }
0x31bb   :  { %4763 = vmatprep.subr.bf16.mxu0 %v6308_v54 }
0x31be   :  { %4765 = vmatpush3.bf16.msra.mxu0 %v5172_v34  ;;  %v6099_v34 = vld [vmem:[%s6272_s9] ss:$0 sm:$0xff] }
0x31bf   :  { %4766 = vmatprep.subr.bf16.mxu0 %v6308_v54 }
0x31c2   :  { %4768 = vmatpush3.bf16.msra.mxu0 %v5187_v39 }
0x31c3   :  { %4769 = vmatprep.subr.bf16.mxu0 %v6308_v54 }
0x31c6   :  { %4771 = vmatpush3.bf16.msra.mxu0 %v5201_v44 }
0x31c7   :  { %4772 = vmatprep.subr.bf16.mxu0 %v6308_v54 }
0x31ca   :  { %4774 = vmatpush3.bf16.msra.mxu0 %v5215_v49 }
0x31cb   :  { %4775 = vmatprep.subr.bf16.mxu0 %v6308_v54 }
0x31ce   :  { %4777 = vmatpush3.bf16.msra.mxu0 %v5225_v52 }
0x328c   :  { %v3114_v23 = vpop.f32.mrb[12].mxu0 }
0x328d   :  { %v3115_v39 = vadd.f32 %v6099_v34, %v3114_v23  ;;  %v4420_v56 = vpop.f32.mrb[13].mxu0 }
0x328f   :  { %4905 = vtanh.f32 %v3115_v39  ;;  %v3118_v44 = vmul.f32 0.5, %v3115_v39 }
0x3291   :  { %4907 = vtanh.f32 %v3118_v44 }
0x3299   :  { %v4906_v50 = vpop.eup %4905 }
0x329a   :  { %3125 = vrot.lane.b32.xlu0 %v4906_v50, %s4958_s20 }
0x329b   :  { %v4908_v49 = vpop.eup %4907 }
0x329c   :  { %v3120_v14 = vadd.f32 1.0, %v4908_v49 }
0x329e   :  { %v3121_v1 = vmul.f32 0.5, %v3120_v14 }
0x32a0   :  { %v3123_v19 = vmul.f32 %v3121_v1, %v5995_v24 }
0x330c   :  { %v3126_v15 = vpop.permute.xlu0 %3125 }
0x330d   :  { %v3128_v52 = vmul.f32 %v3126_v15, %v3121_v1 }
0x330f   :  { %3130 = vrot.lane.b32.xlu1 %v3128_v52, %s4957_s18 }
0x3313   :  { %2802 = vrot.lane.b32.xlu1 %v6034_v21, %s4957_s18 }
0x3317   :  { %3144 = vrot.lane.b32.xlu1 %v6034_v21, %s4958_s20 }
0x3381   :  { %v3131_v8 = vpop.permute.xlu1 %3130 }
0x3382   :  { %v6109_v51 = vadd.f32 %v3131_v8, %v3123_v19 }
0x3384   :  { %4909 = vtanh.f32 %v6109_v51 }
0x3385   :  { %v2803_v7 = vpop.permute.xlu1 %2802 }
0x3386   :  { %4392 = vmatmul.mubr.msk.f32.vlgmr.msra.gmra.mrb[22].mxu1 %vm70_vm0, %v2803_v7 }
0x3387   :  { %4744 = vmatpush3.bf16.msra.mxu1 %v5302_v42  ;;  %4437 = vmatprep.mubr.msk.f32.mxu1 %vm4959_vm10, %v6307_v29 }
0x3388   :  { %4745 = vmatprep.subr.bf16.mxu1 %v6308_v54 }
0x3389   :  { %v3145_v26 = vpop.permute.xlu1 %3144 }
0x338b   :  { %4747 = vmatpush3.bf16.msra.mxu1 %v5308_v47 }
0x338c   :  { %4748 = vmatprep.subr.bf16.mxu1 %v6308_v54 }
0x338e   :  { %v4910_v24 = vpop.eup %4909 }
0x338f   :  { %3136 = vrot.lane.b32.xlu0 %v4910_v24, %s4958_s20  ;;  %4750 = vmatpush3.bf16.msra.mxu1 %v5318_v43 }
0x3390   :  { %4751 = vmatprep.subr.bf16.mxu1 %v6308_v54 }
0x3393   :  { %4753 = vmatpush3.bf16.msra.mxu1 %v5329_v57 }
0x3394   :  { %4754 = vmatprep.subr.bf16.mxu1 %v6308_v54 }
0x3401   :  { %v3137_v21 = vpop.permute.xlu0 %3136 }
0x3402   :  { %v6124_v11 = vmul.f32 %v3137_v21, %v3121_v1 }
0x3404   :  { %3141 = vrot.lane.b32.xlu0 %v6124_v11, %s4957_s18 }
0x3459   :  { %v2872_v3 = vpop.f32.mrb[22].mxu1 }
0x345a   :  { %v2873_v48 = vadd.f32 %v5862_v40, %v2872_v3  ;;  %v4393_v59 = vpop.f32.mrb[23].mxu1 }
0x345c   :  { %3823 = vst [vmem:[%s6277_s13 + $0x28] sm:$0xff] %v2873_v48 }
0x3476   :  { %v3142_v6 = vpop.permute.xlu0 %3141 }
0x3477   :  { %v3147_v32 = vsel %vm70_vm0, %v3142_v6, %v3145_v26 }
0x3478   :  { %4438 = vmatmul.mubr.msk.f32.vlgmr.msra.gmra.mrb[24].mxu1 %vm361_vm11, %v3147_v32 }
0x3479   :  { %4756 = vmatpush3.bf16.msra.mxu1 %v5434_v2  ;;  %4448 = vmatprep.mubr.msk.f32.mxu1 %vm4959_vm10, %v6307_v29 }
0x347a   :  { %4757 = vmatprep.subr.bf16.mxu1 %v6308_v54 }
0x347d   :  { %4759 = vmatpush3.bf16.msra.mxu1 %v5445_v25 }
0x347e   :  { %4778 = vmatprep.subr.bf16.mxu1 %v6308_v54 }
0x354b   :  { %v3217_v40 = vpop.f32.mrb[24].mxu1 }
0x354c   :  { %v3218_v53 = vadd.f32 %v6143_v10, %v3217_v40  ;;  %v4439_v16 = vpop.f32.mrb[25].mxu1 }
0x354e   :  { %4911 = vtanh.f32 %v3218_v53  ;;  %v3221_v55 = vmul.f32 0.5, %v3218_v53 }
0x3550   :  { %4913 = vtanh.f32 %v3221_v55 }
0x3558   :  { %v4912_v22 = vpop.eup %4911 }
0x3559   :  { %3228 = vrot.lane.b32.xlu0 %v4912_v22, %s4958_s20 }
0x355a   :  { %v4914_v38 = vpop.eup %4913 }
0x355b   :  { %v3223_v33 = vadd.f32 1.0, %v4914_v38 }
0x355d   :  { %v3224_v5 = vmul.f32 0.5, %v3223_v33 }
0x355f   :  { %v3226_v58 = vmul.f32 %v3224_v5, %v6030_v45 }
0x35cb   :  { %v3229_v27 = vpop.permute.xlu0 %3228 }
0x35cc   :  { %v3231_v35 = vmul.f32 %v3229_v27, %v3224_v5 }
0x35ce   :  { %3233 = vrot.lane.b32.xlu1 %v3231_v35, %s4957_s18 }
0x3640   :  { %v3234_v13 = vpop.permute.xlu1 %3233 }
0x3641   :  { %v6149_v62 = vadd.f32 %v3234_v13, %v3226_v58  ;;  %v6328_v13 = vld [vmem:[#allocation5_spill] sm:$0xff] }
0x3643   :  { %4915 = vtanh.f32 %v6149_v62 }
0x364d   :  { %v4916_v63 = vpop.eup %4915 }
0x364e   :  { %3239 = vrot.lane.b32.xlu0 %v4916_v63, %s4958_s20 }
0x36c0   :  { %v3240_v0 = vpop.permute.xlu0 %3239 }
0x36c1   :  { %v6153_v23 = vmul.f32 %v3240_v0, %v3224_v5  ;;  %v6329_v0 = vld [vmem:[#allocation6_spill] sm:$0xff] }
0x36c3   :  { %v3322_v39 = vmul.f32 %v6153_v23, %v5362_v37 }
0x36c5   :  { %3324 = vrot.lane.b32.xlu1 %v3322_v39, %s4957_s18 }
0x3737   :  { %v3325_v56 = vpop.permute.xlu1 %3324 }
0x3738   :  { %v3327_v50 = vsel %vm70_vm0, %v3325_v56, 0.0 }
0x3739   :  { %3328 = vadd.xlane.f32.xlu0 %v3327_v50 }
0x37c6   :  { %v3329_v45 = vpop.xlane.xlu0 %3328 }
0x37c7   :  { %v3330_v44 = vadd.f32 %v3329_v45, %v5127_v60 }
0x37c9   :  { %v3331_v49 = vsel %vm204_vm9, %v3330_v44, -inf }
0x37ca   :  { %3332 = vmax.xlane.f32.xlu1 %v3331_v49 }
0x3857   :  { %v3333_v14 = vpop.xlane.xlu1 %3332 }
0x3858   :  { %v3334_v1 = vsub.f32 %v3330_v44, %v3333_v14 }
0x385a   :  { %v3335_v15 = vmul.f32 1.442695, %v3334_v1 }
0x385c   :  { %4917 = vpow2.f32 %v3335_v15 }
0x3866   :  { %v4918_v52 = vpop.eup %4917 }
0x3867   :  { %v3337_v19 = vsel %vm204_vm9, %v4918_v52, 0.0 }
0x3868   :  { %3338 = vadd.xlane.f32.xlu0 %v3337_v19 }
0x38f5   :  { %v3339_v37 = vpop.xlane.xlu0 %3338 }
0x38f6   :  { %4919 = vrcp.f32 %v3339_v37 }
0x3900   :  { %v4920_v8 = vpop.eup %4919 }
0x3901   :  { %v3341_v7 = vmul.f32 %v4920_v8, %v4918_v52 }
0x3903   :  { %v3352_v24 = vrot.slane %v3341_v7, %v5133_v9  ;;  %v3345_v21 = vrot.slane %v3341_v7, %v5136_v12  ;;  %v3359_v60 = vrot.slane %v3341_v7, %v5141_v17  ;;  %v3366_v3 = vrot.slane %v3341_v7, %v5157_v28  ;;  %v3829_v12 = vld [vmem:[%s6270_s0 + $0x38] sm:$0xff] }
0x3904   :  { %v3373_v48 = vrot.slane %v3341_v7, %v5176_v36  ;;  %v3380_v59 = vrot.slane %v3341_v7, %v5191_v41  ;;  %v3387_v26 = vrot.slane %v3341_v7, %v5144_v20  ;;  %v3394_v9 = vrot.slane %v3341_v7, %v5205_v46  ;;  %v6330_v7 = vld [vmem:[#allocation7_spill] sm:$0xff] }
0x3905   :  { %3354 = vbcast.lane.b32.xlu1 %v3352_v24, 256  ;;  %3347 = vbcast.lane.b32.xlu0 %v3345_v21, 256 }
0x3909   :  { %3361 = vbcast.lane.b32.xlu1 %v3359_v60, 256  ;;  %3368 = vbcast.lane.b32.xlu0 %v3366_v3, 256 }
0x390d   :  { %3375 = vbcast.lane.b32.xlu1 %v3373_v48, 256  ;;  %3382 = vbcast.lane.b32.xlu0 %v3380_v59, 256 }
0x3911   :  { %3389 = vbcast.lane.b32.xlu1 %v3387_v26, 256  ;;  %3396 = vbcast.lane.b32.xlu0 %v3394_v9, 256 }
0x3915   :  { %3482 = vrot.lane.b32.xlu0 %v6124_v11, %s4961_s4  ;;  %3479 = vrot.lane.b32.xlu1 %v3829_v12, %s4957_s18 }
0x3977   :  { %v3355_v17 = vpop.permute.xlu1 %3354  ;;  %v3348_v28 = vpop.permute.xlu0 %3347 }
0x3978   :  { %v3399_v36 = vmul.f32 %v5910_v31, %v3355_v17  ;;  %v3398_v41 = vmul.f32 %v6322_v61, %v3348_v28 }
0x397a   :  { %v3413_v20 = vsel %vm70_vm0, %v3399_v36, 0.0  ;;  %v3406_v46 = vsel %vm70_vm0, %v3398_v41, 0.0 }
0x397b   :  { %v3414_v6 = vrot.slane %v3413_v20, 4  ;;  %v3407_v32 = vrot.slane %v3406_v46, 4  ;;  %v3362_v40 = vpop.permute.xlu1 %3361  ;;  %v3369_v53 = vpop.permute.xlu0 %3368 }
0x397c   :  { %v3400_v16 = vmul.f32 %v6323_v18, %v3362_v40  ;;  %v3401_v11 = vmul.f32 %v6325_v30, %v3369_v53 }
0x397d   :  { %v3415_v22 = vadd.f32 %v3414_v6, %v3413_v20  ;;  %v3408_v55 = vadd.f32 %v3407_v32, %v3406_v46 }
0x397e   :  { %v3420_v38 = vsel %vm70_vm0, %v3400_v16, 0.0  ;;  %v3427_v31 = vsel %vm70_vm0, %v3401_v11, 0.0 }
0x397f   :  { %v3416_v33 = vrot.slane %v3415_v22, 2  ;;  %v3409_v61 = vrot.slane %v3408_v55, 2  ;;  %v3421_v5 = vrot.slane %v3420_v38, 4  ;;  %v3428_v27 = vrot.slane %v3427_v31, 4  ;;  %v3376_v35 = vpop.permute.xlu1 %3375  ;;  %v3383_v58 = vpop.permute.xlu0 %3382 }
0x3980   :  { %v3402_v63 = vmul.f32 %v6328_v13, %v3376_v35  ;;  %v3403_v39 = vmul.f32 %v6329_v0, %v3383_v58 }
0x3981   :  { %v3417_v56 = vadd.f32 %v3416_v33, %v3415_v22  ;;  %v3410_v18 = vadd.f32 %v3409_v61, %v3408_v55  ;;  %v3422_v50 = vadd.f32 %v3421_v5, %v3420_v38  ;;  %v3429_v30 = vadd.f32 %v3428_v27, %v3427_v31 }
0x3982   :  { %v3434_v45 = vsel %vm70_vm0, %v3402_v63, 0.0  ;;  %v3441_v44 = vsel %vm70_vm0, %v3403_v39, 0.0 }
0x3983   :  { %v3418_v49 = vrot.slane %v3417_v56, 1  ;;  %v3411_v14 = vrot.slane %v3410_v18, 1  ;;  %v3423_v1 = vrot.slane %v3422_v50, 2  ;;  %v3430_v15 = vrot.slane %v3429_v30, 2  ;;  %v3390_v52 = vpop.permute.xlu1 %3389  ;;  %v3397_v19 = vpop.permute.xlu0 %3396 }
0x3984   :  { %v3435_v37 = vrot.slane %v3434_v45, 4  ;;  %v3442_v8 = vrot.slane %v3441_v44, 4  ;;  %v3404_v24 = vmul.f32 %v6330_v7, %v3390_v52  ;;  %v3405_v21 = vmul.f32 %v5958_v4, %v3397_v19 }
0x3985   :  { %v3419_v60 = vadd.f32 %v3418_v49, %v3417_v56  ;;  %v3424_v3 = vadd.f32 %v3423_v1, %v3422_v50  ;;  %v3431_v48 = vadd.f32 %v3430_v15, %v3429_v30  ;;  %v3412_v17 = vadd.f32 %v3411_v14, %v3410_v18 }
0x3986   :  { %v3436_v59 = vadd.f32 %v3435_v37, %v3434_v45  ;;  %v3443_v26 = vadd.f32 %v3442_v8, %v3441_v44  ;;  %v3448_v9 = vsel %vm70_vm0, %v3404_v24, 0.0  ;;  %v3455_v12 = vsel %vm70_vm0, %v3405_v21, 0.0 }
0x3987   :  { %v3425_v28 = vrot.slane %v3424_v3, 1  ;;  %v3432_v36 = vrot.slane %v3431_v48, 1  ;;  %v3449_v41 = vrot.slane %v3448_v9, 4  ;;  %v3456_v6 = vrot.slane %v3455_v12, 4  ;;  %v3480_v50 = vpop.permute.xlu1 %3479  ;;  %v3483_v49 = vpop.permute.xlu0 %3482 }
0x3988   :  { %v3437_v20 = vrot.slane %v3436_v59, 2  ;;  %v3444_v46 = vrot.slane %v3443_v26, 2  ;;  %v3470_v11 = vsel %vm142_vm1, %v3419_v60, %v3412_v17 }
0x3989   :  { %v3426_v32 = vadd.f32 %v3425_v28, %v3424_v3  ;;  %v3450_v40 = vadd.f32 %v3449_v41, %v3448_v9  ;;  %v3457_v16 = vadd.f32 %v3456_v6, %v3455_v12  ;;  %v3433_v22 = vadd.f32 %v3432_v36, %v3431_v48 }
0x398a   :  { %v3438_v53 = vadd.f32 %v3437_v20, %v3436_v59  ;;  %v3445_v4 = vadd.f32 %v3444_v46, %v3443_v26 }
0x398b   :  { %v3451_v55 = vrot.slane %v3450_v40, 2  ;;  %v3471_v38 = vsel %vm144_vm2, %v3426_v32, %v3470_v11  ;;  %v3458_v61 = vrot.slane %v3457_v16, 2 }
0x398c   :  { %v3439_v31 = vrot.slane %v3438_v53, 1  ;;  %v3446_v33 = vrot.slane %v3445_v4, 1  ;;  %v3472_v13 = vsel %vm146_vm3, %v3433_v22, %v3471_v38 }
0x398d   :  { %v3452_v5 = vadd.f32 %v3451_v55, %v3450_v40  ;;  %v3459_v58 = vadd.f32 %v3458_v61, %v3457_v16 }
0x398e   :  { %v3440_v27 = vadd.f32 %v3439_v31, %v3438_v53  ;;  %v3447_v35 = vadd.f32 %v3446_v33, %v3445_v4 }
0x398f   :  { %v3453_v63 = vrot.slane %v3452_v5, 1  ;;  %v3460_v0 = vrot.slane %v3459_v58, 1 }
0x3990   :  { %v3473_v39 = vsel %vm148_vm4, %v3440_v27, %v3472_v13 }
0x3991   :  { %v3454_v56 = vadd.f32 %v3453_v63, %v3452_v5  ;;  %v3461_v18 = vadd.f32 %v3460_v0, %v3459_v58  ;;  %v3474_v30 = vsel %vm150_vm5, %v3447_v35, %v3473_v39 }
0x3993   :  { %v3475_v45 = vsel %vm152_vm6, %v3454_v56, %v3474_v30 }
0x3994   :  { %v3476_v44 = vsel %vm154_vm7, %v3461_v18, %v3475_v45 }
0x3995   :  { %v3485_v14 = vsel %vm70_vm0, %v3476_v44, %v3480_v50 }
0x3996   :  { %v3486_v1 = vsel %vm361_vm11, %v3485_v14, %v3483_v49 }
0x3997   :  { %4476 = vmatmul.mubr.msk.f32.vlgmr.msra.gmra.mrb[14].mxu0 %vm369_vm12, %v3486_v1 }
0x3a6a   :  { %v3556_v15 = vpop.f32.mrb[14].mxu0 }
0x3a6b   :  { %v3557_v52 = vadd.f32 %v6099_v34, %v3556_v15  ;;  %v4477_v19 = vpop.f32.mrb[15].mxu0 }
0x3a6d   :  { %4921 = vtanh.f32 %v3557_v52  ;;  %v3560_v8 = vmul.f32 0.5, %v3557_v52 }
0x3a6f   :  { %4923 = vtanh.f32 %v3560_v8 }
0x3a77   :  { %v4922_v37 = vpop.eup %4921 }
0x3a78   :  { %3567 = vrot.lane.b32.xlu1 %v4922_v37, %s4958_s20 }
0x3a79   :  { %v4924_v7 = vpop.eup %4923 }
0x3a7a   :  { %v3562_v24 = vadd.f32 1.0, %v4924_v7 }
0x3a7c   :  { %v3563_v21 = vmul.f32 0.5, %v3562_v24 }
0x3a7e   :  { %v3565_v34 = vmul.f32 %v3563_v21, %v6109_v51 }
0x3aea   :  { %v3568_v60 = vpop.permute.xlu1 %3567 }
0x3aeb   :  { %v3570_v3 = vmul.f32 %v3568_v60, %v3563_v21 }
0x3aed   :  { %3572 = vrot.lane.b32.xlu0 %v3570_v3, %s4957_s18 }
0x3af1   :  { %3244 = vrot.lane.b32.xlu0 %v6153_v23, %s4957_s18 }
0x3af5   :  { %3586 = vrot.lane.b32.xlu0 %v6153_v23, %s4958_s20 }
0x3b5f   :  { %v3573_v48 = vpop.permute.xlu0 %3572 }
0x3b60   :  { %v3575_v59 = vadd.f32 %v3573_v48, %v3565_v34 }
0x3b62   :  { %4925 = vtanh.f32 %v3575_v59 }
0x3b63   :  { %v3245_v26 = vpop.permute.xlu0 %3244 }
0x3b64   :  { %4449 = vmatmul.mubr.msk.f32.vlgmr.msra.gmra.mrb[26].mxu1 %vm70_vm0, %v3245_v26 }
0x3b65   :  { %4780 = vmatpush3.bf16.msra.mxu1 %v5302_v42  ;;  %4494 = vmatprep.mubr.msk.f32.mxu1 %vm4959_vm10, %v6307_v29 }
0x3b66   :  { %4781 = vmatprep.subr.bf16.mxu1 %v6308_v54 }
0x3b69   :  { %4783 = vmatpush3.bf16.msra.mxu1 %v5308_v47  ;;  %v4954_v47 = vld [vmem:[%s6276_s12] ss:$0 sm:$0xff] }
0x3b6a   :  { %4784 = vmatprep.subr.bf16.mxu1 %v6308_v54 }
0x3b6c   :  { %v4926_v23 = vpop.eup %4925 }
0x3b6d   :  { %3578 = vrot.lane.b32.xlu1 %v4926_v23, %s4958_s20  ;;  %4786 = vmatpush3.bf16.msra.mxu1 %v5318_v43  ;;  %v3587_v43 = vpop.permute.xlu0 %3586 }
0x3b6e   :  { %4787 = vmatprep.subr.bf16.mxu1 %v6308_v54 }
0x3b71   :  { %4789 = vmatpush3.bf16.msra.mxu1 %v5329_v57 }
0x3b72   :  { %4790 = vmatprep.subr.bf16.mxu1 %v6308_v54 }
0x3bdf   :  { %v3579_v42 = vpop.permute.xlu1 %3578 }
0x3be0   :  { %v3581_v51 = vmul.f32 %v3579_v42, %v3563_v21 }
0x3be2   :  { %3583 = vrot.lane.b32.xlu1 %v3581_v51, %s4957_s18 }
0x3c37   :  { %v3314_v9 = vpop.f32.mrb[26].mxu1 }
0x3c38   :  { %v3315_v12 = vadd.f32 %v4954_v47, %v3314_v9  ;;  %v4450_v17 = vpop.f32.mrb[27].mxu1 }
0x3c3a   :  { %3828 = vst [vmem:[%s6277_s13 + $0x30] sm:$0xff] %v3315_v12 }
0x3c54   :  { %v3584_v28 = vpop.permute.xlu1 %3583 }
0x3c55   :  { %v3589_v57 = vsel %vm70_vm0, %v3584_v28, %v3587_v43  ;;  %3762 = vst.msk [vmem:[%s6278_s14] sm:$0xff] %vm70_vm0, %v3584_v28 }
0x3c56   :  { %4495 = vmatmul.mubr.msk.f32.vlgmr.msra.gmra.mrb[28].mxu1 %vm361_vm11, %v3589_v57 }
0x3c57   :  { %4792 = vmatpush3.bf16.msra.mxu1 %v5434_v2  ;;  %4505 = vmatprep.mubr.msk.f32.mxu1 %vm4959_vm10, %v6307_v29 }
0x3c58   :  { %4793 = vmatprep.subr.bf16.mxu1 %v6308_v54 }
0x3c5b   :  { %4795 = vmatpush3.bf16.msra.mxu1 %v5445_v25 }
0x3d29   :  { %v3659_v36 = vpop.f32.mrb[28].mxu1 }
0x3d2a   :  { %v3660_v41 = vadd.f32 %v6143_v10, %v3659_v36  ;;  %v4496_v20 = vpop.f32.mrb[29].mxu1 }
0x3d2c   :  { %4927 = vtanh.f32 %v3660_v41  ;;  %v3663_v6 = vmul.f32 0.5, %v3660_v41 }
0x3d2e   :  { %4929 = vtanh.f32 %v3663_v6 }
0x3d36   :  { %v4928_v46 = vpop.eup %4927 }
0x3d37   :  { %3670 = vrot.lane.b32.xlu1 %v4928_v46, %s4958_s20 }
0x3d38   :  { %v4930_v32 = vpop.eup %4929 }
0x3d39   :  { %v3665_v40 = vadd.f32 1.0, %v4930_v32 }
0x3d3b   :  { %v3666_v2 = vmul.f32 0.5, %v3665_v40 }
0x3d3d   :  { %v3668_v29 = vmul.f32 %v3666_v2, %v6149_v62 }
0x3da9   :  { %v3671_v53 = vpop.permute.xlu1 %3670 }
0x3daa   :  { %v3673_v4 = vmul.f32 %v3671_v53, %v3666_v2 }
0x3dac   :  { %3675 = vrot.lane.b32.xlu0 %v3673_v4, %s4957_s18 }
0x3e1e   :  { %v3676_v25 = vpop.permute.xlu0 %3675 }
0x3e1f   :  { %v3678_v54 = vadd.f32 %v3676_v25, %v3668_v29 }
0x3e21   :  { %4931 = vtanh.f32 %v3678_v54 }
0x3e2b   :  { %v4932_v10 = vpop.eup %4931 }
0x3e2c   :  { %3681 = vrot.lane.b32.xlu1 %v4932_v10, %s4958_s20 }
0x3e30   :  { %3764 = vrot.lane.b32.xlu1 %v3575_v59, %s4961_s4 }
0x3e9e   :  { %v3682_v16 = vpop.permute.xlu1 %3681 }
0x3e9f   :  { %v3684_v11 = vmul.f32 %v3682_v16, %v3666_v2 }
0x3ea1   :  { %3686 = vrot.lane.b32.xlu0 %v3684_v11, %s4957_s18 }
0x3ea2   :  { %v3765_v22 = vpop.permute.xlu1 %3764 }
0x3ea3   :  { %3767 = vst.msk [vmem:[%s6279_s15] sm:$0xff] %vm70_vm0, %v3765_v22 }
0x3ea5   :  { %3772 = vrot.lane.b32.xlu0 %v3678_v54, %s4961_s4 }
0x3f13   :  { %v3687_v62 = vpop.permute.xlu0 %3686 }
0x3f14   :  { %3834 = vst.msk [vmem:[%s6278_s14 + $0x8] sm:$0xff] %vm70_vm0, %v3687_v62  ;;  %4506 = vmatmul.mubr.msk.f32.vlgmr.msra.gmra.mrb[30].mxu1 %vm70_vm0, %v3687_v62 }
0x3f17   :  { %v3773_v55 = vpop.permute.xlu0 %3772 }
0x3f18   :  { %3835 = vst.msk [vmem:[%s6279_s15 + $0x8] sm:$0xff] %vm70_vm0, %v3773_v55 }
0x3fe7   :  { %v3756_v38 = vpop.f32.mrb[30].mxu1 }
0x3fe8   :  { %v3757_v31 = vadd.f32 %v4954_v47, %v3756_v38  ;;  %v4507_v33 = vpop.f32.mrb[31].mxu1 }
0x3fea   :  { %3833 = vst [vmem:[%s6277_s13 + $0x38] sm:$0xff] %v3757_v31 }

</bundles_post_ra>
